<compile_context>
chip_gen: v6e
topology: v6e:2x2x1
jax: 0.10.0
libtpu: 0.0.40
codegen_flags: <defaults>
</compile_context>

<pallas_src>
import functools

import jax
import jax.numpy as jnp
from jax.experimental import pallas as pl
from jax.experimental.pallas import tpu as pltpu

_KS = (3, 5, 7, 9)          # branch kernel sizes (RB3, RB5, RB7, RB9)


# ------------------------------ Pallas kernel -------------------------------

def _im2col_h(a, k):
    """(B, H, C) -> (B, H, k*C): k vertically shifted copies, 'same' zero pad along H."""
    bsz, h, c = a.shape
    p = k // 2
    z = jnp.zeros((bsz, p, c), a.dtype)
    apad = jnp.concatenate([z, a, z], axis=1)                       # (B, H+2p, C)
    return jnp.concatenate([apad[:, dy:dy + h, :] for dy in range(k)], axis=-1)


def _resblock_kernel(x_ref, s0_ref, sh0_ref, b1_ref, bout_ref,
                     t1a, t1b, t1c, t1d, t2a, t2b, t2c, t2d, trb1_ref,
                     o_ref, *, ks, nimg, H, W, cin, c4):
    """Fused ResBlock forward for a block of `nimg` images.

    Inputs (all weights bf16, all vectors f32):
      x_ref    (nimg, H, W*cin)     row-flattened NHWC input block
      s0_ref   (nb, W*cin)          folded BN0 scale per branch (tiled over W)
      sh0_ref  (nb, W*cin)          folded BN0 shift per branch
      b1_ref   (nb, W*c4)           conv1 bias with BN1 folded (tiled over W)
      bout_ref (1, nb*W*c4)         conv2 bias + folded RB1 bias, per output lane
      t1*      (k*W*cin, W*c4)      conv1 block-Toeplitz weights (BN1 folded), bf16
      t2*      (k*W*c4, W*c4)       conv2 block-Toeplitz weights, bf16
      trb1_ref (W*cin, nb*W*c4)     folded RB1 1x1 conv as one block matrix, bf16
      o_ref    (nimg, H, nb*W*c4)   lane-dense output block
    """
    nb = len(ks)
    wci, wc4 = W * cin, W * c4
    m = nimg * H
    t1_refs = (t1a, t1b, t1c, t1d)
    t2_refs = (t2a, t2b, t2c, t2d)

    x = x_ref[...]                                                  # (nimg, H, wci) f32
    x2d = x.reshape(m, wci)

    # Folded RB1 (1x1 conv + BN) for every output lane at once; all output biases folded in.
    acc = jnp.dot(x2d.astype(jnp.bfloat16), trb1_ref[...],
                  preferred_element_type=jnp.float32) + bout_ref[...]      # (m, nb*wc4)

    s0 = s0_ref[...]
    sh0 = sh0_ref[...]
    b1 = b1_ref[...]

    outs = []
    for bi, k in enumerate(ks):
        # BN0 + ReLU (f32 epilogue).
        pre = jnp.maximum(x * s0[bi] + sh0[bi], 0.0)                # (nimg, H, wci)

        # conv kxk (+ folded BN1) as ONE im2col matmul, then ReLU.
        cols1 = _im2col_h(pre, k).reshape(m, k * wci)
        y1 = jnp.dot(cols1.astype(jnp.bfloat16), t1_refs[bi][...],
                     preferred_element_type=jnp.float32) + b1[bi]
        y1 = jnp.maximum(y1, 0.0)                                   # (m, wc4)

        # conv kxk (bias already folded into bout) as ONE im2col matmul.
        cols2 = _im2col_h(y1.reshape(nimg, H, wc4), k).reshape(m, k * wc4)
        outs.append(jnp.dot(cols2.astype(jnp.bfloat16), t2_refs[bi][...],
                            preferred_element_type=jnp.float32))    # (m, wc4)

    # Fused channel concat + residual add, ONE lane-dense (128-wide) store.
    out = acc + jnp.concatenate(outs, axis=-1)                      # (m, nb*wc4)
    o_ref[...] = out.reshape(nimg, H, nb * wc4).astype(o_ref.dtype)


# --------------------------- host-side preparation ---------------------------

def _bn_fold(gamma, beta, mean, var, eps=1e-5):
    scale = gamma / jnp.sqrt(var + eps)
    return scale, beta - mean * scale


def _w_oihw_to_hwio(w):
    # PyTorch conv weight (Cout, Cin, kh, kw) -> (kh, kw, Cin, Cout)
    return jnp.transpose(w, (2, 3, 1, 0))


def _row_toeplitz(w_dx, width):
    """1-D conv along W as a dense (width*Cin, width*Cout) matrix.

    w_dx: (k, Cin, Cout) taps for one dy.  Entry [v*Cin+i, w*Cout+o] equals
    w_dx[v - w + p, i, o] when that tap exists, else 0 ('same' zero padding along W).
    """
    k, cin, cout = w_dx.shape
    p = k // 2
    v = jnp.arange(width)[:, None]
    wpos = jnp.arange(width)[None, :]
    dx = v - wpos + p                                               # (W, W)
    valid = (dx >= 0) & (dx < k)
    t4 = jnp.where(valid[:, :, None, None], w_dx[jnp.clip(dx, 0, k - 1)], 0.0)
    return jnp.transpose(t4, (0, 2, 1, 3)).reshape(width * cin, width * cout)


def _conv_toeplitz(w_hwio, width):
    # (k, k, Cin, Cout) -> (k*width*Cin, width*Cout): dy-major merged Toeplitz weights,
    # matching the dy-major im2col built inside the kernel.
    k = w_hwio.shape[0]
    return jnp.concatenate([_row_toeplitz(w_hwio[dy], width) for dy in range(k)], axis=0)


def _prepare_inputs(P, width):
    """Fold BN into the convs and build the packed kernel operands."""
    nb = len(_KS)
    rb1 = P["rb1"]
    s, sh = _bn_fold(*rb1["bn"])
    w1x1 = rb1["w"][:, :, 0, 0].T * s[None, :]            # (Cin, out_ch), BN folded
    b1x1 = rb1["b"] * s + sh                               # (out_ch,)
    cin, out_ch = w1x1.shape
    c4 = out_ch // nb

    # Folded RB1 as one (W*Cin, nb*W*c4) block matrix: lane = bi*W*c4 + w*c4 + j.
    eye = jnp.eye(width, dtype=jnp.float32)
    trb1 = jnp.einsum("vw,cbj->vcbwj", eye, w1x1.reshape(cin, nb, c4))
    trb1 = trb1.reshape(width * cin, nb * width * c4)

    s0_rows, sh0_rows, b1_rows, bout_parts, t1_list, t2_list = [], [], [], [], [], []
    for bi, k in enumerate(_KS):
        p = P[f"rb{k}"]
        s0, sh0 = _bn_fold(*p["bn0"])
        s1, sh1 = _bn_fold(*p["bn1"])
        w1 = _w_oihw_to_hwio(p["w1"]) * s1[None, None, None, :]     # fold BN1 into conv1
        b1f = p["b1"] * s1 + sh1
        w2 = _w_oihw_to_hwio(p["w2"])

        s0_rows.append(jnp.tile(s0, width))                         # (W*Cin,)
        sh0_rows.append(jnp.tile(sh0, width))
        b1_rows.append(jnp.tile(b1f, width))                        # (W*c4,)
        bout_parts.append(jnp.tile(p["b2"] + b1x1[bi * c4:(bi + 1) * c4], width))
        t1_list.append(_conv_toeplitz(w1, width))                   # (k*W*Cin, W*c4)
        t2_list.append(_conv_toeplitz(w2, width))                   # (k*W*c4,  W*c4)

    bf = jnp.bfloat16
    flat = (jnp.stack(s0_rows), jnp.stack(sh0_rows), jnp.stack(b1_rows),
            jnp.concatenate(bout_parts)[None, :],
            *[t.astype(bf) for t in t1_list],
            *[t.astype(bf) for t in t2_list],
            trb1.astype(bf))
    return flat, c4


def _const_spec(a):
    nd = a.ndim
    return pl.BlockSpec(a.shape, lambda n, _nd=nd: (0,) * _nd)


def resblock_forward(x_nchw, P, block_n=None):
    N, cin, H, W = x_nchw.shape
    nb = len(_KS)
    if block_n is None:
        block_n = N if N <= 8 else 8
    assert N % block_n == 0, "batch must be divisible by block_n"

    x2 = jnp.transpose(x_nchw, (0, 2, 3, 1)).reshape(N, H, W * cin)  # row-flattened NHWC

    flat, c4 = _prepare_inputs(P, W)
    oc = nb * W * c4

    kernel = functools.partial(_resblock_kernel, ks=_KS, nimg=block_n,
                               H=H, W=W, cin=cin, c4=c4)

    in_specs = [pl.BlockSpec((block_n, H, W * cin), lambda n: (n, 0, 0))]
    in_specs += [_const_spec(a) for a in flat]

    out = pl.pallas_call(
        kernel,
        out_shape=jax.ShapeDtypeStruct((N, H, oc), jnp.float32),
        grid=(N // block_n,),
        in_specs=in_specs,
        out_specs=pl.BlockSpec((block_n, H, oc), lambda n: (n, 0, 0)),
        compiler_params=pltpu.CompilerParams(dimension_semantics=("parallel",)),
    )(x2, *flat)

    # lane = bi*W*c4 + w*c4 + j  ->  NCHW with channel = bi*c4 + j (== torch.cat order)
    out = out.reshape(N, H, nb, W, c4)
    return jnp.transpose(out, (0, 2, 4, 1, 3)).reshape(N, nb * c4, H, W)


# -------------------------- deterministic params ---------------------------

def init_conv(key, cin, cout, k):
    k1, k2 = jax.random.split(key)
    fan_in = cin * k * k
    bound = 1.0 / jnp.sqrt(jnp.float32(fan_in))
    w = jax.random.uniform(k1, (cout, cin, k, k), jnp.float32, -bound, bound)
    b = jax.random.uniform(k2, (cout,), jnp.float32, -bound, bound)
    return w, b


def init_bn(key, c):
    k1, k2, k3, k4 = jax.random.split(key, 4)
    gamma = jax.random.uniform(k1, (c,), jnp.float32, 0.5, 1.5)
    beta = jax.random.uniform(k2, (c,), jnp.float32, -0.5, 0.5)
    mean = 0.1 * jax.random.normal(k3, (c,), jnp.float32)
    var = jax.random.uniform(k4, (c,), jnp.float32, 0.5, 1.5)
    return (gamma, beta, mean, var)


def make_params(key, in_ch, out_ch):
    c4 = out_ch // 4
    ki = iter(jax.random.split(key, 32))
    P = {}
    w, b = init_conv(next(ki), in_ch, out_ch, 1)
    P["rb1"] = {"w": w, "b": b, "bn": init_bn(next(ki), out_ch)}
    for k in _KS:
        w1, b1 = init_conv(next(ki), in_ch, c4, k)
        w2, b2 = init_conv(next(ki), c4, c4, k)
        P[f"rb{k}"] = {"bn0": init_bn(next(ki), in_ch),
                       "w1": w1, "b1": b1,
                       "bn1": init_bn(next(ki), c4),
                       "w2": w2, "b2": b2}
    return P


# ----------------------------- pure-JAX reference ---------------------------

def ref_resblock(x, P, eps=1e-5):
    def bn(z, prm):
        g, b, m, v = prm
        s = g / jnp.sqrt(v + eps)
        return z * s[None, :, None, None] + (b - m * s)[None, :, None, None]

    def conv(z, w, b, pad):
        y = jax.lax.conv_general_dilated(
            z, w, (1, 1), [(pad, pad), (pad, pad)],
            dimension_numbers=("NCHW", "OIHW", "NCHW"))
        return y + b[None, :, None, None]

    out1 = bn(conv(x, P["rb1"]["w"], P["rb1"]["b"], 0), P["rb1"]["bn"])
    outs = []
    for k in _KS:
        p = P[f"rb{k}"]
        pad = k // 2
        h = jax.nn.relu(bn(x, p["bn0"]))
        h = conv(h, p["w1"], p["b1"], pad)
        h = jax.nn.relu(bn(h, p["bn1"]))
        h = conv(h, p["w2"], p["b2"], pad)
        outs.append(h)
    return jnp.concatenate(outs, axis=1) + out1


# ---------------------------------- main ------------------------------------

if __name__ == "__main__":
    N, in_ch, H, W = 2, 4, 16, 16
    out_ch = 8

    key = jax.random.PRNGKey(0)
    kp, kx = jax.random.split(key)
    params = make_params(kp, in_ch, out_ch)
    x = jax.random.normal(kx, (N, in_ch, H, W), jnp.float32)

    fwd = jax.jit(resblock_forward)
    out = jax.block_until_ready(fwd(x, params))

    assert out.shape == (N, out_ch, H, W), out.shape

    ref = ref_resblock(x, params)
    err = float(jnp.max(jnp.abs(out - ref)))
    ref_max = float(jnp.max(jnp.abs(ref)))
    rel = err / (ref_max + 1e-12)
    # Tolerance deliberately relaxed vs an all-f32 kernel: matmul inputs are bf16
    # (accumulation/epilogues remain f32).  Indexing bugs would produce O(0.1+) errors,
    # well above these bounds.
    assert rel < 2e-2 and err < 1e-1, f"max abs err {err}, rel err {rel}"

    print("KERNEL_OK")
</pallas_src>

<mosaic_0001>
module attributes {stable_mosaic.version = 11 : i64} {
  func.func @_resblock_kernel(%arg0: i32, %arg1: memref<2x16x64xf32, #tpu.memory_space<vmem>>, %arg2: memref<4x64xf32, #tpu.memory_space<vmem>>, %arg3: memref<4x64xf32, #tpu.memory_space<vmem>>, %arg4: memref<4x32xf32, #tpu.memory_space<vmem>>, %arg5: memref<1x128xf32, #tpu.memory_space<vmem>>, %arg6: memref<192x32xbf16, #tpu.memory_space<vmem>>, %arg7: memref<320x32xbf16, #tpu.memory_space<vmem>>, %arg8: memref<448x32xbf16, #tpu.memory_space<vmem>>, %arg9: memref<576x32xbf16, #tpu.memory_space<vmem>>, %arg10: memref<96x32xbf16, #tpu.memory_space<vmem>>, %arg11: memref<160x32xbf16, #tpu.memory_space<vmem>>, %arg12: memref<224x32xbf16, #tpu.memory_space<vmem>>, %arg13: memref<288x32xbf16, #tpu.memory_space<vmem>>, %arg14: memref<64x128xbf16, #tpu.memory_space<vmem>>, %arg15: memref<2x16x128xf32, #tpu.memory_space<vmem>>) attributes {dimension_semantics = [#tpu.dimension_semantics<parallel>], iteration_bounds = array<i64: 1>, scalar_prefetch = 0 : i64, scratch_operands = 0 : i64, tpu.core_type = #tpu.core_type<tc>, window_params = [{transform_indices = @transform_0, window_bounds = array<i64: 2, 16, 64>}, {pipeline_mode = #tpu.pipeline_mode<synchronous>, transform_indices = @transform_1, window_bounds = array<i64: 4, 64>}, {pipeline_mode = #tpu.pipeline_mode<synchronous>, transform_indices = @transform_2, window_bounds = array<i64: 4, 64>}, {pipeline_mode = #tpu.pipeline_mode<synchronous>, transform_indices = @transform_3, window_bounds = array<i64: 4, 32>}, {pipeline_mode = #tpu.pipeline_mode<synchronous>, transform_indices = @transform_4, window_bounds = array<i64: 1, 128>}, {pipeline_mode = #tpu.pipeline_mode<synchronous>, transform_indices = @transform_5, window_bounds = array<i64: 192, 32>}, {pipeline_mode = #tpu.pipeline_mode<synchronous>, transform_indices = @transform_6, window_bounds = array<i64: 320, 32>}, {pipeline_mode = #tpu.pipeline_mode<synchronous>, transform_indices = @transform_7, window_bounds = array<i64: 448, 32>}, {pipeline_mode = #tpu.pipeline_mode<synchronous>, transform_indices = @transform_8, window_bounds = array<i64: 576, 32>}, {pipeline_mode = #tpu.pipeline_mode<synchronous>, transform_indices = @transform_9, window_bounds = array<i64: 96, 32>}, {pipeline_mode = #tpu.pipeline_mode<synchronous>, transform_indices = @transform_10, window_bounds = array<i64: 160, 32>}, {pipeline_mode = #tpu.pipeline_mode<synchronous>, transform_indices = @transform_11, window_bounds = array<i64: 224, 32>}, {pipeline_mode = #tpu.pipeline_mode<synchronous>, transform_indices = @transform_12, window_bounds = array<i64: 288, 32>}, {pipeline_mode = #tpu.pipeline_mode<synchronous>, transform_indices = @transform_13, window_bounds = array<i64: 64, 128>}, {transform_indices = @transform_14, window_bounds = array<i64: 2, 16, 128>}]} {
    %c0 = arith.constant 0 : index
    %c0_0 = arith.constant 0 : index
    %c0_1 = arith.constant 0 : index
    %0 = vector.load %arg1[%c0, %c0_0, %c0_1] : memref<2x16x64xf32, #tpu.memory_space<vmem>>, vector<2x16x64xf32>
    %1 = vector.shape_cast %0 : vector<2x16x64xf32> to vector<32x64xf32>
    %2 = arith.truncf %1 : vector<32x64xf32> to vector<32x64xbf16>
    %c0_2 = arith.constant 0 : index
    %c0_3 = arith.constant 0 : index
    %3 = vector.load %arg14[%c0_2, %c0_3] : memref<64x128xbf16, #tpu.memory_space<vmem>>, vector<64x128xbf16>
    %cst = arith.constant dense<0.000000e+00> : vector<32x128xf32>
    %4 = tpu.matmul %2, %3, %cst {dimension_numbers = #tpu.dot_dimension_numbers<[1], [0], [0], [1], [0, 0, 1, 1], [], []>} : vector<32x64xbf16>, vector<64x128xbf16>, vector<32x128xf32> -> vector<32x128xf32>
    %c0_4 = arith.constant 0 : index
    %c0_5 = arith.constant 0 : index
    %5 = vector.load %arg5[%c0_4, %c0_5] : memref<1x128xf32, #tpu.memory_space<vmem>>, vector<1x128xf32>
    %6 = vector.broadcast %5 : vector<1x128xf32> to vector<32x128xf32>
    %7 = arith.addf %4, %6 : vector<32x128xf32>
    %c0_6 = arith.constant 0 : index
    %c0_7 = arith.constant 0 : index
    %8 = vector.load %arg2[%c0_6, %c0_7] : memref<4x64xf32, #tpu.memory_space<vmem>>, vector<4x64xf32>
    %c0_8 = arith.constant 0 : index
    %c0_9 = arith.constant 0 : index
    %9 = vector.load %arg3[%c0_8, %c0_9] : memref<4x64xf32, #tpu.memory_space<vmem>>, vector<4x64xf32>
    %c0_10 = arith.constant 0 : index
    %c0_11 = arith.constant 0 : index
    %10 = vector.load %arg4[%c0_10, %c0_11] : memref<4x32xf32, #tpu.memory_space<vmem>>, vector<4x32xf32>
    %11 = vector.extract_strided_slice %8 {offsets = [0, 0], sizes = [1, 64], strides = [1, 1]} : vector<4x64xf32> to vector<1x64xf32>
    %12 = vector.shape_cast %11 : vector<1x64xf32> to vector<64xf32>
    %13 = vector.shape_cast %12 : vector<64xf32> to vector<1x1x64xf32>
    %14 = vector.broadcast %13 : vector<1x1x64xf32> to vector<2x16x64xf32>
    %15 = arith.mulf %0, %14 : vector<2x16x64xf32>
    %16 = vector.extract_strided_slice %9 {offsets = [0, 0], sizes = [1, 64], strides = [1, 1]} : vector<4x64xf32> to vector<1x64xf32>
    %17 = vector.shape_cast %16 : vector<1x64xf32> to vector<64xf32>
    %18 = vector.shape_cast %17 : vector<64xf32> to vector<1x1x64xf32>
    %19 = vector.broadcast %18 : vector<1x1x64xf32> to vector<2x16x64xf32>
    %20 = arith.addf %15, %19 : vector<2x16x64xf32>
    %cst_12 = arith.constant 0.000000e+00 : f32
    %21 = vector.broadcast %cst_12 : f32 to vector<2x16x64xf32>
    %22 = arith.maximumf %20, %21 : vector<2x16x64xf32>
    %cst_13 = arith.constant 0.000000e+00 : f32
    %23 = vector.broadcast %cst_13 : f32 to vector<2x1x64xf32>
    %24 = tpu.concatenate %23, %22, %23 in 1 : vector<2x1x64xf32>, vector<2x16x64xf32>, vector<2x1x64xf32> -> vector<2x18x64xf32>
    %25 = vector.extract_strided_slice %24 {offsets = [0, 0, 0], sizes = [2, 16, 64], strides = [1, 1, 1]} : vector<2x18x64xf32> to vector<2x16x64xf32>
    %26 = vector.extract_strided_slice %24 {offsets = [0, 1, 0], sizes = [2, 16, 64], strides = [1, 1, 1]} : vector<2x18x64xf32> to vector<2x16x64xf32>
    %27 = vector.extract_strided_slice %24 {offsets = [0, 2, 0], sizes = [2, 16, 64], strides = [1, 1, 1]} : vector<2x18x64xf32> to vector<2x16x64xf32>
    %28 = tpu.concatenate %25, %26, %27 in 2 : vector<2x16x64xf32>, vector<2x16x64xf32>, vector<2x16x64xf32> -> vector<2x16x192xf32>
    %29 = vector.shape_cast %28 : vector<2x16x192xf32> to vector<32x192xf32>
    %30 = arith.truncf %29 : vector<32x192xf32> to vector<32x192xbf16>
    %c0_14 = arith.constant 0 : index
    %c0_15 = arith.constant 0 : index
    %31 = vector.load %arg6[%c0_14, %c0_15] : memref<192x32xbf16, #tpu.memory_space<vmem>>, vector<192x32xbf16>
    %cst_16 = arith.constant dense<0.000000e+00> : vector<32x32xf32>
    %32 = tpu.matmul %30, %31, %cst_16 {dimension_numbers = #tpu.dot_dimension_numbers<[1], [0], [0], [1], [0, 0, 1, 1], [], []>} : vector<32x192xbf16>, vector<192x32xbf16>, vector<32x32xf32> -> vector<32x32xf32>
    %33 = vector.extract_strided_slice %10 {offsets = [0, 0], sizes = [1, 32], strides = [1, 1]} : vector<4x32xf32> to vector<1x32xf32>
    %34 = vector.shape_cast %33 : vector<1x32xf32> to vector<32xf32>
    %35 = vector.shape_cast %34 : vector<32xf32> to vector<1x32xf32>
    %36 = vector.broadcast %35 : vector<1x32xf32> to vector<32x32xf32>
    %37 = arith.addf %32, %36 : vector<32x32xf32>
    %cst_17 = arith.constant 0.000000e+00 : f32
    %38 = vector.broadcast %cst_17 : f32 to vector<32x32xf32>
    %39 = arith.maximumf %37, %38 : vector<32x32xf32>
    %40 = vector.shape_cast %39 : vector<32x32xf32> to vector<2x16x32xf32>
    %cst_18 = arith.constant 0.000000e+00 : f32
    %41 = vector.broadcast %cst_18 : f32 to vector<2x1x32xf32>
    %42 = tpu.concatenate %41, %40, %41 in 1 : vector<2x1x32xf32>, vector<2x16x32xf32>, vector<2x1x32xf32> -> vector<2x18x32xf32>
    %43 = vector.extract_strided_slice %42 {offsets = [0, 0, 0], sizes = [2, 16, 32], strides = [1, 1, 1]} : vector<2x18x32xf32> to vector<2x16x32xf32>
    %44 = vector.extract_strided_slice %42 {offsets = [0, 1, 0], sizes = [2, 16, 32], strides = [1, 1, 1]} : vector<2x18x32xf32> to vector<2x16x32xf32>
    %45 = vector.extract_strided_slice %42 {offsets = [0, 2, 0], sizes = [2, 16, 32], strides = [1, 1, 1]} : vector<2x18x32xf32> to vector<2x16x32xf32>
    %46 = tpu.concatenate %43, %44, %45 in 2 : vector<2x16x32xf32>, vector<2x16x32xf32>, vector<2x16x32xf32> -> vector<2x16x96xf32>
    %47 = vector.shape_cast %46 : vector<2x16x96xf32> to vector<32x96xf32>
    %48 = arith.truncf %47 : vector<32x96xf32> to vector<32x96xbf16>
    %c0_19 = arith.constant 0 : index
    %c0_20 = arith.constant 0 : index
    %49 = vector.load %arg10[%c0_19, %c0_20] : memref<96x32xbf16, #tpu.memory_space<vmem>>, vector<96x32xbf16>
    %cst_21 = arith.constant dense<0.000000e+00> : vector<32x32xf32>
    %50 = tpu.matmul %48, %49, %cst_21 {dimension_numbers = #tpu.dot_dimension_numbers<[1], [0], [0], [1], [0, 0, 1, 1], [], []>} : vector<32x96xbf16>, vector<96x32xbf16>, vector<32x32xf32> -> vector<32x32xf32>
    %51 = vector.extract_strided_slice %8 {offsets = [1, 0], sizes = [1, 64], strides = [1, 1]} : vector<4x64xf32> to vector<1x64xf32>
    %52 = vector.shape_cast %51 : vector<1x64xf32> to vector<64xf32>
    %53 = vector.shape_cast %52 : vector<64xf32> to vector<1x1x64xf32>
    %54 = vector.broadcast %53 : vector<1x1x64xf32> to vector<2x16x64xf32>
    %55 = arith.mulf %0, %54 : vector<2x16x64xf32>
    %56 = vector.extract_strided_slice %9 {offsets = [1, 0], sizes = [1, 64], strides = [1, 1]} : vector<4x64xf32> to vector<1x64xf32>
    %57 = vector.shape_cast %56 : vector<1x64xf32> to vector<64xf32>
    %58 = vector.shape_cast %57 : vector<64xf32> to vector<1x1x64xf32>
    %59 = vector.broadcast %58 : vector<1x1x64xf32> to vector<2x16x64xf32>
    %60 = arith.addf %55, %59 : vector<2x16x64xf32>
    %cst_22 = arith.constant 0.000000e+00 : f32
    %61 = vector.broadcast %cst_22 : f32 to vector<2x16x64xf32>
    %62 = arith.maximumf %60, %61 : vector<2x16x64xf32>
    %cst_23 = arith.constant 0.000000e+00 : f32
    %63 = vector.broadcast %cst_23 : f32 to vector<2x2x64xf32>
    %64 = tpu.concatenate %63, %62, %63 in 1 : vector<2x2x64xf32>, vector<2x16x64xf32>, vector<2x2x64xf32> -> vector<2x20x64xf32>
    %65 = vector.extract_strided_slice %64 {offsets = [0, 0, 0], sizes = [2, 16, 64], strides = [1, 1, 1]} : vector<2x20x64xf32> to vector<2x16x64xf32>
    %66 = vector.extract_strided_slice %64 {offsets = [0, 1, 0], sizes = [2, 16, 64], strides = [1, 1, 1]} : vector<2x20x64xf32> to vector<2x16x64xf32>
    %67 = vector.extract_strided_slice %64 {offsets = [0, 2, 0], sizes = [2, 16, 64], strides = [1, 1, 1]} : vector<2x20x64xf32> to vector<2x16x64xf32>
    %68 = vector.extract_strided_slice %64 {offsets = [0, 3, 0], sizes = [2, 16, 64], strides = [1, 1, 1]} : vector<2x20x64xf32> to vector<2x16x64xf32>
    %69 = vector.extract_strided_slice %64 {offsets = [0, 4, 0], sizes = [2, 16, 64], strides = [1, 1, 1]} : vector<2x20x64xf32> to vector<2x16x64xf32>
    %70 = tpu.concatenate %65, %66, %67, %68, %69 in 2 : vector<2x16x64xf32>, vector<2x16x64xf32>, vector<2x16x64xf32>, vector<2x16x64xf32>, vector<2x16x64xf32> -> vector<2x16x320xf32>
    %71 = vector.shape_cast %70 : vector<2x16x320xf32> to vector<32x320xf32>
    %72 = arith.truncf %71 : vector<32x320xf32> to vector<32x320xbf16>
    %c0_24 = arith.constant 0 : index
    %c0_25 = arith.constant 0 : index
    %73 = vector.load %arg7[%c0_24, %c0_25] : memref<320x32xbf16, #tpu.memory_space<vmem>>, vector<320x32xbf16>
    %cst_26 = arith.constant dense<0.000000e+00> : vector<32x32xf32>
    %74 = tpu.matmul %72, %73, %cst_26 {dimension_numbers = #tpu.dot_dimension_numbers<[1], [0], [0], [1], [0, 0, 1, 1], [], []>} : vector<32x320xbf16>, vector<320x32xbf16>, vector<32x32xf32> -> vector<32x32xf32>
    %75 = vector.extract_strided_slice %10 {offsets = [1, 0], sizes = [1, 32], strides = [1, 1]} : vector<4x32xf32> to vector<1x32xf32>
    %76 = vector.shape_cast %75 : vector<1x32xf32> to vector<32xf32>
    %77 = vector.shape_cast %76 : vector<32xf32> to vector<1x32xf32>
    %78 = vector.broadcast %77 : vector<1x32xf32> to vector<32x32xf32>
    %79 = arith.addf %74, %78 : vector<32x32xf32>
    %cst_27 = arith.constant 0.000000e+00 : f32
    %80 = vector.broadcast %cst_27 : f32 to vector<32x32xf32>
    %81 = arith.maximumf %79, %80 : vector<32x32xf32>
    %82 = vector.shape_cast %81 : vector<32x32xf32> to vector<2x16x32xf32>
    %cst_28 = arith.constant 0.000000e+00 : f32
    %83 = vector.broadcast %cst_28 : f32 to vector<2x2x32xf32>
    %84 = tpu.concatenate %83, %82, %83 in 1 : vector<2x2x32xf32>, vector<2x16x32xf32>, vector<2x2x32xf32> -> vector<2x20x32xf32>
    %85 = vector.extract_strided_slice %84 {offsets = [0, 0, 0], sizes = [2, 16, 32], strides = [1, 1, 1]} : vector<2x20x32xf32> to vector<2x16x32xf32>
    %86 = vector.extract_strided_slice %84 {offsets = [0, 1, 0], sizes = [2, 16, 32], strides = [1, 1, 1]} : vector<2x20x32xf32> to vector<2x16x32xf32>
    %87 = vector.extract_strided_slice %84 {offsets = [0, 2, 0], sizes = [2, 16, 32], strides = [1, 1, 1]} : vector<2x20x32xf32> to vector<2x16x32xf32>
    %88 = vector.extract_strided_slice %84 {offsets = [0, 3, 0], sizes = [2, 16, 32], strides = [1, 1, 1]} : vector<2x20x32xf32> to vector<2x16x32xf32>
    %89 = vector.extract_strided_slice %84 {offsets = [0, 4, 0], sizes = [2, 16, 32], strides = [1, 1, 1]} : vector<2x20x32xf32> to vector<2x16x32xf32>
    %90 = tpu.concatenate %85, %86, %87, %88, %89 in 2 : vector<2x16x32xf32>, vector<2x16x32xf32>, vector<2x16x32xf32>, vector<2x16x32xf32>, vector<2x16x32xf32> -> vector<2x16x160xf32>
    %91 = vector.shape_cast %90 : vector<2x16x160xf32> to vector<32x160xf32>
    %92 = arith.truncf %91 : vector<32x160xf32> to vector<32x160xbf16>
    %c0_29 = arith.constant 0 : index
    %c0_30 = arith.constant 0 : index
    %93 = vector.load %arg11[%c0_29, %c0_30] : memref<160x32xbf16, #tpu.memory_space<vmem>>, vector<160x32xbf16>
    %cst_31 = arith.constant dense<0.000000e+00> : vector<32x32xf32>
    %94 = tpu.matmul %92, %93, %cst_31 {dimension_numbers = #tpu.dot_dimension_numbers<[1], [0], [0], [1], [0, 0, 1, 1], [], []>} : vector<32x160xbf16>, vector<160x32xbf16>, vector<32x32xf32> -> vector<32x32xf32>
    %95 = vector.extract_strided_slice %8 {offsets = [2, 0], sizes = [1, 64], strides = [1, 1]} : vector<4x64xf32> to vector<1x64xf32>
    %96 = vector.shape_cast %95 : vector<1x64xf32> to vector<64xf32>
    %97 = vector.shape_cast %96 : vector<64xf32> to vector<1x1x64xf32>
    %98 = vector.broadcast %97 : vector<1x1x64xf32> to vector<2x16x64xf32>
    %99 = arith.mulf %0, %98 : vector<2x16x64xf32>
    %100 = vector.extract_strided_slice %9 {offsets = [2, 0], sizes = [1, 64], strides = [1, 1]} : vector<4x64xf32> to vector<1x64xf32>
    %101 = vector.shape_cast %100 : vector<1x64xf32> to vector<64xf32>
    %102 = vector.shape_cast %101 : vector<64xf32> to vector<1x1x64xf32>
    %103 = vector.broadcast %102 : vector<1x1x64xf32> to vector<2x16x64xf32>
    %104 = arith.addf %99, %103 : vector<2x16x64xf32>
    %cst_32 = arith.constant 0.000000e+00 : f32
    %105 = vector.broadcast %cst_32 : f32 to vector<2x16x64xf32>
    %106 = arith.maximumf %104, %105 : vector<2x16x64xf32>
    %cst_33 = arith.constant 0.000000e+00 : f32
    %107 = vector.broadcast %cst_33 : f32 to vector<2x3x64xf32>
    %108 = tpu.concatenate %107, %106, %107 in 1 : vector<2x3x64xf32>, vector<2x16x64xf32>, vector<2x3x64xf32> -> vector<2x22x64xf32>
    %109 = vector.extract_strided_slice %108 {offsets = [0, 0, 0], sizes = [2, 16, 64], strides = [1, 1, 1]} : vector<2x22x64xf32> to vector<2x16x64xf32>
    %110 = vector.extract_strided_slice %108 {offsets = [0, 1, 0], sizes = [2, 16, 64], strides = [1, 1, 1]} : vector<2x22x64xf32> to vector<2x16x64xf32>
    %111 = vector.extract_strided_slice %108 {offsets = [0, 2, 0], sizes = [2, 16, 64], strides = [1, 1, 1]} : vector<2x22x64xf32> to vector<2x16x64xf32>
    %112 = vector.extract_strided_slice %108 {offsets = [0, 3, 0], sizes = [2, 16, 64], strides = [1, 1, 1]} : vector<2x22x64xf32> to vector<2x16x64xf32>
    %113 = vector.extract_strided_slice %108 {offsets = [0, 4, 0], sizes = [2, 16, 64], strides = [1, 1, 1]} : vector<2x22x64xf32> to vector<2x16x64xf32>
    %114 = vector.extract_strided_slice %108 {offsets = [0, 5, 0], sizes = [2, 16, 64], strides = [1, 1, 1]} : vector<2x22x64xf32> to vector<2x16x64xf32>
    %115 = vector.extract_strided_slice %108 {offsets = [0, 6, 0], sizes = [2, 16, 64], strides = [1, 1, 1]} : vector<2x22x64xf32> to vector<2x16x64xf32>
    %116 = tpu.concatenate %109, %110, %111, %112, %113, %114, %115 in 2 : vector<2x16x64xf32>, vector<2x16x64xf32>, vector<2x16x64xf32>, vector<2x16x64xf32>, vector<2x16x64xf32>, vector<2x16x64xf32>, vector<2x16x64xf32> -> vector<2x16x448xf32>
    %117 = vector.shape_cast %116 : vector<2x16x448xf32> to vector<32x448xf32>
    %118 = arith.truncf %117 : vector<32x448xf32> to vector<32x448xbf16>
    %c0_34 = arith.constant 0 : index
    %c0_35 = arith.constant 0 : index
    %119 = vector.load %arg8[%c0_34, %c0_35] : memref<448x32xbf16, #tpu.memory_space<vmem>>, vector<448x32xbf16>
    %cst_36 = arith.constant dense<0.000000e+00> : vector<32x32xf32>
    %120 = tpu.matmul %118, %119, %cst_36 {dimension_numbers = #tpu.dot_dimension_numbers<[1], [0], [0], [1], [0, 0, 1, 1], [], []>} : vector<32x448xbf16>, vector<448x32xbf16>, vector<32x32xf32> -> vector<32x32xf32>
    %121 = vector.extract_strided_slice %10 {offsets = [2, 0], sizes = [1, 32], strides = [1, 1]} : vector<4x32xf32> to vector<1x32xf32>
    %122 = vector.shape_cast %121 : vector<1x32xf32> to vector<32xf32>
    %123 = vector.shape_cast %122 : vector<32xf32> to vector<1x32xf32>
    %124 = vector.broadcast %123 : vector<1x32xf32> to vector<32x32xf32>
    %125 = arith.addf %120, %124 : vector<32x32xf32>
    %cst_37 = arith.constant 0.000000e+00 : f32
    %126 = vector.broadcast %cst_37 : f32 to vector<32x32xf32>
    %127 = arith.maximumf %125, %126 : vector<32x32xf32>
    %128 = vector.shape_cast %127 : vector<32x32xf32> to vector<2x16x32xf32>
    %cst_38 = arith.constant 0.000000e+00 : f32
    %129 = vector.broadcast %cst_38 : f32 to vector<2x3x32xf32>
    %130 = tpu.concatenate %129, %128, %129 in 1 : vector<2x3x32xf32>, vector<2x16x32xf32>, vector<2x3x32xf32> -> vector<2x22x32xf32>
    %131 = vector.extract_strided_slice %130 {offsets = [0, 0, 0], sizes = [2, 16, 32], strides = [1, 1, 1]} : vector<2x22x32xf32> to vector<2x16x32xf32>
    %132 = vector.extract_strided_slice %130 {offsets = [0, 1, 0], sizes = [2, 16, 32], strides = [1, 1, 1]} : vector<2x22x32xf32> to vector<2x16x32xf32>
    %133 = vector.extract_strided_slice %130 {offsets = [0, 2, 0], sizes = [2, 16, 32], strides = [1, 1, 1]} : vector<2x22x32xf32> to vector<2x16x32xf32>
    %134 = vector.extract_strided_slice %130 {offsets = [0, 3, 0], sizes = [2, 16, 32], strides = [1, 1, 1]} : vector<2x22x32xf32> to vector<2x16x32xf32>
    %135 = vector.extract_strided_slice %130 {offsets = [0, 4, 0], sizes = [2, 16, 32], strides = [1, 1, 1]} : vector<2x22x32xf32> to vector<2x16x32xf32>
    %136 = vector.extract_strided_slice %130 {offsets = [0, 5, 0], sizes = [2, 16, 32], strides = [1, 1, 1]} : vector<2x22x32xf32> to vector<2x16x32xf32>
    %137 = vector.extract_strided_slice %130 {offsets = [0, 6, 0], sizes = [2, 16, 32], strides = [1, 1, 1]} : vector<2x22x32xf32> to vector<2x16x32xf32>
    %138 = tpu.concatenate %131, %132, %133, %134, %135, %136, %137 in 2 : vector<2x16x32xf32>, vector<2x16x32xf32>, vector<2x16x32xf32>, vector<2x16x32xf32>, vector<2x16x32xf32>, vector<2x16x32xf32>, vector<2x16x32xf32> -> vector<2x16x224xf32>
    %139 = vector.shape_cast %138 : vector<2x16x224xf32> to vector<32x224xf32>
    %140 = arith.truncf %139 : vector<32x224xf32> to vector<32x224xbf16>
    %c0_39 = arith.constant 0 : index
    %c0_40 = arith.constant 0 : index
    %141 = vector.load %arg12[%c0_39, %c0_40] : memref<224x32xbf16, #tpu.memory_space<vmem>>, vector<224x32xbf16>
    %cst_41 = arith.constant dense<0.000000e+00> : vector<32x32xf32>
    %142 = tpu.matmul %140, %141, %cst_41 {dimension_numbers = #tpu.dot_dimension_numbers<[1], [0], [0], [1], [0, 0, 1, 1], [], []>} : vector<32x224xbf16>, vector<224x32xbf16>, vector<32x32xf32> -> vector<32x32xf32>
    %143 = vector.extract_strided_slice %8 {offsets = [3, 0], sizes = [1, 64], strides = [1, 1]} : vector<4x64xf32> to vector<1x64xf32>
    %144 = vector.shape_cast %143 : vector<1x64xf32> to vector<64xf32>
    %145 = vector.shape_cast %144 : vector<64xf32> to vector<1x1x64xf32>
    %146 = vector.broadcast %145 : vector<1x1x64xf32> to vector<2x16x64xf32>
    %147 = arith.mulf %0, %146 : vector<2x16x64xf32>
    %148 = vector.extract_strided_slice %9 {offsets = [3, 0], sizes = [1, 64], strides = [1, 1]} : vector<4x64xf32> to vector<1x64xf32>
    %149 = vector.shape_cast %148 : vector<1x64xf32> to vector<64xf32>
    %150 = vector.shape_cast %149 : vector<64xf32> to vector<1x1x64xf32>
    %151 = vector.broadcast %150 : vector<1x1x64xf32> to vector<2x16x64xf32>
    %152 = arith.addf %147, %151 : vector<2x16x64xf32>
    %cst_42 = arith.constant 0.000000e+00 : f32
    %153 = vector.broadcast %cst_42 : f32 to vector<2x16x64xf32>
    %154 = arith.maximumf %152, %153 : vector<2x16x64xf32>
    %cst_43 = arith.constant 0.000000e+00 : f32
    %155 = vector.broadcast %cst_43 : f32 to vector<2x4x64xf32>
    %156 = tpu.concatenate %155, %154, %155 in 1 : vector<2x4x64xf32>, vector<2x16x64xf32>, vector<2x4x64xf32> -> vector<2x24x64xf32>
    %157 = vector.extract_strided_slice %156 {offsets = [0, 0, 0], sizes = [2, 16, 64], strides = [1, 1, 1]} : vector<2x24x64xf32> to vector<2x16x64xf32>
    %158 = vector.extract_strided_slice %156 {offsets = [0, 1, 0], sizes = [2, 16, 64], strides = [1, 1, 1]} : vector<2x24x64xf32> to vector<2x16x64xf32>
    %159 = vector.extract_strided_slice %156 {offsets = [0, 2, 0], sizes = [2, 16, 64], strides = [1, 1, 1]} : vector<2x24x64xf32> to vector<2x16x64xf32>
    %160 = vector.extract_strided_slice %156 {offsets = [0, 3, 0], sizes = [2, 16, 64], strides = [1, 1, 1]} : vector<2x24x64xf32> to vector<2x16x64xf32>
    %161 = vector.extract_strided_slice %156 {offsets = [0, 4, 0], sizes = [2, 16, 64], strides = [1, 1, 1]} : vector<2x24x64xf32> to vector<2x16x64xf32>
    %162 = vector.extract_strided_slice %156 {offsets = [0, 5, 0], sizes = [2, 16, 64], strides = [1, 1, 1]} : vector<2x24x64xf32> to vector<2x16x64xf32>
    %163 = vector.extract_strided_slice %156 {offsets = [0, 6, 0], sizes = [2, 16, 64], strides = [1, 1, 1]} : vector<2x24x64xf32> to vector<2x16x64xf32>
    %164 = vector.extract_strided_slice %156 {offsets = [0, 7, 0], sizes = [2, 16, 64], strides = [1, 1, 1]} : vector<2x24x64xf32> to vector<2x16x64xf32>
    %165 = vector.extract_strided_slice %156 {offsets = [0, 8, 0], sizes = [2, 16, 64], strides = [1, 1, 1]} : vector<2x24x64xf32> to vector<2x16x64xf32>
    %166 = tpu.concatenate %157, %158, %159, %160, %161, %162, %163, %164, %165 in 2 : vector<2x16x64xf32>, vector<2x16x64xf32>, vector<2x16x64xf32>, vector<2x16x64xf32>, vector<2x16x64xf32>, vector<2x16x64xf32>, vector<2x16x64xf32>, vector<2x16x64xf32>, vector<2x16x64xf32> -> vector<2x16x576xf32>
    %167 = vector.shape_cast %166 : vector<2x16x576xf32> to vector<32x576xf32>
    %168 = arith.truncf %167 : vector<32x576xf32> to vector<32x576xbf16>
    %c0_44 = arith.constant 0 : index
    %c0_45 = arith.constant 0 : index
    %169 = vector.load %arg9[%c0_44, %c0_45] : memref<576x32xbf16, #tpu.memory_space<vmem>>, vector<576x32xbf16>
    %cst_46 = arith.constant dense<0.000000e+00> : vector<32x32xf32>
    %170 = tpu.matmul %168, %169, %cst_46 {dimension_numbers = #tpu.dot_dimension_numbers<[1], [0], [0], [1], [0, 0, 1, 1], [], []>} : vector<32x576xbf16>, vector<576x32xbf16>, vector<32x32xf32> -> vector<32x32xf32>
    %171 = vector.extract_strided_slice %10 {offsets = [3, 0], sizes = [1, 32], strides = [1, 1]} : vector<4x32xf32> to vector<1x32xf32>
    %172 = vector.shape_cast %171 : vector<1x32xf32> to vector<32xf32>
    %173 = vector.shape_cast %172 : vector<32xf32> to vector<1x32xf32>
    %174 = vector.broadcast %173 : vector<1x32xf32> to vector<32x32xf32>
    %175 = arith.addf %170, %174 : vector<32x32xf32>
    %cst_47 = arith.constant 0.000000e+00 : f32
    %176 = vector.broadcast %cst_47 : f32 to vector<32x32xf32>
    %177 = arith.maximumf %175, %176 : vector<32x32xf32>
    %178 = vector.shape_cast %177 : vector<32x32xf32> to vector<2x16x32xf32>
    %cst_48 = arith.constant 0.000000e+00 : f32
    %179 = vector.broadcast %cst_48 : f32 to vector<2x4x32xf32>
    %180 = tpu.concatenate %179, %178, %179 in 1 : vector<2x4x32xf32>, vector<2x16x32xf32>, vector<2x4x32xf32> -> vector<2x24x32xf32>
    %181 = vector.extract_strided_slice %180 {offsets = [0, 0, 0], sizes = [2, 16, 32], strides = [1, 1, 1]} : vector<2x24x32xf32> to vector<2x16x32xf32>
    %182 = vector.extract_strided_slice %180 {offsets = [0, 1, 0], sizes = [2, 16, 32], strides = [1, 1, 1]} : vector<2x24x32xf32> to vector<2x16x32xf32>
    %183 = vector.extract_strided_slice %180 {offsets = [0, 2, 0], sizes = [2, 16, 32], strides = [1, 1, 1]} : vector<2x24x32xf32> to vector<2x16x32xf32>
    %184 = vector.extract_strided_slice %180 {offsets = [0, 3, 0], sizes = [2, 16, 32], strides = [1, 1, 1]} : vector<2x24x32xf32> to vector<2x16x32xf32>
    %185 = vector.extract_strided_slice %180 {offsets = [0, 4, 0], sizes = [2, 16, 32], strides = [1, 1, 1]} : vector<2x24x32xf32> to vector<2x16x32xf32>
    %186 = vector.extract_strided_slice %180 {offsets = [0, 5, 0], sizes = [2, 16, 32], strides = [1, 1, 1]} : vector<2x24x32xf32> to vector<2x16x32xf32>
    %187 = vector.extract_strided_slice %180 {offsets = [0, 6, 0], sizes = [2, 16, 32], strides = [1, 1, 1]} : vector<2x24x32xf32> to vector<2x16x32xf32>
    %188 = vector.extract_strided_slice %180 {offsets = [0, 7, 0], sizes = [2, 16, 32], strides = [1, 1, 1]} : vector<2x24x32xf32> to vector<2x16x32xf32>
    %189 = vector.extract_strided_slice %180 {offsets = [0, 8, 0], sizes = [2, 16, 32], strides = [1, 1, 1]} : vector<2x24x32xf32> to vector<2x16x32xf32>
    %190 = tpu.concatenate %181, %182, %183, %184, %185, %186, %187, %188, %189 in 2 : vector<2x16x32xf32>, vector<2x16x32xf32>, vector<2x16x32xf32>, vector<2x16x32xf32>, vector<2x16x32xf32>, vector<2x16x32xf32>, vector<2x16x32xf32>, vector<2x16x32xf32>, vector<2x16x32xf32> -> vector<2x16x288xf32>
    %191 = vector.shape_cast %190 : vector<2x16x288xf32> to vector<32x288xf32>
    %192 = arith.truncf %191 : vector<32x288xf32> to vector<32x288xbf16>
    %c0_49 = arith.constant 0 : index
    %c0_50 = arith.constant 0 : index
    %193 = vector.load %arg13[%c0_49, %c0_50] : memref<288x32xbf16, #tpu.memory_space<vmem>>, vector<288x32xbf16>
    %cst_51 = arith.constant dense<0.000000e+00> : vector<32x32xf32>
    %194 = tpu.matmul %192, %193, %cst_51 {dimension_numbers = #tpu.dot_dimension_numbers<[1], [0], [0], [1], [0, 0, 1, 1], [], []>} : vector<32x288xbf16>, vector<288x32xbf16>, vector<32x32xf32> -> vector<32x32xf32>
    %195 = tpu.concatenate %50, %94, %142, %194 in 1 : vector<32x32xf32>, vector<32x32xf32>, vector<32x32xf32>, vector<32x32xf32> -> vector<32x128xf32>
    %196 = arith.addf %7, %195 : vector<32x128xf32>
    %197 = vector.shape_cast %196 : vector<32x128xf32> to vector<2x16x128xf32>
    %c0_52 = arith.constant 0 : index
    %c0_53 = arith.constant 0 : index
    %c0_54 = arith.constant 0 : index
    %198 = vector.load %arg15[%c0_52, %c0_53, %c0_54] : memref<2x16x128xf32, #tpu.memory_space<vmem>>, vector<2x16x128xf32>
    tpu.vector_store %arg15[%c0_52, %c0_53, %c0_54], %197 {strides = array<i32>} : memref<2x16x128xf32, #tpu.memory_space<vmem>>, vector<2x16x128xf32>,
    return
  }
  func.func @transform_0(%arg0: i32) -> (i32, i32, i32) {
    %c0_i32 = arith.constant 0 : i32
    %c0_i32_0 = arith.constant 0 : i32
    %c0_i32_1 = arith.constant 0 : i32
    return %arg0, %c0_i32, %c0_i32_0 : i32, i32, i32
  }
  func.func @transform_1(%arg0: i32) -> (i32, i32) {
    %c0_i32 = arith.constant 0 : i32
    %c0_i32_0 = arith.constant 0 : i32
    %c0_i32_1 = arith.constant 0 : i32
    return %c0_i32, %c0_i32_0 : i32, i32
  }
  func.func @transform_2(%arg0: i32) -> (i32, i32) {
    %c0_i32 = arith.constant 0 : i32
    %c0_i32_0 = arith.constant 0 : i32
    %c0_i32_1 = arith.constant 0 : i32
    return %c0_i32, %c0_i32_0 : i32, i32
  }
  func.func @transform_3(%arg0: i32) -> (i32, i32) {
    %c0_i32 = arith.constant 0 : i32
    %c0_i32_0 = arith.constant 0 : i32
    %c0_i32_1 = arith.constant 0 : i32
    return %c0_i32, %c0_i32_0 : i32, i32
  }
  func.func @transform_4(%arg0: i32) -> (i32, i32) {
    %c0_i32 = arith.constant 0 : i32
    %c0_i32_0 = arith.constant 0 : i32
    %c0_i32_1 = arith.constant 0 : i32
    return %c0_i32, %c0_i32_0 : i32, i32
  }
  func.func @transform_5(%arg0: i32) -> (i32, i32) {
    %c0_i32 = arith.constant 0 : i32
    %c0_i32_0 = arith.constant 0 : i32
    %c0_i32_1 = arith.constant 0 : i32
    return %c0_i32, %c0_i32_0 : i32, i32
  }
  func.func @transform_6(%arg0: i32) -> (i32, i32) {
    %c0_i32 = arith.constant 0 : i32
    %c0_i32_0 = arith.constant 0 : i32
    %c0_i32_1 = arith.constant 0 : i32
    return %c0_i32, %c0_i32_0 : i32, i32
  }
  func.func @transform_7(%arg0: i32) -> (i32, i32) {
    %c0_i32 = arith.constant 0 : i32
    %c0_i32_0 = arith.constant 0 : i32
    %c0_i32_1 = arith.constant 0 : i32
    return %c0_i32, %c0_i32_0 : i32, i32
  }
  func.func @transform_8(%arg0: i32) -> (i32, i32) {
    %c0_i32 = arith.constant 0 : i32
    %c0_i32_0 = arith.constant 0 : i32
    %c0_i32_1 = arith.constant 0 : i32
    return %c0_i32, %c0_i32_0 : i32, i32
  }
  func.func @transform_9(%arg0: i32) -> (i32, i32) {
    %c0_i32 = arith.constant 0 : i32
    %c0_i32_0 = arith.constant 0 : i32
    %c0_i32_1 = arith.constant 0 : i32
    return %c0_i32, %c0_i32_0 : i32, i32
  }
  func.func @transform_10(%arg0: i32) -> (i32, i32) {
    %c0_i32 = arith.constant 0 : i32
    %c0_i32_0 = arith.constant 0 : i32
    %c0_i32_1 = arith.constant 0 : i32
    return %c0_i32, %c0_i32_0 : i32, i32
  }
  func.func @transform_11(%arg0: i32) -> (i32, i32) {
    %c0_i32 = arith.constant 0 : i32
    %c0_i32_0 = arith.constant 0 : i32
    %c0_i32_1 = arith.constant 0 : i32
    return %c0_i32, %c0_i32_0 : i32, i32
  }
  func.func @transform_12(%arg0: i32) -> (i32, i32) {
    %c0_i32 = arith.constant 0 : i32
    %c0_i32_0 = arith.constant 0 : i32
    %c0_i32_1 = arith.constant 0 : i32
    return %c0_i32, %c0_i32_0 : i32, i32
  }
  func.func @transform_13(%arg0: i32) -> (i32, i32) {
    %c0_i32 = arith.constant 0 : i32
    %c0_i32_0 = arith.constant 0 : i32
    %c0_i32_1 = arith.constant 0 : i32
    return %c0_i32, %c0_i32_0 : i32, i32
  }
  func.func @transform_14(%arg0: i32) -> (i32, i32, i32) {
    %c0_i32 = arith.constant 0 : i32
    %c0_i32_0 = arith.constant 0 : i32
    %c0_i32_1 = arith.constant 0 : i32
    return %arg0, %c0_i32, %c0_i32_0 : i32, i32, i32
  }
}

</mosaic_0001>

<bundles_post_ra>
// kernel: tile.112
= control target key start
LH: loop header
LB: loop body
LE: loop exit
PB: predicated region body
PF: predicated region fallthrough
CT: control target
= control target key end

     0   :  { %s28_s0 = inlined_call_operand.vmem [shape: f32[2], index: 0, kind: input, shape index: {}]   ;;  %s29_s1 = inlined_call_operand.vmem [shape: f32[16,2], index: 1, kind: output, shape index: {}]  }
   0x1   :  { %v4_v0 = vld [vmem:[%s28_s0] ss:$0 sm:$0xff] }
   0x2   :  { %5 = vst [vmem:[%s29_s1] sm:$0xff] %v4_v0  ;;  %8 = vst [vmem:[%s29_s1 + $0x8] sm:$0xff] %v4_v0 }

// kernel: tile.113
= control target key start
LH: loop header
LB: loop body
LE: loop exit
PB: predicated region body
PF: predicated region fallthrough
CT: control target
= control target key end

     0   :  { %s133_s10 = smov 30   ;;  %s134_s11 = smov 26   ;;  %vm3_vm0 = vcmask 15360   ;;  %vm9_vm1 = vcmask 261360   ;;  %vm15_vm2 = vcmask 244960   ;;  %vm21_vm3 = vcmask 228560   ;;  %s209_s0 = inlined_call_operand.vmem [shape: f32[16,2], index: 0, kind: input, shape index: {}]   ;;  %s210_s1 = inlined_call_operand.vmem [shape: f32[32], index: 1, kind: output, shape index: {}]  }
   0x1   :  { %v103_v0 = vld [vmem:[%s209_s0 + $0xf] sm:$0x1]   ;;  %v105_v1 = vld [vmem:[%s209_s0 + $0xd] sm:$0x1]   ;;  %v104_v2 = vld [vmem:[%s209_s0 + $0xe] sm:$0x1]  }
   0x2   :  { %7 = vrot.lane.b32.xlu0 %v103_v0, %s133_s10  ;;  %19 = vrot.lane.b32.xlu1 %v105_v1, %s134_s11  ;;  %v106_v3 = vld [vmem:[%s209_s0 + $0xc] sm:$0x1]   ;;  %s135_s16 = smov 28   ;;  %s136_s17 = smov 24   ;;  %v107_v4 = vld [vmem:[%s209_s0 + $0xb] sm:$0x1]  }
   0x3   :  { %v108_v5 = vld [vmem:[%s209_s0 + $0xa] sm:$0x1]   ;;  %v2_v6 = vld [vmem:[%s209_s0] sm:$0x1]   ;;  %s137_s24 = smov 22   ;;  %s138_s25 = smov 20  }
   0x4   :  { %4 = vst.msk [vmem:[#allocation0] sm:$0x1] %vm3_vm0, %v2_v6   ;;  %v109_v7 = vld [vmem:[%s209_s0 + $0x9] sm:$0x1]   ;;  %v110_v8 = vld [vmem:[%s209_s0 + $0x8] sm:$0x1]  }
   0x5   :  { %s139_s30 = smov 18   ;;  %s140_s2 = smov 16   ;;  %v111_v9 = vld [vmem:[%s209_s0 + $0x7] sm:$0x1]   ;;  %v112_v10 = vld [vmem:[%s209_s0 + $0x6] sm:$0x1]  }
   0x6   :  { %13 = vrot.lane.b32.xlu0 %v104_v2, %s135_s16  ;;  %25 = vrot.lane.b32.xlu1 %v106_v3, %s136_s17  ;;  %s141_s7 = smov 14   ;;  %s142_s8 = smov 12   ;;  %v113_v11 = vld [vmem:[%s209_s0 + $0x5] sm:$0x1]   ;;  %v114_v12 = vld [vmem:[%s209_s0 + $0x4] sm:$0x1]  }
   0x7   :  { %s143_s13 = smov 10   ;;  %s144_s14 = smov 8   ;;  %v115_v13 = vld [vmem:[%s209_s0 + $0x3] sm:$0x1]   ;;  %v116_v14 = vld [vmem:[%s209_s0 + $0x2] sm:$0x1]  }
   0x8   :  { %s145_s19 = smov 6   ;;  %s146_s20 = smov 4   ;;  %v117_v15 = vld [vmem:[%s209_s0 + $0x1] sm:$0x1]   ;;  %vm27_vm4 = vcmask 212160   ;;  %vm33_vm5 = vcmask 195760  }
   0x9   :  { %s147_s0 = smov 2   ;;  %vm39_vm6 = vcmask 179360   ;;  %vm45_vm7 = vcmask 162960   ;;  %vm51_vm8 = vcmask 146560   ;;  %vm57_vm9 = vcmask 130160  }
   0xa   :  { %31 = vrot.lane.b32.xlu0 %v107_v4, %s137_s24  ;;  %37 = vrot.lane.b32.xlu1 %v108_v5, %s138_s25  ;;  %vm63_vm10 = vcmask 113760   ;;  %vm69_vm11 = vcmask 97360   ;;  %vm75_vm12 = vcmask 80960   ;;  %vm81_vm13 = vcmask 64560  }
   0xb   :  { %vm87_vm14 = vcmask 48160   ;;  %vm93_vm15 = vcmask 31760  }
   0xe   :  { %43 = vrot.lane.b32.xlu0 %v109_v7, %s139_s30  ;;  %49 = vrot.lane.b32.xlu1 %v110_v8, %s140_s2 }
  0x12   :  { %55 = vrot.lane.b32.xlu0 %v111_v9, %s141_s7  ;;  %61 = vrot.lane.b32.xlu1 %v112_v10, %s142_s8 }
  0x16   :  { %67 = vrot.lane.b32.xlu0 %v113_v11, %s143_s13  ;;  %73 = vrot.lane.b32.xlu1 %v114_v12, %s144_s14 }
  0x1a   :  { %79 = vrot.lane.b32.xlu0 %v115_v13, %s145_s19  ;;  %85 = vrot.lane.b32.xlu1 %v116_v14, %s146_s20 }
  0x1e   :  { %91 = vrot.lane.b32.xlu0 %v117_v15, %s147_s0 }
  0x74   :  { %v8_v16 = vpop.permute.xlu0 %7   ;;  %v20_v17 = vpop.permute.xlu1 %19  }
  0x75   :  { %10 = vst.msk [vmem:[#allocation0] sm:$0x1] %vm9_vm1, %v8_v16  }
  0x78   :  { %v14_v18 = vpop.permute.xlu0 %13   ;;  %v26_v19 = vpop.permute.xlu1 %25  }
  0x79   :  { %16 = vst.msk [vmem:[#allocation0] sm:$0x1] %vm15_vm2, %v14_v18  }
  0x7a   :  { %22 = vst.msk [vmem:[#allocation0] sm:$0x1] %vm21_vm3, %v20_v17  }
  0x7b   :  { %28 = vst.msk [vmem:[#allocation0] sm:$0x1] %vm27_vm4, %v26_v19  }
  0x7c   :  { %v32_v20 = vpop.permute.xlu0 %31   ;;  %v38_v21 = vpop.permute.xlu1 %37  }
  0x7d   :  { %34 = vst.msk [vmem:[#allocation0] sm:$0x1] %vm33_vm5, %v32_v20  }
  0x7e   :  { %40 = vst.msk [vmem:[#allocation0] sm:$0x1] %vm39_vm6, %v38_v21  }
  0x80   :  { %v44_v22 = vpop.permute.xlu0 %43   ;;  %v50_v23 = vpop.permute.xlu1 %49  }
  0x81   :  { %46 = vst.msk [vmem:[#allocation0] sm:$0x1] %vm45_vm7, %v44_v22  }
  0x82   :  { %52 = vst.msk [vmem:[#allocation0] sm:$0x1] %vm51_vm8, %v50_v23  }
  0x84   :  { %v56_v24 = vpop.permute.xlu0 %55   ;;  %v62_v25 = vpop.permute.xlu1 %61  }
  0x85   :  { %58 = vst.msk [vmem:[#allocation0] sm:$0x1] %vm57_vm9, %v56_v24  }
  0x86   :  { %64 = vst.msk [vmem:[#allocation0] sm:$0x1] %vm63_vm10, %v62_v25  }
  0x88   :  { %v68_v26 = vpop.permute.xlu0 %67   ;;  %v74_v27 = vpop.permute.xlu1 %73  }
  0x89   :  { %70 = vst.msk [vmem:[#allocation0] sm:$0x1] %vm69_vm11, %v68_v26  }
  0x8a   :  { %76 = vst.msk [vmem:[#allocation0] sm:$0x1] %vm75_vm12, %v74_v27  }
  0x8c   :  { %v80_v28 = vpop.permute.xlu0 %79   ;;  %v86_v29 = vpop.permute.xlu1 %85  }
  0x8d   :  { %82 = vst.msk [vmem:[#allocation0] sm:$0x1] %vm81_vm13, %v80_v28  }
  0x8e   :  { %88 = vst.msk [vmem:[#allocation0] sm:$0x1] %vm87_vm14, %v86_v29  }
  0x90   :  { %v92_v30 = vpop.permute.xlu0 %91  }
  0x91   :  { %94 = vst.msk [vmem:[#allocation0] sm:$0x1] %vm93_vm15, %v92_v30  }
  0x98   :  { %v99_v31 = vld [vmem:[#allocation0] sm:$0x1] }
  0x99   :  { %102 = vst [vmem:[%s210_s1] sm:$0x1] %v99_v31 }

// kernel: tile.83
= control target key start
LH: loop header
LB: loop body
LE: loop exit
PB: predicated region body
PF: predicated region fallthrough
CT: control target
= control target key end

     0   :  { %s28_s0 = inlined_call_operand.vmem [shape: f32[4], index: 0, kind: input, shape index: {}]   ;;  %s29_s1 = inlined_call_operand.vmem [shape: f32[16,4], index: 1, kind: output, shape index: {}]  }
   0x1   :  { %v4_v0 = vld [vmem:[%s28_s0] ss:$0 sm:$0xff] }
   0x2   :  { %5 = vst [vmem:[%s29_s1] sm:$0xff] %v4_v0  ;;  %8 = vst [vmem:[%s29_s1 + $0x8] sm:$0xff] %v4_v0 }

// kernel: tile.148
= control target key start
LH: loop header
LB: loop body
LE: loop exit
PB: predicated region body
PF: predicated region fallthrough
CT: control target
= control target key end

     0   :  { %s133_s10 = smov 60   ;;  %s134_s11 = smov 52   ;;  %vm3_vm0 = vcmask 31744   ;;  %vm9_vm1 = vcmask 523744   ;;  %vm15_vm2 = vcmask 490944   ;;  %vm21_vm3 = vcmask 458144   ;;  %s209_s0 = inlined_call_operand.vmem [shape: f32[16,4], index: 0, kind: input, shape index: {}]   ;;  %s210_s1 = inlined_call_operand.vmem [shape: f32[1,64], index: 1, kind: output, shape index: {}]  }
   0x1   :  { %v103_v0 = vld [vmem:[%s209_s0 + $0xf] sm:$0x1]   ;;  %v105_v1 = vld [vmem:[%s209_s0 + $0xd] sm:$0x1]   ;;  %v104_v2 = vld [vmem:[%s209_s0 + $0xe] sm:$0x1]  }
   0x2   :  { %7 = vrot.lane.b32.xlu0 %v103_v0, %s133_s10  ;;  %19 = vrot.lane.b32.xlu1 %v105_v1, %s134_s11  ;;  %v106_v3 = vld [vmem:[%s209_s0 + $0xc] sm:$0x1]   ;;  %s135_s16 = smov 56   ;;  %s136_s17 = smov 48   ;;  %v107_v4 = vld [vmem:[%s209_s0 + $0xb] sm:$0x1]  }
   0x3   :  { %v108_v5 = vld [vmem:[%s209_s0 + $0xa] sm:$0x1]   ;;  %v2_v6 = vld [vmem:[%s209_s0] sm:$0x1]   ;;  %s137_s24 = smov 44   ;;  %s138_s25 = smov 40  }
   0x4   :  { %4 = vst.msk [vmem:[#allocation0] sm:$0x1] %vm3_vm0, %v2_v6   ;;  %v109_v7 = vld [vmem:[%s209_s0 + $0x9] sm:$0x1]   ;;  %v110_v8 = vld [vmem:[%s209_s0 + $0x8] sm:$0x1]  }
   0x5   :  { %s139_s30 = smov 36   ;;  %s140_s2 = smov 32   ;;  %v111_v9 = vld [vmem:[%s209_s0 + $0x7] sm:$0x1]   ;;  %v112_v10 = vld [vmem:[%s209_s0 + $0x6] sm:$0x1]  }
   0x6   :  { %13 = vrot.lane.b32.xlu0 %v104_v2, %s135_s16  ;;  %25 = vrot.lane.b32.xlu1 %v106_v3, %s136_s17  ;;  %s141_s7 = smov 28   ;;  %s142_s8 = smov 24   ;;  %v113_v11 = vld [vmem:[%s209_s0 + $0x5] sm:$0x1]   ;;  %v114_v12 = vld [vmem:[%s209_s0 + $0x4] sm:$0x1]  }
   0x7   :  { %s143_s13 = smov 20   ;;  %s144_s14 = smov 16   ;;  %v115_v13 = vld [vmem:[%s209_s0 + $0x3] sm:$0x1]   ;;  %v116_v14 = vld [vmem:[%s209_s0 + $0x2] sm:$0x1]  }
   0x8   :  { %s145_s19 = smov 12   ;;  %s146_s20 = smov 8   ;;  %v117_v15 = vld [vmem:[%s209_s0 + $0x1] sm:$0x1]   ;;  %vm27_vm4 = vcmask 425344   ;;  %vm33_vm5 = vcmask 392544  }
   0x9   :  { %s147_s0 = smov 4   ;;  %vm39_vm6 = vcmask 359744   ;;  %vm45_vm7 = vcmask 326944   ;;  %vm51_vm8 = vcmask 294144   ;;  %vm57_vm9 = vcmask 261344  }
   0xa   :  { %31 = vrot.lane.b32.xlu0 %v107_v4, %s137_s24  ;;  %37 = vrot.lane.b32.xlu1 %v108_v5, %s138_s25  ;;  %vm63_vm10 = vcmask 228544   ;;  %vm69_vm11 = vcmask 195744   ;;  %vm75_vm12 = vcmask 162944   ;;  %vm81_vm13 = vcmask 130144  }
   0xb   :  { %vm87_vm14 = vcmask 97344   ;;  %vm93_vm15 = vcmask 64544  }
   0xe   :  { %43 = vrot.lane.b32.xlu0 %v109_v7, %s139_s30  ;;  %49 = vrot.lane.b32.xlu1 %v110_v8, %s140_s2 }
  0x12   :  { %55 = vrot.lane.b32.xlu0 %v111_v9, %s141_s7  ;;  %61 = vrot.lane.b32.xlu1 %v112_v10, %s142_s8 }
  0x16   :  { %67 = vrot.lane.b32.xlu0 %v113_v11, %s143_s13  ;;  %73 = vrot.lane.b32.xlu1 %v114_v12, %s144_s14 }
  0x1a   :  { %79 = vrot.lane.b32.xlu0 %v115_v13, %s145_s19  ;;  %85 = vrot.lane.b32.xlu1 %v116_v14, %s146_s20 }
  0x1e   :  { %91 = vrot.lane.b32.xlu0 %v117_v15, %s147_s0 }
  0x74   :  { %v8_v16 = vpop.permute.xlu0 %7   ;;  %v20_v17 = vpop.permute.xlu1 %19  }
  0x75   :  { %10 = vst.msk [vmem:[#allocation0] sm:$0x1] %vm9_vm1, %v8_v16  }
  0x78   :  { %v14_v18 = vpop.permute.xlu0 %13   ;;  %v26_v19 = vpop.permute.xlu1 %25  }
  0x79   :  { %16 = vst.msk [vmem:[#allocation0] sm:$0x1] %vm15_vm2, %v14_v18  }
  0x7a   :  { %22 = vst.msk [vmem:[#allocation0] sm:$0x1] %vm21_vm3, %v20_v17  }
  0x7b   :  { %28 = vst.msk [vmem:[#allocation0] sm:$0x1] %vm27_vm4, %v26_v19  }
  0x7c   :  { %v32_v20 = vpop.permute.xlu0 %31   ;;  %v38_v21 = vpop.permute.xlu1 %37  }
  0x7d   :  { %34 = vst.msk [vmem:[#allocation0] sm:$0x1] %vm33_vm5, %v32_v20  }
  0x7e   :  { %40 = vst.msk [vmem:[#allocation0] sm:$0x1] %vm39_vm6, %v38_v21  }
  0x80   :  { %v44_v22 = vpop.permute.xlu0 %43   ;;  %v50_v23 = vpop.permute.xlu1 %49  }
  0x81   :  { %46 = vst.msk [vmem:[#allocation0] sm:$0x1] %vm45_vm7, %v44_v22  }
  0x82   :  { %52 = vst.msk [vmem:[#allocation0] sm:$0x1] %vm51_vm8, %v50_v23  }
  0x84   :  { %v56_v24 = vpop.permute.xlu0 %55   ;;  %v62_v25 = vpop.permute.xlu1 %61  }
  0x85   :  { %58 = vst.msk [vmem:[#allocation0] sm:$0x1] %vm57_vm9, %v56_v24  }
  0x86   :  { %64 = vst.msk [vmem:[#allocation0] sm:$0x1] %vm63_vm10, %v62_v25  }
  0x88   :  { %v68_v26 = vpop.permute.xlu0 %67   ;;  %v74_v27 = vpop.permute.xlu1 %73  }
  0x89   :  { %70 = vst.msk [vmem:[#allocation0] sm:$0x1] %vm69_vm11, %v68_v26  }
  0x8a   :  { %76 = vst.msk [vmem:[#allocation0] sm:$0x1] %vm75_vm12, %v74_v27  }
  0x8c   :  { %v80_v28 = vpop.permute.xlu0 %79   ;;  %v86_v29 = vpop.permute.xlu1 %85  }
  0x8d   :  { %82 = vst.msk [vmem:[#allocation0] sm:$0x1] %vm81_vm13, %v80_v28  }
  0x8e   :  { %88 = vst.msk [vmem:[#allocation0] sm:$0x1] %vm87_vm14, %v86_v29  }
  0x90   :  { %v92_v30 = vpop.permute.xlu0 %91  }
  0x91   :  { %94 = vst.msk [vmem:[#allocation0] sm:$0x1] %vm93_vm15, %v92_v30  }
  0x98   :  { %v99_v31 = vld [vmem:[#allocation0] sm:$0x1] }
  0x99   :  { %102 = vst [vmem:[%s210_s1] sm:$0x1] %v99_v31 }

// kernel: tile.156
= control target key start
LH: loop header
LB: loop body
LE: loop exit
PB: predicated region body
PF: predicated region fallthrough
CT: control target
= control target key end

     0   :  { %s133_s10 = smov 30   ;;  %s134_s11 = smov 26   ;;  %vm3_vm0 = vcmask 15360   ;;  %vm9_vm1 = vcmask 261360   ;;  %vm15_vm2 = vcmask 244960   ;;  %vm21_vm3 = vcmask 228560   ;;  %s209_s0 = inlined_call_operand.vmem [shape: f32[16,2], index: 0, kind: input, shape index: {}]   ;;  %s210_s1 = inlined_call_operand.vmem [shape: f32[1,32], index: 1, kind: output, shape index: {}]  }
   0x1   :  { %v103_v0 = vld [vmem:[%s209_s0 + $0xf] sm:$0x1]   ;;  %v105_v1 = vld [vmem:[%s209_s0 + $0xd] sm:$0x1]   ;;  %v104_v2 = vld [vmem:[%s209_s0 + $0xe] sm:$0x1]  }
   0x2   :  { %7 = vrot.lane.b32.xlu0 %v103_v0, %s133_s10  ;;  %19 = vrot.lane.b32.xlu1 %v105_v1, %s134_s11  ;;  %v106_v3 = vld [vmem:[%s209_s0 + $0xc] sm:$0x1]   ;;  %s135_s16 = smov 28   ;;  %s136_s17 = smov 24   ;;  %v107_v4 = vld [vmem:[%s209_s0 + $0xb] sm:$0x1]  }
   0x3   :  { %v108_v5 = vld [vmem:[%s209_s0 + $0xa] sm:$0x1]   ;;  %v2_v6 = vld [vmem:[%s209_s0] sm:$0x1]   ;;  %s137_s24 = smov 22   ;;  %s138_s25 = smov 20  }
   0x4   :  { %4 = vst.msk [vmem:[#allocation0] sm:$0x1] %vm3_vm0, %v2_v6   ;;  %v109_v7 = vld [vmem:[%s209_s0 + $0x9] sm:$0x1]   ;;  %v110_v8 = vld [vmem:[%s209_s0 + $0x8] sm:$0x1]  }
   0x5   :  { %s139_s30 = smov 18   ;;  %s140_s2 = smov 16   ;;  %v111_v9 = vld [vmem:[%s209_s0 + $0x7] sm:$0x1]   ;;  %v112_v10 = vld [vmem:[%s209_s0 + $0x6] sm:$0x1]  }
   0x6   :  { %13 = vrot.lane.b32.xlu0 %v104_v2, %s135_s16  ;;  %25 = vrot.lane.b32.xlu1 %v106_v3, %s136_s17  ;;  %s141_s7 = smov 14   ;;  %s142_s8 = smov 12   ;;  %v113_v11 = vld [vmem:[%s209_s0 + $0x5] sm:$0x1]   ;;  %v114_v12 = vld [vmem:[%s209_s0 + $0x4] sm:$0x1]  }
   0x7   :  { %s143_s13 = smov 10   ;;  %s144_s14 = smov 8   ;;  %v115_v13 = vld [vmem:[%s209_s0 + $0x3] sm:$0x1]   ;;  %v116_v14 = vld [vmem:[%s209_s0 + $0x2] sm:$0x1]  }
   0x8   :  { %s145_s19 = smov 6   ;;  %s146_s20 = smov 4   ;;  %v117_v15 = vld [vmem:[%s209_s0 + $0x1] sm:$0x1]   ;;  %vm27_vm4 = vcmask 212160   ;;  %vm33_vm5 = vcmask 195760  }
   0x9   :  { %s147_s0 = smov 2   ;;  %vm39_vm6 = vcmask 179360   ;;  %vm45_vm7 = vcmask 162960   ;;  %vm51_vm8 = vcmask 146560   ;;  %vm57_vm9 = vcmask 130160  }
   0xa   :  { %31 = vrot.lane.b32.xlu0 %v107_v4, %s137_s24  ;;  %37 = vrot.lane.b32.xlu1 %v108_v5, %s138_s25  ;;  %vm63_vm10 = vcmask 113760   ;;  %vm69_vm11 = vcmask 97360   ;;  %vm75_vm12 = vcmask 80960   ;;  %vm81_vm13 = vcmask 64560  }
   0xb   :  { %vm87_vm14 = vcmask 48160   ;;  %vm93_vm15 = vcmask 31760  }
   0xe   :  { %43 = vrot.lane.b32.xlu0 %v109_v7, %s139_s30  ;;  %49 = vrot.lane.b32.xlu1 %v110_v8, %s140_s2 }
  0x12   :  { %55 = vrot.lane.b32.xlu0 %v111_v9, %s141_s7  ;;  %61 = vrot.lane.b32.xlu1 %v112_v10, %s142_s8 }
  0x16   :  { %67 = vrot.lane.b32.xlu0 %v113_v11, %s143_s13  ;;  %73 = vrot.lane.b32.xlu1 %v114_v12, %s144_s14 }
  0x1a   :  { %79 = vrot.lane.b32.xlu0 %v115_v13, %s145_s19  ;;  %85 = vrot.lane.b32.xlu1 %v116_v14, %s146_s20 }
  0x1e   :  { %91 = vrot.lane.b32.xlu0 %v117_v15, %s147_s0 }
  0x74   :  { %v8_v16 = vpop.permute.xlu0 %7   ;;  %v20_v17 = vpop.permute.xlu1 %19  }
  0x75   :  { %10 = vst.msk [vmem:[#allocation0] sm:$0x1] %vm9_vm1, %v8_v16  }
  0x78   :  { %v14_v18 = vpop.permute.xlu0 %13   ;;  %v26_v19 = vpop.permute.xlu1 %25  }
  0x79   :  { %16 = vst.msk [vmem:[#allocation0] sm:$0x1] %vm15_vm2, %v14_v18  }
  0x7a   :  { %22 = vst.msk [vmem:[#allocation0] sm:$0x1] %vm21_vm3, %v20_v17  }
  0x7b   :  { %28 = vst.msk [vmem:[#allocation0] sm:$0x1] %vm27_vm4, %v26_v19  }
  0x7c   :  { %v32_v20 = vpop.permute.xlu0 %31   ;;  %v38_v21 = vpop.permute.xlu1 %37  }
  0x7d   :  { %34 = vst.msk [vmem:[#allocation0] sm:$0x1] %vm33_vm5, %v32_v20  }
  0x7e   :  { %40 = vst.msk [vmem:[#allocation0] sm:$0x1] %vm39_vm6, %v38_v21  }
  0x80   :  { %v44_v22 = vpop.permute.xlu0 %43   ;;  %v50_v23 = vpop.permute.xlu1 %49  }
  0x81   :  { %46 = vst.msk [vmem:[#allocation0] sm:$0x1] %vm45_vm7, %v44_v22  }
  0x82   :  { %52 = vst.msk [vmem:[#allocation0] sm:$0x1] %vm51_vm8, %v50_v23  }
  0x84   :  { %v56_v24 = vpop.permute.xlu0 %55   ;;  %v62_v25 = vpop.permute.xlu1 %61  }
  0x85   :  { %58 = vst.msk [vmem:[#allocation0] sm:$0x1] %vm57_vm9, %v56_v24  }
  0x86   :  { %64 = vst.msk [vmem:[#allocation0] sm:$0x1] %vm63_vm10, %v62_v25  }
  0x88   :  { %v68_v26 = vpop.permute.xlu0 %67   ;;  %v74_v27 = vpop.permute.xlu1 %73  }
  0x89   :  { %70 = vst.msk [vmem:[#allocation0] sm:$0x1] %vm69_vm11, %v68_v26  }
  0x8a   :  { %76 = vst.msk [vmem:[#allocation0] sm:$0x1] %vm75_vm12, %v74_v27  }
  0x8c   :  { %v80_v28 = vpop.permute.xlu0 %79   ;;  %v86_v29 = vpop.permute.xlu1 %85  }
  0x8d   :  { %82 = vst.msk [vmem:[#allocation0] sm:$0x1] %vm81_vm13, %v80_v28  }
  0x8e   :  { %88 = vst.msk [vmem:[#allocation0] sm:$0x1] %vm87_vm14, %v86_v29  }
  0x90   :  { %v92_v30 = vpop.permute.xlu0 %91  }
  0x91   :  { %94 = vst.msk [vmem:[#allocation0] sm:$0x1] %vm93_vm15, %v92_v30  }
  0x98   :  { %v99_v31 = vld [vmem:[#allocation0] sm:$0x1] }
  0x99   :  { %102 = vst [vmem:[%s210_s1] sm:$0x1] %v99_v31 }

// kernel: resblock_forward.1
= control target key start
LH: loop header
LB: loop body
LE: loop exit
PB: predicated region body
PF: predicated region fallthrough
CT: control target
= control target key end

     0   :  { %v152_v0 = vlaneseq  ;;  %v4079_v1 = vmov 0   ;;  %vm176_vm0 = vcmask 1040384   ;;  %vm197_vm1 = vcmask 1046528   ;;  %s4080_s21 = smov 64   ;;  %s5604_s0 = inlined_call_operand.vmem [shape: f32[2,16,64], index: 0, kind: input, shape index: {}]   ;;  %s5605_s1 = inlined_call_operand.vmem [shape: f32[4,64], index: 1, kind: input, shape index: {}]   ;;  %s5606_s2 = inlined_call_operand.vmem [shape: f32[4,64], index: 2, kind: input, shape index: {}]   ;;  %s5607_s5 = inlined_call_operand.vmem [shape: bf16[192,32], index: 5, kind: input, shape index: {}]   ;;  %s5608_s13 = inlined_call_operand.vmem [shape: bf16[64,128], index: 13, kind: input, shape index: {}]   ;;  %s5609_s9 = inlined_call_operand.vmem [shape: bf16[96,32], index: 9, kind: input, shape index: {}]   ;;  %s5610_s3 = inlined_call_operand.vmem [shape: f32[4,32], index: 3, kind: input, shape index: {}]   ;;  %s5611_s6 = inlined_call_operand.vmem [shape: bf16[320,32], index: 6, kind: input, shape index: {}]   ;;  %s5612_s7 = inlined_call_operand.vmem [shape: bf16[448,32], index: 7, kind: input, shape index: {}]   ;;  %s5613_s10 = inlined_call_operand.vmem [shape: bf16[160,32], index: 10, kind: input, shape index: {}]   ;;  %s5614_s11 = inlined_call_operand.vmem [shape: bf16[224,32], index: 11, kind: input, shape index: {}]   ;;  %s5615_s8 = inlined_call_operand.vmem [shape: bf16[576,32], index: 8, kind: input, shape index: {}]   ;;  %s5616_s12 = inlined_call_operand.vmem [shape: bf16[288,32], index: 12, kind: input, shape index: {}]   ;;  %s5617_s4 = inlined_call_operand.vmem [shape: f32[1,128], index: 4, kind: input, shape index: {}]   ;;  %s5618_s14 = inlined_call_operand.vmem [shape: f32[2,16,128], index: 14, kind: output, shape index: {}]  }
   0x1   :  { %349 = vmatprep.subr.bf16.mxu1 %v4079_v1  ;;  %v4162_v2 = vld [vmem:[%s5605_s1] sm:$0xf]  ;;  %v4179_v6 = vld [vmem:[%s5604_s0 + $0x8] sm:$0xff]  ;;  %v4184_v7 = vld [vmem:[%s5604_s0 + $0x10] sm:$0xff]  ;;  %vm220_vm2 = vcmask 1045504   ;;  %vm93_vm3 = vcmask 523264  }
   0x2   :  { %v4167_v3 = vld [vmem:[%s5606_s2] sm:$0xf]  ;;  %v4169_v4 = vshrl.u32 %v152_v0, 7  ;;  %v3923_v8 = vld [vmem:[%s5607_s5 + $0x38] sm:$0xff]   ;;  %v3924_v11 = vld [vmem:[%s5607_s5 + $0x30] sm:$0xff]   ;;  %vm609_vm4 = vcmask 1041408  }
   0x3   :  { %v4174_v5 = vld [vmem:[%s5604_s0] sm:$0xff]  ;;  %v4195_v10 = vld [vmem:[%s5604_s0 + $0x18] sm:$0xff]  ;;  %350 = vmatpush1.bf16.msra.mxu1 %v3923_v8  ;;  %v3925_v18 = vld [vmem:[%s5607_s5 + $0x28] sm:$0xff]   ;;  %vm666_vm5 = vcmask 1044480   ;;  %vm1269_vm6 = vcmask 1042432   ;;  %vm470_vm7 = vcmask 261120  }
   0x4   :  { %v4190_v9 = vsub.s32 0, %v4169_v4  ;;  %351 = vmatprep.subr.bf16.mxu1 %v4079_v1  ;;  %v3926_v27 = vld [vmem:[%s5607_s5 + $0x20] sm:$0xff]   ;;  %v3927_v40 = vld [vmem:[%s5607_s5 + $0x18] sm:$0xff]   ;;  %v3928_v53 = vld [vmem:[%s5607_s5 + $0x10] sm:$0xff]   ;;  %vm529_vm8 = vcmask 785408   ;;  %vm689_vm9 = vcmask 1043456  }
   0x5   :  { %v3929_v58 = vld [vmem:[%s5607_s5 + $0x8] sm:$0xff]   ;;  %v3930_v59 = vld [vmem:[%s5607_s5] sm:$0xff]   ;;  %v3931_v60 = vld [vmem:[%s5607_s5 + $0x58] sm:$0xff]  }
   0x6   :  { %v155_v12 = vrot.slane %v4162_v2, %v4190_v9  ;;  %v163_v13 = vrot.slane %v4167_v3, %v4190_v9  ;;  %v3932_v61 = vld [vmem:[%s5607_s5 + $0x50] sm:$0xff]   ;;  %v3933_v62 = vld [vmem:[%s5607_s5 + $0x48] sm:$0xff]   ;;  %v3934_v63 = vld [vmem:[%s5607_s5 + $0x40] sm:$0xff]  }
   0x7   :  { %352 = vmatpush1.bf16.msra.mxu1 %v3924_v11 }
   0x8   :  { %v156_v14 = vmul.f32 %v155_v12, %v4174_v5  ;;  %v157_v15 = vmul.f32 %v155_v12, %v4179_v6  ;;  %v158_v16 = vmul.f32 %v155_v12, %v4184_v7  ;;  %v159_v17 = vmul.f32 %v155_v12, %v4195_v10  ;;  %353 = vmatprep.subr.bf16.mxu1 %v4079_v1 }
   0xa   :  { %v164_v19 = vadd.f32 %v163_v13, %v156_v14  ;;  %v165_v20 = vadd.f32 %v163_v13, %v157_v15  ;;  %v166_v21 = vadd.f32 %v163_v13, %v158_v16  ;;  %v167_v22 = vadd.f32 %v163_v13, %v159_v17 }
   0xb   :  { %354 = vmatpush1.bf16.msra.mxu1 %v3925_v18 }
   0xc   :  { %v168_v23 = vmax.f32 %v164_v19, 0.0  ;;  %v169_v24 = vmax.f32 %v165_v20, 0.0  ;;  %v170_v25 = vmax.f32 %v166_v21, 0.0  ;;  %v171_v26 = vmax.f32 %v167_v22, 0.0  ;;  %355 = vmatprep.subr.bf16.mxu1 %v4079_v1 }
   0xe   :  { %v177_v28 = vrot.slane %v168_v23, 7  ;;  %v178_v29 = vrot.slane %v169_v24, 7  ;;  %v180_v30 = vrot.slane %v170_v25, 7  ;;  %v181_v31 = vrot.slane %v171_v26, 7 }
   0xf   :  { %356 = vmatpush1.bf16.msra.mxu1 %v3926_v27  ;;  %v3935_v27 = vld [vmem:[%s5608_s13 + $0x18] sm:$0xff]  }
  0x10   :  { %v4218_v32 = vsel %vm176_vm0, %v177_v28, %v178_v29  ;;  %v4221_v33 = vsel %vm176_vm0, 0.0, %v177_v28  ;;  %v191_v34 = vsel %vm176_vm0, %v178_v29, 0.0  ;;  %v4225_v35 = vsel %vm176_vm0, %v180_v30, %v181_v31  ;;  %357 = vmatprep.subr.bf16.mxu1 %v4079_v1  ;;  %3599 = vmatprep.subr.bf16.mxu0 %v3935_v27  ;;  %v3936_v28 = vld [vmem:[%s5608_s13 + $0x10] sm:$0xff]   ;;  %v3937_v29 = vld [vmem:[%s5608_s13 + $0x8] sm:$0xff]  }
  0x11   :  { %v198_v36 = vrot.slane %v4221_v33, 1  ;;  %v199_v37 = vrot.slane %v4218_v32, 1  ;;  %v201_v38 = vrot.slane %v191_v34, 1  ;;  %v4230_v39 = vsel %vm176_vm0, 0.0, %v180_v30  ;;  %3600 = vmatpush3.bf16.msra.mxu0 %v3935_v27  ;;  %v3938_v30 = vld [vmem:[%s5608_s13] sm:$0xff]  }
  0x12   :  { %v192_v41 = vsel %vm176_vm0, %v181_v31, 0.0  ;;  %v203_v42 = vrot.slane %v4230_v39, 1  ;;  %v204_v43 = vrot.slane %v4225_v35, 1  ;;  %v221_v44 = vrot.slane %v4221_v33, 2  ;;  %3601 = vmatprep.subr.bf16.mxu0 %v3936_v28 }
  0x13   :  { %v200_v45 = vsel %vm197_vm1, %v198_v36, %v199_v37  ;;  %v202_v46 = vsel %vm197_vm1, %v199_v37, %v201_v38  ;;  %v206_v47 = vrot.slane %v192_v41, 1  ;;  %v222_v50 = vrot.slane %v4218_v32, 2  ;;  %358 = vmatpush1.bf16.msra.mxu1 %v3927_v40 }
  0x14   :  { %v3663_v48 = vpack.i.bf16 %v202_v46, %v200_v45  ;;  %v205_v49 = vsel %vm197_vm1, %v203_v42, %v204_v43  ;;  %v224_v51 = vrot.slane %v191_v34, 2  ;;  %359 = vmatprep.subr.bf16.mxu1 %v4079_v1  ;;  %v229_v0 = vrot.slane %v192_v41, 2  ;;  %v3940_v34 = vld [vmem:[%s5609_s9 + $0x20] sm:$0xff]  }
  0x15   :  { %v207_v52 = vsel %vm197_vm1, %v204_v43, %v206_v47  ;;  %v223_v55 = vsel %vm220_vm2, %v221_v44, %v222_v50  ;;  %v226_v8 = vrot.slane %v4230_v39, 2  ;;  %v227_v11 = vrot.slane %v4225_v35, 2  ;;  %3602 = vmatpush3.bf16.msra.mxu0 %v3936_v28 }
  0x16   :  { %3664 = vrot.lane.b32.xlu0 %v3663_v48, %s4080_s21  ;;  %v3668_v54 = vpack.i.bf16 %v207_v52, %v205_v49  ;;  %v225_v56 = vsel %vm220_vm2, %v222_v50, %v224_v51  ;;  %3603 = vmatprep.subr.bf16.mxu0 %v3937_v29  ;;  %v52_v31 = vpack.c.bf16 %v4179_v6, %v4174_v5  ;;  %v4326_v40 = vsub.s32 2, %v4169_v4  ;;  %v151_v51 = vld [vmem:[%s5610_s3] sm:$0xf] }
  0x17   :  { %v240_v57 = vpack.c.bf16 %v225_v56, %v223_v55  ;;  %360 = vmatpush1.bf16.msra.mxu1 %v3928_v53  ;;  %v228_v13 = vsel %vm220_vm2, %v226_v8, %v227_v11  ;;  %v230_v14 = vsel %vm220_vm2, %v227_v11, %v229_v0 }
  0x18   :  { %361 = vmatprep.subr.bf16.mxu1 %v4079_v1  ;;  %v242_v19 = vpack.c.bf16 %v230_v14, %v228_v13  ;;  %3607 = vmatprep.mubr.msk.bf16.mxu0 %vm93_vm3, %v52_v31  ;;  %v1248_v45 = vrot.slane %v4162_v2, %v4326_v40  ;;  %v1256_v50 = vrot.slane %v4167_v3, %v4326_v40 }
  0x19   :  { %3281 = vmatprep.mubr.msk.bf16.mxu1 %vm93_vm3, %v240_v57  ;;  %3604 = vmatpush3.bf16.msra.mxu0 %v3937_v29  ;;  %v3942_v29 = vld [vmem:[%s5609_s9 + $0x10] sm:$0xff]  }
  0x1a   :  { %3669 = vrot.lane.b32.xlu0 %v3668_v54, %s4080_s21  ;;  %3605 = vmatprep.subr.bf16.mxu0 %v3938_v30  ;;  %v1249_v52 = vmul.f32 %v1248_v45, %v4174_v5  ;;  %v1250_v53 = vmul.f32 %v1248_v45, %v4179_v6 }
  0x1b   :  { %362 = vmatpush1.bf16.msra.mxu1 %v3929_v58 }
  0x1c   :  { %363 = vmatprep.subr.bf16.mxu1 %v4079_v1  ;;  %v1257_v58 = vadd.f32 %v1256_v50, %v1249_v52 }
  0x1d   :  { %3606 = vmatpush3.bf16.msra.mxu0 %v3938_v30 }
  0x1f   :  { %364 = vmatpush1.bf16.msra.mxu1 %v3930_v59  ;;  %v1258_v59 = vadd.f32 %v1256_v50, %v1250_v53 }
  0x20   :  { %373 = vmatprep.subr.bf16.mxu1 %v4079_v1 }
  0x21   :  { %v1262_v13 = vmax.f32 %v1258_v59, 0.0 }
  0x23   :  { %374 = vmatpush2.bf16.msra.mxu1 %v3931_v60  ;;  %v1271_v28 = vrot.slane %v1262_v13, 5 }
  0x24   :  { %375 = vmatprep.subr.bf16.mxu1 %v4079_v1 }
  0x27   :  { %376 = vmatpush2.bf16.msra.mxu1 %v3932_v61  ;;  %v1251_v61 = vmul.f32 %v1248_v45, %v4184_v7 }
  0x28   :  { %377 = vmatprep.subr.bf16.mxu1 %v4079_v1 }
  0x29   :  { %v1259_v8 = vadd.f32 %v1256_v50, %v1251_v61 }
  0x2b   :  { %378 = vmatpush2.bf16.msra.mxu1 %v3933_v62  ;;  %v1252_v62 = vmul.f32 %v1248_v45, %v4195_v10 }
  0x2c   :  { %379 = vmatprep.subr.bf16.mxu1 %v4079_v1 }
  0x2f   :  { %380 = vmatpush2.bf16.msra.mxu1 %v3934_v63 }
  0x30   :  { %1196 = vmatprep.subr.bf16.mxu1 %v4079_v1 }
  0x88   :  { %v3665_v12 = vpop.permute.xlu0 %3664 }
  0x89   :  { %v3667_v15 = vunpack.i.h.bf16 %v3665_v12  ;;  %v3666_v16 = vunpack.i.l.bf16 %v3665_v12  ;;  %v1261_v12 = vmax.f32 %v1257_v58, 0.0 }
  0x8b   :  { %v235_v17 = vsel %vm93_vm3, %v4221_v33, %v3666_v16  ;;  %v236_v18 = vsel %vm93_vm3, %v4218_v32, %v3667_v15  ;;  %v3939_v32 = vld [vmem:[%s5609_s9 + $0x28] sm:$0xff]   ;;  %v53_v33 = vpack.c.bf16 %v4195_v10, %v4184_v7  ;;  %v1270_v27 = vrot.slane %v1261_v12, 5 }
  0x8c   :  { %v239_v20 = vpack.c.bf16 %v236_v18, %v235_v17  ;;  %v3670_v21 = vpop.permute.xlu0 %3669  ;;  %3611 = vmatprep.subr.bf16.mxu0 %v3939_v32 }
  0x8d   :  { %v3672_v22 = vunpack.i.h.bf16 %v3670_v21  ;;  %v3671_v23 = vunpack.i.l.bf16 %v3670_v21  ;;  %3608 = vmatmul.mubr.msk.bf16.vlgmr.msra.gmra.mxu0 %vm93_vm3, %v53_v33 }
  0x8e   :  { %382 = vmatmul.mubr.bf16.vlgmr.msra.gmra.mxu1 %v239_v20  ;;  %3612 = vmatpush3.bf16.msra.mxu0 %v3939_v32 }
  0x8f   :  { %3282 = vmatprep.mubr.msk.bf16.mxu1 %vm93_vm3, %v242_v19  ;;  %v237_v24 = vsel %vm93_vm3, %v4230_v39, %v3671_v23  ;;  %v238_v25 = vsel %vm93_vm3, %v4225_v35, %v3672_v22  ;;  %3613 = vmatprep.subr.bf16.mxu0 %v3940_v34  ;;  %v4317_v35 = vsub.s32 1, %v4169_v4 }
  0x90   :  { %v241_v26 = vpack.c.bf16 %v238_v25, %v237_v24  ;;  %v1263_v24 = vmax.f32 %v1259_v8, 0.0 }
  0x91   :  { %v588_v36 = vrot.slane %v4162_v2, %v4317_v35  ;;  %v596_v39 = vrot.slane %v4167_v3, %v4317_v35  ;;  %v4340_v2 = vrot.slane %v151_v51, %v4190_v9 }
  0x92   :  { %3614 = vmatpush3.bf16.msra.mxu0 %v3940_v34  ;;  %v1273_v45 = vrot.slane %v1263_v24, 5 }
  0x93   :  { %v589_v37 = vmul.f32 %v588_v36, %v4174_v5  ;;  %v590_v38 = vmul.f32 %v588_v36, %v4179_v6  ;;  %v591_v41 = vmul.f32 %v588_v36, %v4184_v7  ;;  %v592_v42 = vmul.f32 %v588_v36, %v4195_v10  ;;  %v3941_v7 = vld [vmem:[%s5609_s9 + $0x18] sm:$0xff]  }
  0x94   :  { %v1260_v10 = vadd.f32 %v1256_v50, %v1252_v62  ;;  %3615 = vmatprep.subr.bf16.mxu0 %v3941_v7  ;;  %v3943_v50 = vld [vmem:[%s5609_s9 + $0x8] sm:$0xff]   ;;  %v4408_v62 = vsel %vm1269_vm6, %v1271_v28, 0.0 }
  0x95   :  { %v597_v43 = vadd.f32 %v596_v39, %v589_v37  ;;  %v598_v44 = vadd.f32 %v596_v39, %v590_v38  ;;  %v599_v46 = vadd.f32 %v596_v39, %v591_v41  ;;  %v600_v47 = vadd.f32 %v596_v39, %v592_v42 }
  0x96   :  { %390 = vmatmul.mubr.bf16.gmra.mxu1 %v241_v26  ;;  %3616 = vmatpush3.bf16.msra.mxu0 %v3941_v7  ;;  %v1264_v30 = vmax.f32 %v1260_v10, 0.0  ;;  %v1329_v24 = vrot.slane %v4408_v62, 3 }
  0x97   :  { %v601_v48 = vmax.f32 %v597_v43, 0.0  ;;  %v602_v49 = vmax.f32 %v598_v44, 0.0  ;;  %v603_v54 = vmax.f32 %v599_v46, 0.0  ;;  %v604_v55 = vmax.f32 %v600_v47, 0.0  ;;  %3617 = vmatprep.subr.bf16.mxu0 %v3942_v29 }
  0x98   :  { %v1274_v51 = vrot.slane %v1264_v30, 5 }
  0x99   :  { %v610_v56 = vrot.slane %v601_v48, 6  ;;  %v611_v57 = vrot.slane %v602_v49, 6  ;;  %v613_v60 = vrot.slane %v603_v54, 6  ;;  %v614_v3 = vrot.slane %v604_v55, 6 }
  0x9a   :  { %3618 = vmatpush3.bf16.msra.mxu0 %v3942_v29  ;;  %v4391_v48 = vsel %vm1269_vm6, %v1270_v27, %v1271_v28  ;;  %v4394_v49 = vsel %vm1269_vm6, 0.0, %v1270_v27 }
  0x9b   :  { %v4345_v5 = vsel %vm609_vm4, %v610_v56, %v611_v57  ;;  %v4349_v0 = vsel %vm609_vm4, 0.0, %v610_v56  ;;  %v4352_v9 = vsel %vm609_vm4, %v611_v57, 0.0  ;;  %v4358_v15 = vsel %vm609_vm4, %v613_v60, %v614_v3  ;;  %3619 = vmatprep.subr.bf16.mxu0 %v3943_v50 }
  0x9c   :  { %v667_v17 = vrot.slane %v4349_v0, 3  ;;  %v668_v18 = vrot.slane %v4345_v5, 3  ;;  %v670_v19 = vrot.slane %v4352_v9, 3  ;;  %v630_v20 = vrot.slane %v4349_v0, 1 }
  0x9d   :  { %v4366_v23 = vsel %vm609_vm4, 0.0, %v613_v60  ;;  %v4369_v26 = vsel %vm609_vm4, %v614_v3, 0.0  ;;  %v631_v33 = vrot.slane %v4345_v5, 1  ;;  %v633_v34 = vrot.slane %v4352_v9, 1 }
  0x9e   :  { %v4380_v37 = vsel %vm666_vm5, %v667_v17, %v668_v18  ;;  %v4383_v38 = vsel %vm666_vm5, %v668_v18, %v670_v19  ;;  %v672_v39 = vrot.slane %v4366_v23, 3  ;;  %v673_v41 = vrot.slane %v4358_v15, 3  ;;  %3620 = vmatpush3.bf16.msra.mxu0 %v3943_v50 }
  0x9f   :  { %v675_v44 = vrot.slane %v4369_v26, 3  ;;  %v3693_v18 = vpack.i.bf16 %v4383_v38, %v4380_v37  ;;  %v1326_v19 = vrot.slane %v4394_v49, 3 }
  0xa0   :  { %v674_v28 = vsel %vm666_vm5, %v672_v39, %v673_v41 }
  0xa1   :  { %v676_v29 = vsel %vm666_vm5, %v673_v41, %v675_v44 }
  0xa2   :  { %v3703_v44 = vpack.i.bf16 %v676_v29, %v674_v28 }
 0x14e   :  { %v383_v63 = vpop.f32.mrf.mxu1 }
 0x14f   :  { %v384_v6 = vadd.f32 %v383_v63, %v4340_v2  ;;  %v4411_v63 = vsel %vm1269_vm6, 0.0, %v1273_v45 }
 0x150   :  { %v385_v11 = vpop.f32.mrf.mxu1  ;;  %v1331_v27 = vrot.slane %v4411_v63, 3 }
 0x151   :  { %v398_v14 = vmax.f32 %v384_v6, 0.0 }
 0x152   :  { %v386_v16 = vpop.f32.mrf.mxu1 }
 0x153   :  { %v406_v21 = vrot.slane %v398_v14, 7  ;;  %v387_v22 = vadd.f32 %v386_v16, %v4340_v2  ;;  %v4421_v16 = vsel %vm1269_vm6, %v1273_v45, %v1274_v51 }
 0x154   :  { %v388_v25 = vpop.f32.mrf.mxu1  ;;  %v1332_v30 = vrot.slane %v4421_v16, 3 }
 0x155   :  { %v4375_v31 = vsel %vm176_vm0, 0.0, %v406_v21  ;;  %v399_v32 = vmax.f32 %v387_v22, 0.0  ;;  %v4434_v25 = vsel %vm1269_vm6, %v1274_v51, 0.0 }
 0x156   :  { %v391_v36 = vpop.f32.mrf.mxu1  ;;  %v426_v46 = vrot.slane %v4375_v31, 1  ;;  %v448_v52 = vrot.slane %v4375_v31, 2 }
 0x157   :  { %v407_v42 = vrot.slane %v399_v32, 7  ;;  %v392_v43 = vadd.f32 %v391_v36, %v4340_v2  ;;  %v3945_v32 = vld [vmem:[%s5611_s6 + $0x78] sm:$0xff]  }
 0x158   :  { %v393_v47 = vpop.f32.mrf.mxu1 }
 0x159   :  { %v4401_v53 = vsel %vm176_vm0, %v406_v21, %v407_v42  ;;  %v420_v54 = vsel %vm176_vm0, %v407_v42, 0.0  ;;  %v400_v55 = vmax.f32 %v392_v43, 0.0  ;;  %v1327_v21 = vrot.slane %v4391_v48, 3 }
 0x15a   :  { %v429_v56 = vrot.slane %v420_v54, 1  ;;  %v449_v57 = vrot.slane %v4401_v53, 2  ;;  %v451_v58 = vrot.slane %v420_v54, 2  ;;  %v394_v59 = vpop.f32.mrf.mxu1  ;;  %v427_v60 = vrot.slane %v4401_v53, 1 }
 0x15b   :  { %v409_v3 = vrot.slane %v400_v55, 7  ;;  %v395_v61 = vadd.f32 %v394_v59, %v4340_v2  ;;  %v3944_v2 = vld [vmem:[%s5609_s9] sm:$0xff]   ;;  %s4081_s9 = smov 32   ;;  %v1328_v45 = vsel %vm666_vm5, %v1326_v19, %v1327_v21  ;;  %v632_v55 = vsel %vm197_vm1, %v630_v20, %v631_v33 }
 0x15c   :  { %v396_v6 = vpop.f32.mrf.mxu1  ;;  %v450_v8 = vsel %vm220_vm2, %v448_v52, %v449_v57  ;;  %v452_v11 = vsel %vm220_vm2, %v449_v57, %v451_v58  ;;  %v428_v12 = vsel %vm197_vm1, %v426_v46, %v427_v60  ;;  %v430_v13 = vsel %vm197_vm1, %v427_v60, %v429_v56  ;;  %3621 = vmatprep.subr.bf16.mxu0 %v3944_v2 }
 0x15d   :  { %v401_v7 = vmax.f32 %v395_v61, 0.0  ;;  %v3678_v10 = vpack.i.bf16 %v452_v11, %v450_v8  ;;  %v3673_v14 = vpack.i.bf16 %v430_v13, %v428_v12  ;;  %v4424_v17 = vsel %vm176_vm0, 0.0, %v409_v3  ;;  %3622 = vmatpush3.bf16.msra.mxu0 %v3944_v2 }
 0x15e   :  { %v431_v36 = vrot.slane %v4424_v17, 1  ;;  %3443 = vmatprep.subr.bf16.mxu0 %v3945_v32  ;;  %v1330_v46 = vsel %vm666_vm5, %v1327_v21, %v1329_v24  ;;  %v453_v47 = vrot.slane %v4424_v17, 2  ;;  %v1334_v52 = vrot.slane %v4434_v25, 3 }
 0x15f   :  { %v410_v22 = vrot.slane %v401_v7, 7  ;;  %3679 = vrot.lane.b32.xlu0 %v3678_v10, %s4080_s21  ;;  %3674 = vrot.lane.b32.xlu1 %v3673_v14, %s4081_s9  ;;  %v635_v58 = vrot.slane %v4366_v23, 1  ;;  %v636_v59 = vrot.slane %v4358_v15, 1  ;;  %v634_v60 = vsel %vm197_vm1, %v631_v33, %v633_v34 }
 0x160   :  { %v638_v20 = vrot.slane %v4369_v26, 1  ;;  %v1362_v61 = vrot.slane %v4394_v49, 5  ;;  %v1333_v6 = vsel %vm666_vm5, %v1331_v27, %v1332_v30  ;;  %v1335_v8 = vsel %vm666_vm5, %v1332_v30, %v1334_v52 }
 0x161   :  { %v4445_v37 = vsel %vm176_vm0, %v409_v3, %v410_v22  ;;  %v421_v38 = vsel %vm176_vm0, %v410_v22, 0.0  ;;  %v3713_v3 = vpack.i.bf16 %v1330_v46, %v1328_v45  ;;  %v1363_v11 = vrot.slane %v4391_v48, 5 }
 0x162   :  { %v432_v42 = vrot.slane %v4445_v37, 1  ;;  %v434_v43 = vrot.slane %v421_v38, 1  ;;  %v454_v39 = vrot.slane %v4445_v37, 2  ;;  %v456_v41 = vrot.slane %v421_v38, 2 }
 0x163   :  { %3694 = vrot.lane.b32.xlu0 %v3693_v18, %s4080_s21  ;;  %v1365_v12 = vrot.slane %v4408_v62, 5  ;;  %v3698_v2 = vpack.i.bf16 %v634_v60, %v632_v55  ;;  %v637_v33 = vsel %vm197_vm1, %v635_v58, %v636_v59  ;;  %v639_v34 = vsel %vm197_vm1, %v636_v59, %v638_v20 }
 0x164   :  { %v433_v50 = vsel %vm197_vm1, %v431_v36, %v432_v42  ;;  %v435_v51 = vsel %vm197_vm1, %v432_v42, %v434_v43  ;;  %v455_v56 = vsel %vm220_vm2, %v453_v47, %v454_v39  ;;  %v457_v57 = vsel %vm220_vm2, %v454_v39, %v456_v41 }
 0x165   :  { %v3683_v54 = vpack.i.bf16 %v435_v51, %v433_v50  ;;  %v3688_v13 = vpack.i.bf16 %v457_v57, %v455_v56  ;;  %v1290_v7 = vrot.slane %v4394_v49, 1  ;;  %v3723_v10 = vpack.i.bf16 %v1335_v8, %v1333_v6 }
 0x166   :  { %v1291_v14 = vrot.slane %v4391_v48, 1  ;;  %v1293_v18 = vrot.slane %v4408_v62, 1  ;;  %v1364_v19 = vsel %vm1269_vm6, %v1362_v61, %v1363_v11  ;;  %v1366_v21 = vsel %vm1269_vm6, %v1363_v11, %v1365_v12 }
 0x167   :  { %3684 = vrot.lane.b32.xlu1 %v3683_v54, %s4081_s9  ;;  %3704 = vrot.lane.b32.xlu0 %v3703_v44, %s4080_s21  ;;  %v3708_v22 = vpack.i.bf16 %v639_v34, %v637_v33  ;;  %v1295_v24 = vrot.slane %v4411_v63, 1  ;;  %v1296_v27 = vrot.slane %v4421_v16, 1  ;;  %v3733_v28 = vpack.i.bf16 %v1366_v21, %v1364_v19 }
 0x168   :  { %v1292_v29 = vsel %vm197_vm1, %v1290_v7, %v1291_v14  ;;  %v1294_v30 = vsel %vm197_vm1, %v1291_v14, %v1293_v18  ;;  %v1298_v32 = vrot.slane %v4434_v25, 1  ;;  %v1367_v43 = vrot.slane %v4411_v63, 5 }
 0x169   :  { %v3718_v36 = vpack.i.bf16 %v1294_v30, %v1292_v29  ;;  %v1297_v38 = vsel %vm197_vm1, %v1295_v24, %v1296_v27  ;;  %v1368_v39 = vrot.slane %v4421_v16, 5  ;;  %v1370_v41 = vrot.slane %v4434_v25, 5  ;;  %v3947_v30 = vld [vmem:[%s5611_s6 + $0x70] sm:$0xff]  }
 0x16a   :  { %v1299_v42 = vsel %vm197_vm1, %v1296_v27, %v1298_v32  ;;  %v652_v61 = vrot.slane %v4349_v0, 2  ;;  %v653_v6 = vrot.slane %v4345_v5, 2  ;;  %v655_v8 = vrot.slane %v4352_v9, 2  ;;  %v3946_v27 = vld [vmem:[%s5611_s6 + $0x38] sm:$0xff]   ;;  %v3950_v32 = vld [vmem:[%s5611_s6 + $0x28] sm:$0xff]  }
 0x16b   :  { %3689 = vrot.lane.b32.xlu1 %v3688_v13, %s4080_s21  ;;  %3714 = vrot.lane.b32.xlu0 %v3713_v3, %s4080_s21  ;;  %v3728_v44 = vpack.i.bf16 %v1299_v42, %v1297_v38  ;;  %v1369_v45 = vsel %vm1269_vm6, %v1367_v43, %v1368_v39  ;;  %v1371_v46 = vsel %vm1269_vm6, %v1368_v39, %v1370_v41  ;;  %v3952_v38 = vld [vmem:[%s5611_s6 + $0x20] sm:$0xff]   ;;  %v3953_v42 = vld [vmem:[%s5611_s6 + $0x58] sm:$0xff]  }
 0x16c   :  { %v3738_v47 = vpack.i.bf16 %v1371_v46, %v1369_v45  ;;  %v656_v13 = vsel %vm220_vm2, %v653_v6, %v655_v8  ;;  %v3954_v43 = vld [vmem:[%s5611_s6 + $0x18] sm:$0xff]   ;;  %v3955_v39 = vld [vmem:[%s5611_s6 + $0x50] sm:$0xff]  }
 0x16d   :  { %v3956_v41 = vld [vmem:[%s5611_s6 + $0x10] sm:$0xff]  }
 0x16f   :  { %3699 = vrot.lane.b32.xlu1 %v3698_v2, %s4080_s21  ;;  %3724 = vrot.lane.b32.xlu0 %v3723_v10, %s4080_s21 }
 0x173   :  { %3709 = vrot.lane.b32.xlu1 %v3708_v22, %s4080_s21  ;;  %3734 = vrot.lane.b32.xlu0 %v3733_v28, %s4080_s21 }
 0x177   :  { %3719 = vrot.lane.b32.xlu1 %v3718_v36, %s4080_s21  ;;  %v3951_v36 = vld [vmem:[%s5611_s6 + $0x60] sm:$0xff]  }
 0x17b   :  { %3729 = vrot.lane.b32.xlu1 %v3728_v44, %s4080_s21  ;;  %v3957_v44 = vld [vmem:[%s5611_s6 + $0x48] sm:$0xff]  }
 0x17f   :  { %3739 = vrot.lane.b32.xlu1 %v3738_v47, %s4080_s21  ;;  %v657_v47 = vrot.slane %v4366_v23, 2 }
 0x1d1   :  { %v3680_v50 = vpop.permute.xlu0 %3679  ;;  %v3675_v51 = vpop.permute.xlu1 %3674 }
 0x1d2   :  { %v3682_v52 = vunpack.i.h.bf16 %v3680_v50  ;;  %v3681_v54 = vunpack.i.l.bf16 %v3680_v50  ;;  %v3677_v55 = vunpack.i.h.bf16 %v3675_v51  ;;  %v3676_v56 = vunpack.i.l.bf16 %v3675_v51 }
 0x1d3   :  { %v658_v50 = vrot.slane %v4358_v15, 2  ;;  %v660_v51 = vrot.slane %v4369_v26, 2 }
 0x1d4   :  { %v472_v57 = vsel %vm470_vm7, %v4401_v53, %v3677_v55  ;;  %v471_v58 = vsel %vm470_vm7, %v4375_v31, %v3676_v56  ;;  %v654_v31 = vsel %vm220_vm2, %v652_v61, %v653_v6  ;;  %v3959_v56 = vld [vmem:[%s5611_s6 + $0x40] sm:$0xff]   ;;  %v3961_v6 = vld [vmem:[%s5611_s6 + $0x98] sm:$0xff]  }
 0x1d5   :  { %v475_v59 = vsel %vm93_vm3, %v471_v58, %v3681_v54  ;;  %v476_v60 = vsel %vm93_vm3, %v472_v57, %v3682_v52  ;;  %v3695_v3 = vpop.permute.xlu0 %3694  ;;  %v3958_v52 = vld [vmem:[%s5611_s6 + $0x8] sm:$0xff]   ;;  %v3960_v61 = vld [vmem:[%s5611_s6] sm:$0xff]  }
 0x1d6   :  { %v479_v20 = vpack.c.bf16 %v476_v60, %v475_v59  ;;  %v3697_v53 = vunpack.i.h.bf16 %v3695_v3  ;;  %v3696_v12 = vunpack.i.l.bf16 %v3695_v3  ;;  %v659_v59 = vsel %vm220_vm2, %v657_v47, %v658_v50  ;;  %v3968_v47 = vld [vmem:[%s5612_s7 + $0x30] sm:$0xff]  }
 0x1d7   :  { %v661_v60 = vsel %vm220_vm2, %v658_v50, %v660_v51  ;;  %v3969_v50 = vld [vmem:[%s5612_s7 + $0x68] sm:$0xff]  }
 0x1d8   :  { %3623 = vmatprep.mubr.msk.bf16.mxu0 %vm529_vm8, %v479_v20  ;;  %v708_v7 = vsel %vm93_vm3, %v654_v31, %v3696_v12  ;;  %v709_v10 = vsel %vm93_vm3, %v656_v13, %v3697_v53  ;;  %v3970_v51 = vld [vmem:[%s5612_s7 + $0x28] sm:$0xff]  }
 0x1d9   :  { %v3685_v11 = vpop.permute.xlu1 %3684  ;;  %v713_v28 = vpack.c.bf16 %v709_v10, %v708_v7  ;;  %v3705_v46 = vpop.permute.xlu0 %3704  ;;  %v691_v7 = vrot.slane %v4345_v5, 4  ;;  %v693_v10 = vrot.slane %v4352_v9, 4 }
 0x1da   :  { %v3687_v2 = vunpack.i.h.bf16 %v3685_v11  ;;  %v3686_v33 = vunpack.i.l.bf16 %v3685_v11  ;;  %v3707_v57 = vunpack.i.h.bf16 %v3705_v46  ;;  %v3706_v58 = vunpack.i.l.bf16 %v3705_v46  ;;  %v3967_v46 = vld [vmem:[%s5612_s7 + $0x70] sm:$0xff]  }
 0x1dc   :  { %v474_v19 = vsel %vm470_vm7, %v4445_v37, %v3687_v2  ;;  %v473_v21 = vsel %vm470_vm7, %v4424_v17, %v3686_v33  ;;  %v3948_v17 = vld [vmem:[%s5611_s6 + $0x30] sm:$0xff]   ;;  %v3949_v37 = vld [vmem:[%s5611_s6 + $0x68] sm:$0xff]   ;;  %v710_v11 = vsel %vm93_vm3, %v659_v59, %v3706_v58  ;;  %v711_v53 = vsel %vm93_vm3, %v661_v60, %v3707_v57 }
 0x1dd   :  { %v3690_v34 = vpop.permute.xlu1 %3689  ;;  %v716_v2 = vpack.c.bf16 %v711_v53, %v710_v11  ;;  %v3962_v33 = vld [vmem:[%s5611_s6 + $0x90] sm:$0xff]   ;;  %v3715_v9 = vpop.permute.xlu0 %3714  ;;  %v3977_v59 = vld [vmem:[%s5612_s7 + $0x48] sm:$0xff]  }
 0x1de   :  { %v3692_v14 = vunpack.i.h.bf16 %v3690_v34  ;;  %v3691_v18 = vunpack.i.l.bf16 %v3690_v34  ;;  %v690_v34 = vrot.slane %v4349_v0, 4  ;;  %v3975_v57 = vld [vmem:[%s5612_s7 + $0x50] sm:$0xff]  }
 0x1df   :  { %v3976_v58 = vld [vmem:[%s5612_s7 + $0x10] sm:$0xff]  }
 0x1e0   :  { %v477_v22 = vsel %vm93_vm3, %v473_v21, %v3691_v18  ;;  %v478_v24 = vsel %vm93_vm3, %v474_v19, %v3692_v14  ;;  %v3963_v19 = vld [vmem:[%s5611_s6 + $0x88] sm:$0xff]   ;;  %v1312_v21 = vrot.slane %v4394_v49, 2 }
 0x1e1   :  { %v480_v29 = vpack.c.bf16 %v478_v24, %v477_v22  ;;  %v3700_v45 = vpop.permute.xlu1 %3699  ;;  %v1313_v22 = vrot.slane %v4391_v48, 2  ;;  %v1315_v24 = vrot.slane %v4408_v62, 2 }
 0x1e2   :  { %v3702_v54 = vunpack.i.h.bf16 %v3700_v45  ;;  %v3701_v55 = vunpack.i.l.bf16 %v3700_v45 }
 0x1e3   :  { %3624 = vmatmul.mubr.msk.bf16.vlgmr.msra.gmra.mxu0 %vm529_vm8, %v480_v29  ;;  %v696_v29 = vrot.slane %v4358_v15, 4 }
 0x1e4   :  { %3444 = vmatpush3.bf16.msra.mxu0 %v3946_v27  ;;  %920 = vmatprep.mubr.bf16.mxu0 %v713_v28  ;;  %v705_v20 = vsel %vm93_vm3, %v4345_v5, %v3702_v54  ;;  %v704_v3 = vsel %vm93_vm3, %v4349_v0, %v3701_v55  ;;  %v692_v0 = vsel %vm689_vm9, %v690_v34, %v691_v7  ;;  %v695_v28 = vrot.slane %v4366_v23, 4  ;;  %v3972_v54 = vld [vmem:[%s5612_s7 + $0x20] sm:$0xff]   ;;  %v3973_v55 = vld [vmem:[%s5612_s7 + $0x58] sm:$0xff]  }
 0x1e5   :  { %3445 = vmatprep.subr.bf16.mxu0 %v3947_v30  ;;  %v3710_v8 = vpop.permute.xlu1 %3709  ;;  %v712_v12 = vpack.c.bf16 %v705_v20, %v704_v3  ;;  %v694_v5 = vsel %vm689_vm9, %v691_v7, %v693_v10  ;;  %v698_v30 = vrot.slane %v4369_v26, 4  ;;  %v3965_v26 = vld [vmem:[%s5612_s7 + $0x78] sm:$0xff]   ;;  %v3725_v20 = vpop.permute.xlu0 %3724  ;;  %v1317_v3 = vrot.slane %v4411_v63, 2  ;;  %v3980_v10 = vld [vmem:[%s5612_s7] sm:$0xff]  }
 0x1e6   :  { %v3712_v31 = vunpack.i.h.bf16 %v3710_v8  ;;  %v3711_v13 = vunpack.i.l.bf16 %v3710_v8  ;;  %v3978_v8 = vld [vmem:[%s5612_s7 + $0x8] sm:$0xff]  }
 0x1e8   :  { %3446 = vmatpush3.bf16.msra.mxu0 %v3948_v17  ;;  %v706_v14 = vsel %vm93_vm3, %v4366_v23, %v3711_v13  ;;  %v707_v18 = vsel %vm93_vm3, %v4358_v15, %v3712_v31  ;;  %v714_v17 = vpack.c.bf16 %v694_v5, %v692_v0  ;;  %v697_v15 = vsel %vm689_vm9, %v695_v28, %v696_v29  ;;  %v3981_v5 = vld [vmem:[%s5612_s7 + $0xb8] sm:$0xff]  }
 0x1e9   :  { %3447 = vmatprep.subr.bf16.mxu0 %v3949_v37  ;;  %v715_v27 = vpack.c.bf16 %v707_v18, %v706_v14  ;;  %v3964_v37 = vld [vmem:[%s5611_s6 + $0x80] sm:$0xff]   ;;  %v699_v23 = vsel %vm689_vm9, %v696_v29, %v698_v30  ;;  %v3720_v60 = vpop.permute.xlu1 %3719  ;;  %v3727_v31 = vunpack.i.h.bf16 %v3725_v20  ;;  %v3726_v13 = vunpack.i.l.bf16 %v3725_v20  ;;  %v3982_v29 = vld [vmem:[%s5612_s7 + $0xb0] sm:$0xff]  }
 0x1ea   :  { %v3722_v11 = vunpack.i.h.bf16 %v3720_v60  ;;  %v3721_v53 = vunpack.i.l.bf16 %v3720_v60  ;;  %v1387_v28 = vrot.slane %v4408_v62, 6  ;;  %v1353_v60 = vrot.slane %v4411_v63, 4 }
 0x1ec   :  { %3448 = vmatpush3.bf16.msra.mxu0 %v3950_v32  ;;  %v3717_v32 = vunpack.i.h.bf16 %v3715_v9  ;;  %v1399_v34 = vsel %vm93_vm3, %v4391_v48, %v3722_v11  ;;  %v1398_v7 = vsel %vm93_vm3, %v4394_v49, %v3721_v53 }
 0x1ed   :  { %3449 = vmatprep.subr.bf16.mxu0 %v3951_v36  ;;  %v3716_v36 = vunpack.i.l.bf16 %v3715_v9  ;;  %v3730_v14 = vpop.permute.xlu1 %3729  ;;  %v1410_v0 = vpack.c.bf16 %v1399_v34, %v1398_v7 }
 0x1ee   :  { %v3732_v9 = vunpack.i.h.bf16 %v3730_v14 }
 0x1f0   :  { %3450 = vmatpush3.bf16.msra.mxu0 %v3952_v38  ;;  %v1314_v38 = vsel %vm220_vm2, %v1312_v21, %v1313_v22  ;;  %v3731_v21 = vunpack.i.l.bf16 %v3730_v14 }
 0x1f1   :  { %3451 = vmatprep.subr.bf16.mxu0 %v3953_v42  ;;  %v1316_v42 = vsel %vm220_vm2, %v1313_v22, %v1315_v24  ;;  %v1384_v24 = vrot.slane %v4394_v49, 6  ;;  %v3740_v20 = vpop.permute.xlu1 %3739 }
 0x1f2   :  { %v1400_v30 = vsel %vm93_vm3, %v4411_v63, %v3731_v21  ;;  %v3742_v53 = vunpack.i.h.bf16 %v3740_v20  ;;  %v3995_v21 = vld [vmem:[%s5613_s10 + $0x28] sm:$0xff]  }
 0x1f4   :  { %3452 = vmatpush3.bf16.msra.mxu0 %v3954_v43  ;;  %v1402_v43 = vsel %vm93_vm3, %v1314_v38, %v3716_v36  ;;  %v3983_v38 = vld [vmem:[%s5612_s7 + $0xa8] sm:$0xff]  }
 0x1f5   :  { %3453 = vmatprep.subr.bf16.mxu0 %v3955_v39  ;;  %v1403_v39 = vsel %vm93_vm3, %v1316_v42, %v3717_v32 }
 0x1f6   :  { %v1411_v45 = vpack.c.bf16 %v1403_v39, %v1402_v43  ;;  %v3987_v43 = vld [vmem:[%s5612_s7 + $0x88] sm:$0xff]   ;;  %v3988_v39 = vld [vmem:[%s5612_s7 + $0x80] sm:$0xff]  }
 0x1f8   :  { %3454 = vmatpush3.bf16.msra.mxu0 %v3956_v41  ;;  %v717_v41 = vpack.c.bf16 %v699_v23, %v697_v15  ;;  %v3984_v15 = vld [vmem:[%s5612_s7 + $0xa0] sm:$0xff]   ;;  %v3985_v23 = vld [vmem:[%s5612_s7 + $0x98] sm:$0xff]  }
 0x1f9   :  { %3455 = vmatprep.subr.bf16.mxu0 %v3957_v44  ;;  %v3966_v44 = vld [vmem:[%s5612_s7 + $0x38] sm:$0xff]  }
 0x1fc   :  { %3456 = vmatpush3.bf16.msra.mxu0 %v3958_v52  ;;  %v3971_v52 = vld [vmem:[%s5612_s7 + $0x60] sm:$0xff]  }
 0x1fd   :  { %3457 = vmatprep.subr.bf16.mxu0 %v3959_v56  ;;  %v3974_v56 = vld [vmem:[%s5612_s7 + $0x18] sm:$0xff]  }
 0x200   :  { %3458 = vmatpush3.bf16.msra.mxu0 %v3960_v61  ;;  %v1318_v61 = vrot.slane %v4421_v16, 2 }
 0x201   :  { %3627 = vmatprep.subr.bf16.mxu0 %v3961_v6 }
 0x203   :  { %921 = vmatmul.mubr.bf16.vlgmr.msra.gmra.mxu0 %v712_v12  ;;  %v3979_v12 = vld [vmem:[%s5612_s7 + $0x40] sm:$0xff]  }
 0x204   :  { %3628 = vmatpush3.bf16.msra.mxu0 %v3961_v6  ;;  %928 = vmatprep.mubr.bf16.mxu0 %v716_v2  ;;  %v1320_v6 = vrot.slane %v4434_v25, 2  ;;  %v1319_v2 = vsel %vm220_vm2, %v1317_v3, %v1318_v61 }
 0x205   :  { %3629 = vmatprep.subr.bf16.mxu0 %v3962_v33  ;;  %v1404_v18 = vsel %vm93_vm3, %v1319_v2, %v3726_v13 }
 0x208   :  { %3630 = vmatpush3.bf16.msra.mxu0 %v3962_v33  ;;  %v1321_v33 = vsel %vm220_vm2, %v1318_v61, %v1320_v6  ;;  %v1354_v6 = vrot.slane %v4421_v16, 4 }
 0x209   :  { %3631 = vmatprep.subr.bf16.mxu0 %v3963_v19 }
 0x20a   :  { %v1355_v13 = vsel %vm689_vm9, %v1353_v60, %v1354_v6 }
 0x20b   :  { %929 = vmatmul.mubr.bf16.gmra.mxu0 %v715_v27  ;;  %v1385_v27 = vrot.slane %v4391_v48, 6 }
 0x20c   :  { %3632 = vmatpush3.bf16.msra.mxu0 %v3963_v19  ;;  %3635 = vmatprep.mubr.msk.bf16.mxu0 %vm93_vm3, %v714_v17  ;;  %v1405_v19 = vsel %vm93_vm3, %v1321_v33, %v3727_v31  ;;  %v1401_v17 = vsel %vm93_vm3, %v4421_v16, %v3732_v9 }
 0x20d   :  { %3633 = vmatprep.subr.bf16.mxu0 %v3964_v37  ;;  %v1415_v22 = vpack.c.bf16 %v1405_v19, %v1404_v18  ;;  %v1388_v32 = vsel %vm609_vm4, %v1385_v27, %v1387_v28  ;;  %v1414_v36 = vpack.c.bf16 %v1401_v17, %v1400_v30  ;;  %v3993_v19 = vld [vmem:[%s5613_s10 + $0x38] sm:$0xff]  }
 0x20e   :  { %1197 = vmatpush1.bf16.msra.mxu1 %v3993_v19  ;;  %v3997_v30 = vld [vmem:[%s5613_s10 + $0x18] sm:$0xff]  }
 0x20f   :  { %1198 = vmatprep.subr.bf16.mxu1 %v4079_v1 }
 0x210   :  { %3634 = vmatpush3.bf16.msra.mxu0 %v3964_v37  ;;  %v1386_v37 = vsel %vm609_vm4, %v1384_v24, %v1385_v27  ;;  %v3996_v27 = vld [vmem:[%s5613_s10 + $0x20] sm:$0xff]  }
 0x211   :  { %3477 = vmatprep.subr.bf16.mxu0 %v3965_v26  ;;  %v1413_v42 = vpack.c.bf16 %v1388_v32, %v1386_v37  ;;  %v3986_v26 = vld [vmem:[%s5612_s7 + $0x90] sm:$0xff]  }
 0x212   :  { %v3998_v37 = vld [vmem:[%s5613_s10 + $0x10] sm:$0xff]  }
 0x213   :  { %3636 = vmatmul.mubr.msk.bf16.vlgmr.msra.gmra.mxu0 %vm93_vm3, %v717_v41  ;;  %v3989_v41 = vld [vmem:[%s5612_s7 + $0xd8] sm:$0xff]  }
 0x214   :  { %3478 = vmatpush3.bf16.msra.mxu0 %v3966_v44  ;;  %1684 = vmatprep.mubr.bf16.mxu0 %v1411_v45  ;;  %v3990_v44 = vld [vmem:[%s5612_s7 + $0xd0] sm:$0xff]   ;;  %v1348_v45 = vrot.slane %v4394_v49, 4 }
 0x215   :  { %3479 = vmatprep.subr.bf16.mxu0 %v3967_v46  ;;  %v1349_v46 = vrot.slane %v4391_v48, 4  ;;  %v1389_v48 = vrot.slane %v4411_v63, 6 }
 0x218   :  { %3480 = vmatpush3.bf16.msra.mxu0 %v3968_v47  ;;  %v1351_v47 = vrot.slane %v4408_v62, 4  ;;  %v1392_v62 = vrot.slane %v4434_v25, 6 }
 0x219   :  { %3481 = vmatprep.subr.bf16.mxu0 %v3969_v50  ;;  %v3735_v50 = vpop.permute.xlu0 %3734 }
 0x21a   :  { %v1352_v49 = vsel %vm689_vm9, %v1349_v46, %v1351_v47 }
 0x21c   :  { %3482 = vmatpush3.bf16.msra.mxu0 %v3970_v51  ;;  %v3991_v51 = vld [vmem:[%s5612_s7 + $0xc8] sm:$0xff]  }
 0x21d   :  { %3483 = vmatprep.subr.bf16.mxu0 %v3971_v52  ;;  %v1350_v52 = vsel %vm689_vm9, %v1348_v45, %v1349_v46 }
 0x220   :  { %3484 = vmatpush3.bf16.msra.mxu0 %v3972_v54  ;;  %v3737_v54 = vunpack.i.h.bf16 %v3735_v50 }
 0x221   :  { %3485 = vmatprep.subr.bf16.mxu0 %v3973_v55  ;;  %v3736_v55 = vunpack.i.l.bf16 %v3735_v50  ;;  %v4000_v50 = vld [vmem:[%s5613_s10] sm:$0xff]  }
 0x224   :  { %3486 = vmatpush3.bf16.msra.mxu0 %v3974_v56  ;;  %v1390_v56 = vrot.slane %v4421_v16, 6  ;;  %v4756_v16 = vpop.f32.mrf.mxu0 }
 0x225   :  { %3487 = vmatprep.subr.bf16.mxu0 %v3975_v57  ;;  %v1407_v57 = vsel %vm93_vm3, %v1352_v49, %v3737_v54 }
 0x226   :  { %v1391_v3 = vsel %vm609_vm4, %v1389_v48, %v1390_v56  ;;  %v1393_v61 = vsel %vm609_vm4, %v1390_v56, %v1392_v62 }
 0x227   :  { %v1417_v31 = vpack.c.bf16 %v1393_v61, %v1391_v3 }
 0x228   :  { %3488 = vmatpush3.bf16.msra.mxu0 %v3976_v58  ;;  %v1406_v58 = vsel %vm93_vm3, %v1350_v52, %v3736_v55 }
 0x229   :  { %3489 = vmatprep.subr.bf16.mxu0 %v3977_v59  ;;  %v3992_v59 = vld [vmem:[%s5612_s7 + $0xc0] sm:$0xff]   ;;  %v1412_v11 = vpack.c.bf16 %v1407_v57, %v1406_v58 }
 0x22c   :  { %3490 = vmatpush3.bf16.msra.mxu0 %v3978_v8  ;;  %v1356_v8 = vrot.slane %v4434_v25, 4  ;;  %v4758_v25 = vpop.f32.mrf.mxu0 }
 0x22d   :  { %3491 = vmatprep.subr.bf16.mxu0 %v3979_v12  ;;  %v3741_v12 = vunpack.i.l.bf16 %v3740_v20 }
 0x22e   :  { %v1357_v63 = vsel %vm689_vm9, %v1354_v6, %v1356_v8  ;;  %v4760_v7 = vpop.f32.mrf.mxu0  ;;  %v4001_v8 = vld [vmem:[%s5613_s10 + $0x48] sm:$0xff]  }
 0x22f   :  { %v1408_v2 = vsel %vm93_vm3, %v1355_v13, %v3741_v12  ;;  %v1409_v33 = vsel %vm93_vm3, %v1357_v63, %v3742_v53 }
 0x230   :  { %3492 = vmatpush3.bf16.msra.mxu0 %v3980_v10  ;;  %v1416_v34 = vpack.c.bf16 %v1409_v33, %v1408_v2  ;;  %v4762_v10 = vpop.f32.mrf.mxu0 }
 0x231   :  { %1701 = vmatprep.subr.bf16.mxu0 %v4079_v1 }
 0x233   :  { %1685 = vmatmul.mubr.bf16.vlgmr.msra.gmra.mxu0 %v1410_v0 }
 0x234   :  { %1702 = vmatpush1.bf16.msra.mxu0 %v3981_v5  ;;  %1692 = vmatprep.mubr.bf16.mxu0 %v1415_v22  ;;  %v3994_v5 = vld [vmem:[%s5613_s10 + $0x30] sm:$0xff]  }
 0x235   :  { %1703 = vmatprep.subr.bf16.mxu0 %v4079_v1  ;;  %1199 = vmatpush1.bf16.msra.mxu1 %v3994_v5 }
 0x236   :  { %1200 = vmatprep.subr.bf16.mxu1 %v4079_v1 }
 0x238   :  { %1704 = vmatpush1.bf16.msra.mxu0 %v3982_v29 }
 0x239   :  { %1705 = vmatprep.subr.bf16.mxu0 %v4079_v1  ;;  %1201 = vmatpush1.bf16.msra.mxu1 %v3995_v21 }
 0x23a   :  { %1202 = vmatprep.subr.bf16.mxu1 %v4079_v1 }
 0x23b   :  { %1693 = vmatmul.mubr.bf16.gmra.mxu0 %v1414_v36 }
 0x23c   :  { %1706 = vmatpush1.bf16.msra.mxu0 %v3983_v38  ;;  %3353 = vmatprep.mubr.msk.bf16.mxu0 %vm93_vm3, %v1413_v42 }
 0x23d   :  { %1707 = vmatprep.subr.bf16.mxu0 %v4079_v1  ;;  %1203 = vmatpush1.bf16.msra.mxu1 %v3996_v27 }
 0x23e   :  { %1204 = vmatprep.subr.bf16.mxu1 %v4079_v1 }
 0x240   :  { %1708 = vmatpush1.bf16.msra.mxu0 %v3984_v15  ;;  %v4798_v15 = vld [vmem:[%s5610_s3] sm:$0xf] }
 0x241   :  { %1709 = vmatprep.subr.bf16.mxu0 %v4079_v1  ;;  %1205 = vmatpush1.bf16.msra.mxu1 %v3997_v30  ;;  %v4002_v30 = vld [vmem:[%s5613_s10 + $0x40] sm:$0xff]  }
 0x242   :  { %1206 = vmatprep.subr.bf16.mxu1 %v4079_v1 }
 0x244   :  { %1710 = vmatpush1.bf16.msra.mxu0 %v3985_v23  ;;  %v761_v23 = vrot.slane %v4798_v15, %v4317_v35 }
 0x245   :  { %1711 = vmatprep.subr.bf16.mxu0 %v4079_v1  ;;  %1207 = vmatpush1.bf16.msra.mxu1 %v3998_v37 }
 0x246   :  { %1208 = vmatprep.subr.bf16.mxu1 %v4079_v1 }
 0x248   :  { %1712 = vmatpush1.bf16.msra.mxu0 %v3986_v26  ;;  %v3999_v26 = vld [vmem:[%s5613_s10 + $0x8] sm:$0xff]   ;;  %s4082_s10 = smov 96  }
 0x249   :  { %1713 = vmatprep.subr.bf16.mxu0 %v4079_v1  ;;  %1209 = vmatpush1.bf16.msra.mxu1 %v3999_v26 }
 0x24a   :  { %1210 = vmatprep.subr.bf16.mxu1 %v4079_v1 }
 0x24c   :  { %1714 = vmatpush1.bf16.msra.mxu0 %v3987_v43 }
 0x24d   :  { %1715 = vmatprep.subr.bf16.mxu0 %v4079_v1  ;;  %1211 = vmatpush1.bf16.msra.mxu1 %v4000_v50 }
 0x24e   :  { %1224 = vmatprep.subr.bf16.mxu1 %v4079_v1 }
 0x250   :  { %1716 = vmatpush1.bf16.msra.mxu0 %v3988_v39 }
 0x251   :  { %1725 = vmatprep.subr.bf16.mxu0 %v4079_v1  ;;  %1225 = vmatpush2.bf16.msra.mxu1 %v4001_v8  ;;  %v4072_v8 = vld [vmem:[%s5605_s1] sm:$0xf] }
 0x252   :  { %1226 = vmatprep.subr.bf16.mxu1 %v4079_v1 }
 0x254   :  { %1726 = vmatpush2.bf16.msra.mxu0 %v3989_v41 }
 0x255   :  { %1727 = vmatprep.subr.bf16.mxu0 %v4079_v1  ;;  %1227 = vmatpush2.bf16.msra.mxu1 %v4002_v30 }
 0x256   :  { %2044 = vmatprep.subr.bf16.mxu1 %v4079_v1 }
 0x258   :  { %1728 = vmatpush2.bf16.msra.mxu0 %v3990_v44 }
 0x259   :  { %1729 = vmatprep.subr.bf16.mxu0 %v4079_v1 }
 0x25c   :  { %1730 = vmatpush2.bf16.msra.mxu0 %v3991_v51 }
 0x25d   :  { %1731 = vmatprep.subr.bf16.mxu0 %v4079_v1 }
 0x260   :  { %1732 = vmatpush2.bf16.msra.mxu0 %v3992_v59 }
 0x263   :  { %1734 = vmatmul.mubr.bf16.vlgmr.msra.gmra.mxu0 %v1412_v11 }
 0x264   :  { %3354 = vmatprep.mubr.msk.bf16.mxu0 %vm93_vm3, %v1417_v31 }
 0x26b   :  { %1742 = vmatmul.mubr.bf16.gmra.mxu0 %v1416_v34 }
 0x2a3   :  { %v4764_v14 = vpop.f32.mrf.mxu0 }
 0x2a5   :  { %v4766_v18 = vpop.f32.mrf.mxu0 }
 0x2a7   :  { %v4771_v0 = vpop.f32.mrf.mxu0 }
 0x2a9   :  { %v4777_v9 = vpop.f32.mrf.mxu0 }
 0x2c3   :  { %v3459_v22 = vpop.f32.mrf.mxu0 }
 0x2c5   :  { %v3460_v24 = vpop.f32.mrf.mxu0 }
 0x2c6   :  { %v3461_v42 = vadd.f32 %v3460_v24, %v3459_v22 }
 0x2c7   :  { %v3462_v28 = vpop.f32.mrf.mxu0 }
 0x2c8   :  { %v923_v47 = vadd.f32 %v3461_v42, %v761_v23 }
 0x2c9   :  { %v3463_v29 = vpop.f32.mrf.mxu0 }
 0x2ca   :  { %v3464_v45 = vadd.f32 %v3463_v29, %v3462_v28 }
 0x2cb   :  { %v3465_v17 = vpop.f32.mrf.mxu0 }
 0x2cc   :  { %v926_v62 = vadd.f32 %v3464_v45, %v761_v23 }
 0x2cd   :  { %v3466_v32 = vpop.f32.mrf.mxu0 }
 0x2ce   :  { %v3467_v36 = vadd.f32 %v3466_v32, %v3465_v17 }
 0x2cf   :  { %v3468_v38 = vpop.f32.mrf.mxu0 }
 0x2d0   :  { %v931_v41 = vadd.f32 %v3467_v36, %v761_v23 }
 0x2d1   :  { %v3469_v43 = vpop.f32.mrf.mxu0 }
 0x2d2   :  { %v3470_v39 = vadd.f32 %v3469_v43, %v3468_v38 }
 0x2d3   :  { %v3637_v44 = vpop.f32.mrf.mxu0 }
 0x2d4   :  { %v980_v46 = vadd.f32 %v3637_v44, %v931_v41  ;;  %v934_v54 = vadd.f32 %v3470_v39, %v761_v23 }
 0x2d5   :  { %v971_v35 = vpop.f32.mrf.mxu0 }
 0x2d6   :  { %v988_v51 = vmax.f32 %v980_v46, 0.0  ;;  %v972_v52 = vadd.f32 %v971_v35, %v923_v47 }
 0x2d7   :  { %v3638_v55 = vpop.f32.mrf.mxu0 }
 0x2d8   :  { %v997_v49 = vrot.slane %v988_v51, 6  ;;  %v986_v48 = vmax.f32 %v972_v52, 0.0  ;;  %v983_v56 = vadd.f32 %v3638_v55, %v934_v54 }
 0x2d9   :  { %v974_v57 = vpop.f32.mrf.mxu0 }
 0x2da   :  { %v994_v58 = vrot.slane %v986_v48, 6  ;;  %v989_v59 = vmax.f32 %v983_v56, 0.0  ;;  %v975_v60 = vadd.f32 %v974_v57, %v926_v62  ;;  %v4812_v20 = vsel %vm609_vm4, 0.0, %v997_v49 }
 0x2db   :  { %v1019_v13 = vrot.slane %v4812_v20, 1  ;;  %v1063_v55 = vrot.slane %v4812_v20, 3  ;;  %v1041_v48 = vrot.slane %v4812_v20, 2 }
 0x2dc   :  { %v4815_v3 = vsel %vm609_vm4, 0.0, %v994_v58  ;;  %v998_v61 = vrot.slane %v989_v59, 6  ;;  %v987_v6 = vmax.f32 %v975_v60, 0.0 }
 0x2dd   :  { %v1080_v12 = vrot.slane %v4815_v3, 4  ;;  %v1036_v33 = vrot.slane %v4815_v3, 2  ;;  %v1014_v34 = vrot.slane %v4815_v3, 1  ;;  %v1058_v32 = vrot.slane %v4815_v3, 3 }
 0x2de   :  { %v4821_v11 = vsel %vm609_vm4, %v998_v61, 0.0  ;;  %v995_v53 = vrot.slane %v987_v6, 6  ;;  %v4825_v31 = vsel %vm609_vm4, %v997_v49, %v998_v61  ;;  %v4874_v6 = vsub.s32 3, %v4169_v4  ;;  %v4075_v4 = vld [vmem:[%s5606_s2] sm:$0xf] }
 0x2df   :  { %v1022_v19 = vrot.slane %v4821_v11, 1  ;;  %v1020_v29 = vrot.slane %v4825_v31, 1  ;;  %v1066_v43 = vrot.slane %v4821_v11, 3  ;;  %v1064_v50 = vrot.slane %v4825_v31, 3 }
 0x2e0   :  { %v4829_v63 = vsel %vm609_vm4, %v994_v58, %v995_v53  ;;  %v1008_v2 = vsel %vm609_vm4, %v995_v53, 0.0  ;;  %v1044_v35 = vrot.slane %v4821_v11, 2  ;;  %v1042_v54 = vrot.slane %v4825_v31, 2 }
 0x2e1   :  { %v1017_v5 = vrot.slane %v1008_v2, 1  ;;  %v1039_v21 = vrot.slane %v1008_v2, 2  ;;  %v1081_v22 = vrot.slane %v4829_v63, 4  ;;  %v1083_v24 = vrot.slane %v1008_v2, 4 }
 0x2e2   :  { %v1037_v27 = vrot.slane %v4829_v63, 2  ;;  %v1015_v28 = vrot.slane %v4829_v63, 1  ;;  %v1061_v17 = vrot.slane %v1008_v2, 3  ;;  %v1059_v36 = vrot.slane %v4829_v63, 3  ;;  %v4074_v2 = vld [vmem:[%s5604_s0 + $0x8] sm:$0xff] }
 0x2e3   :  { %v1082_v37 = vsel %vm689_vm9, %v1080_v12, %v1081_v22  ;;  %v1084_v38 = vsel %vm689_vm9, %v1081_v22, %v1083_v24  ;;  %v1021_v46 = vsel %vm197_vm1, %v1019_v13, %v1020_v29  ;;  %v1023_v47 = vsel %vm197_vm1, %v1020_v29, %v1022_v19  ;;  %v4073_v12 = vld [vmem:[%s5604_s0] sm:$0xff]  ;;  %v4012_v19 = vld [vmem:[%s5615_s8 + $0x78] sm:$0xff]  }
 0x2e4   :  { %v1038_v42 = vsel %vm220_vm2, %v1036_v33, %v1037_v27  ;;  %v1040_v23 = vsel %vm220_vm2, %v1037_v27, %v1039_v21  ;;  %v1016_v26 = vsel %vm197_vm1, %v1014_v34, %v1015_v28  ;;  %v1107_v39 = vpack.c.bf16 %v1084_v38, %v1082_v37  ;;  %v4013_v21 = vld [vmem:[%s5615_s8 + $0x38] sm:$0xff]   ;;  %3505 = vmatprep.subr.bf16.mxu0 %v4012_v19  ;;  %v4015_v27 = vld [vmem:[%s5615_s8 + $0x70] sm:$0xff]   ;;  %v4018_v37 = vld [vmem:[%s5615_s8 + $0x68] sm:$0xff]  }
 0x2e5   :  { %v3748_v41 = vpack.i.bf16 %v1040_v23, %v1038_v42  ;;  %v1018_v44 = vsel %vm197_vm1, %v1015_v28, %v1017_v5  ;;  %v1060_v51 = vsel %vm666_vm5, %v1058_v32, %v1059_v36  ;;  %v1062_v52 = vsel %vm666_vm5, %v1059_v36, %v1061_v17  ;;  %3506 = vmatpush3.bf16.msra.mxu0 %v4013_v21  ;;  %v4016_v28 = vld [vmem:[%s5615_s8 + $0x30] sm:$0xff]   ;;  %v4019_v32 = vld [vmem:[%s5615_s8 + $0x28] sm:$0xff]  }
 0x2e6   :  { %v3743_v45 = vpack.i.bf16 %v1018_v44, %v1016_v26  ;;  %3323 = vmatprep.mubr.msk.bf16.mxu1 %vm470_vm7, %v1107_v39  ;;  %v3758_v49 = vpack.i.bf16 %v1023_v47, %v1021_v46  ;;  %v3753_v56 = vpack.i.bf16 %v1062_v52, %v1060_v51  ;;  %v1065_v62 = vsel %vm666_vm5, %v1063_v55, %v1064_v50  ;;  %v4076_v44 = vld [vmem:[%s5604_s0 + $0x10] sm:$0xff]  ;;  %v4077_v55 = vld [vmem:[%s5604_s0 + $0x18] sm:$0xff] }
 0x2e7   :  { %3749 = vrot.lane.b32.xlu1 %v3748_v41, %s4080_s21  ;;  %v1067_v57 = vsel %vm666_vm5, %v1064_v50, %v1066_v43  ;;  %v1043_v58 = vsel %vm220_vm2, %v1041_v48, %v1042_v54  ;;  %v1045_v59 = vsel %vm220_vm2, %v1042_v54, %v1044_v35  ;;  %v2096_v53 = vrot.slane %v4072_v8, %v4874_v6 }
 0x2e8   :  { %3744 = vrot.lane.b32.xlu0 %v3743_v45, %s4081_s9  ;;  %v3768_v60 = vpack.i.bf16 %v1067_v57, %v1065_v62  ;;  %v3763_v61 = vpack.i.bf16 %v1045_v59, %v1043_v58  ;;  %v2104_v34 = vrot.slane %v4075_v4, %v4874_v6  ;;  %3507 = vmatprep.subr.bf16.mxu0 %v4015_v27 }
 0x2e9   :  { %v2097_v13 = vmul.f32 %v4073_v12, %v2096_v53  ;;  %v2098_v33 = vmul.f32 %v4074_v2, %v2096_v53  ;;  %3508 = vmatpush3.bf16.msra.mxu0 %v4016_v28  ;;  %v1477_v39 = vrot.slane %v4798_v15, %v4326_v40  ;;  %v2099_v45 = vmul.f32 %v4076_v44, %v2096_v53 }
 0x2ea   :  { %3509 = vmatprep.subr.bf16.mxu0 %v4018_v37  ;;  %v2100_v40 = vmul.f32 %v4077_v55, %v2096_v53 }
 0x2eb   :  { %3759 = vrot.lane.b32.xlu1 %v3758_v49, %s4081_s9  ;;  %v2106_v22 = vadd.f32 %v2104_v34, %v2098_v33  ;;  %v2105_v24 = vadd.f32 %v2104_v34, %v2097_v13 }
 0x2ec   :  { %3754 = vrot.lane.b32.xlu0 %v3753_v56, %s4082_s10  ;;  %v2107_v56 = vadd.f32 %v2104_v34, %v2099_v45  ;;  %v2108_v33 = vadd.f32 %v2104_v34, %v2100_v40 }
 0x2ed   :  { %v2109_v30 = vmax.f32 %v2105_v24, 0.0  ;;  %v2110_v17 = vmax.f32 %v2106_v22, 0.0  ;;  %3510 = vmatpush3.bf16.msra.mxu0 %v4019_v32  ;;  %v4021_v22 = vld [vmem:[%s5615_s8 + $0x60] sm:$0xff]  }
 0x2ee   :  { %v2111_v4 = vmax.f32 %v2107_v56, 0.0  ;;  %v4022_v24 = vld [vmem:[%s5615_s8 + $0x20] sm:$0xff]   ;;  %3511 = vmatprep.subr.bf16.mxu0 %v4021_v22 }
 0x2ef   :  { %3769 = vrot.lane.b32.xlu1 %v3768_v60, %s4082_s10  ;;  %v2118_v41 = vrot.slane %v2110_v17, 4  ;;  %v2117_v47 = vrot.slane %v2109_v30, 4 }
 0x2f0   :  { %3764 = vrot.lane.b32.xlu0 %v3763_v61, %s4080_s21 }
 0x2f1   :  { %v4914_v54 = vsel %vm689_vm9, %v2118_v41, 0.0  ;;  %v4920_v49 = vsel %vm689_vm9, %v2117_v47, %v2118_v41  ;;  %v4923_v48 = vsel %vm689_vm9, 0.0, %v2117_v47  ;;  %3512 = vmatpush3.bf16.msra.mxu0 %v4022_v24 }
 0x2f2   :  { %v2176_v60 = vrot.slane %v4914_v54, 3  ;;  %v2173_v12 = vrot.slane %v4923_v48, 3  ;;  %v2174_v53 = vrot.slane %v4920_v49, 3  ;;  %v2137_v28 = vrot.slane %v4923_v48, 1 }
 0x2f3   :  { %v3493_v5 = vpop.f32.mrf.mxu0  ;;  %v2140_v34 = vrot.slane %v4914_v54, 1 }
 0x2f4   :  { %v4941_v37 = vsel %vm666_vm5, %v2173_v12, %v2174_v53  ;;  %v4944_v32 = vsel %vm666_vm5, %v2174_v53, %v2176_v60 }
 0x2f5   :  { %v3494_v29 = vpop.f32.mrf.mxu0 }
 0x2f6   :  { %v3495_v43 = vadd.f32 %v3494_v29, %v3493_v5  ;;  %v2138_v29 = vrot.slane %v4920_v49, 1 }
 0x2f7   :  { %v3496_v36 = vpop.f32.mrf.mxu0 }
 0x2f8   :  { %v1687_v35 = vadd.f32 %v3495_v43, %v1477_v39 }
 0x2f9   :  { %v3497_v38 = vpop.f32.mrf.mxu0 }
 0x2fa   :  { %v3498_v50 = vadd.f32 %v3497_v38, %v3496_v36 }
 0x2fb   :  { %v3499_v42 = vpop.f32.mrf.mxu0 }
 0x2fc   :  { %v1690_v58 = vadd.f32 %v3498_v50, %v1477_v39 }
 0x2fd   :  { %v3500_v23 = vpop.f32.mrf.mxu0 }
 0x2fe   :  { %v3501_v62 = vadd.f32 %v3500_v23, %v3499_v42  ;;  %v2112_v23 = vmax.f32 %v2108_v33, 0.0 }
 0x2ff   :  { %v3502_v26 = vpop.f32.mrf.mxu0 }
 0x300   :  { %v1695_v21 = vadd.f32 %v3501_v62, %v1477_v39 }
 0x301   :  { %v3503_v46 = vpop.f32.mrf.mxu0 }
 0x302   :  { %v3504_v13 = vadd.f32 %v3503_v46, %v3502_v26  ;;  %v4947_v26 = vrot.slane %v2111_v4, 4  ;;  %v4024_v46 = vld [vmem:[%s5615_s8 + $0x58] sm:$0xff]  }
 0x303   :  { %3513 = vmatprep.subr.bf16.mxu0 %v4024_v46 }
 0x304   :  { %v1698_v38 = vadd.f32 %v3504_v13, %v1477_v39  ;;  %v4025_v39 = vld [vmem:[%s5615_s8 + $0x18] sm:$0xff]  }
 0x305   :  { %3514 = vmatpush3.bf16.msra.mxu0 %v4025_v39 }
 0x323   :  { %v1735_v51 = vpop.f32.mrf.mxu0 }
 0x324   :  { %v1736_v52 = vadd.f32 %v1735_v51, %v1687_v35 }
 0x325   :  { %v1737_v15 = vpop.f32.mrf.mxu0 }
 0x326   :  { %v1750_v57 = vmax.f32 %v1736_v52, 0.0 }
 0x327   :  { %v1738_v59 = vpop.f32.mrf.mxu0 }
 0x328   :  { %v1758_v61 = vrot.slane %v1750_v57, 5  ;;  %v1739_v8 = vadd.f32 %v1738_v59, %v1690_v58 }
 0x329   :  { %v1740_v2 = vpop.f32.mrf.mxu0 }
 0x32a   :  { %v4929_v19 = vsel %vm1269_vm6, 0.0, %v1758_v61  ;;  %v1751_v5 = vmax.f32 %v1739_v8, 0.0 }
 0x32b   :  { %v1743_v27 = vpop.f32.mrf.mxu0  ;;  %v1858_v42 = vrot.slane %v4929_v19, 5  ;;  %v1778_v45 = vrot.slane %v4929_v19, 1  ;;  %v1880_v52 = vrot.slane %v4929_v19, 6  ;;  %v1800_v53 = vrot.slane %v4929_v19, 2 }
 0x32c   :  { %v1759_v30 = vrot.slane %v1751_v5, 5  ;;  %v1744_v17 = vadd.f32 %v1743_v27, %v1695_v21  ;;  %v4027_v5 = vld [vmem:[%s5615_s8 + $0x50] sm:$0xff]  }
 0x32d   :  { %v1745_v36 = vpop.f32.mrf.mxu0  ;;  %v4028_v21 = vld [vmem:[%s5615_s8 + $0x10] sm:$0xff]   ;;  %3515 = vmatprep.subr.bf16.mxu0 %v4027_v5 }
 0x32e   :  { %v4950_v43 = vsel %vm1269_vm6, %v1758_v61, %v1759_v30  ;;  %v4953_v41 = vsel %vm1269_vm6, %v1759_v30, 0.0  ;;  %v1752_v44 = vmax.f32 %v1744_v17, 0.0  ;;  %v2121_v30 = vrot.slane %v2112_v23, 4  ;;  %3516 = vmatpush3.bf16.msra.mxu0 %v4028_v21 }
 0x32f   :  { %v1746_v47 = vpop.f32.mrf.mxu0  ;;  %v1859_v50 = vrot.slane %v4950_v43, 5  ;;  %v1861_v35 = vrot.slane %v4953_v41, 5  ;;  %v1779_v51 = vrot.slane %v4950_v43, 1  ;;  %v1781_v15 = vrot.slane %v4953_v41, 1 }
 0x330   :  { %v1761_v55 = vrot.slane %v1752_v44, 5  ;;  %v1747_v40 = vadd.f32 %v1746_v47, %v1698_v38  ;;  %v1881_v56 = vrot.slane %v4950_v43, 6  ;;  %v1883_v59 = vrot.slane %v4953_v41, 6 }
 0x331   :  { %v1860_v62 = vsel %vm1269_vm6, %v1858_v42, %v1859_v50  ;;  %v1862_v57 = vsel %vm1269_vm6, %v1859_v50, %v1861_v35  ;;  %v1780_v58 = vsel %vm197_vm1, %v1778_v45, %v1779_v51  ;;  %v1748_v60 = vpop.f32.mrf.mxu0  ;;  %v1782_v12 = vsel %vm197_vm1, %v1779_v51, %v1781_v15  ;;  %v4030_v51 = vld [vmem:[%s5615_s8 + $0x48] sm:$0xff]  }
 0x332   :  { %v1753_v61 = vmax.f32 %v1747_v40, 0.0  ;;  %v3778_v8 = vpack.i.bf16 %v1862_v57, %v1860_v62  ;;  %v3773_v13 = vpack.i.bf16 %v1782_v12, %v1780_v58  ;;  %v1882_v2 = vsel %vm609_vm4, %v1880_v52, %v1881_v56  ;;  %v4032_v40 = vld [vmem:[%s5615_s8 + $0x8] sm:$0xff]   ;;  %3517 = vmatprep.subr.bf16.mxu0 %v4030_v51 }
 0x333   :  { %v1884_v33 = vsel %vm609_vm4, %v1881_v56, %v1883_v59  ;;  %v1801_v4 = vrot.slane %v4950_v43, 2  ;;  %v1803_v24 = vrot.slane %v4953_v41, 2  ;;  %v1823_v27 = vrot.slane %v4950_v43, 3  ;;  %3518 = vmatpush3.bf16.msra.mxu0 %v4032_v40 }
 0x334   :  { %v1762_v22 = vrot.slane %v1753_v61, 5  ;;  %3779 = vrot.lane.b32.xlu1 %v3778_v8, %s4081_s9  ;;  %v4987_v17 = vsel %vm1269_vm6, 0.0, %v1761_v55  ;;  %3774 = vrot.lane.b32.xlu0 %v3773_v13, %s4081_s9  ;;  %v1822_v38 = vrot.slane %v4929_v19, 3  ;;  %v1825_v42 = vrot.slane %v4953_v41, 3 }
 0x335   :  { %v1802_v36 = vsel %vm220_vm2, %v1800_v53, %v1801_v4  ;;  %v3788_v46 = vpack.i.bf16 %v1884_v33, %v1882_v2  ;;  %v1804_v23 = vsel %vm220_vm2, %v1801_v4, %v1803_v24  ;;  %v3798_v52 = vpack.i.bf16 %v4944_v32, %v4941_v37 }
 0x336   :  { %v4994_v44 = vsel %vm1269_vm6, %v1761_v55, %v1762_v22  ;;  %v4997_v45 = vsel %vm1269_vm6, %v1762_v22, 0.0  ;;  %v3783_v39 = vpack.i.bf16 %v1804_v23, %v1802_v36  ;;  %v1824_v47 = vsel %vm666_vm5, %v1822_v38, %v1823_v27 }
 0x337   :  { %v1826_v50 = vsel %vm666_vm5, %v1823_v27, %v1825_v42  ;;  %v1784_v35 = vrot.slane %v4994_v44, 1  ;;  %v1786_v55 = vrot.slane %v4997_v45, 1  ;;  %v1783_v15 = vrot.slane %v4987_v17, 1 }
 0x338   :  { %3789 = vrot.lane.b32.xlu1 %v3788_v46, %s4080_s21  ;;  %3784 = vrot.lane.b32.xlu0 %v3783_v39, %s4080_s21  ;;  %v2139_v56 = vsel %vm197_vm1, %v2137_v28, %v2138_v29  ;;  %v2141_v37 = vsel %vm197_vm1, %v2138_v29, %v2140_v34  ;;  %v3793_v32 = vpack.i.bf16 %v1826_v50, %v1824_v47  ;;  %v5031_v57 = vsel %vm689_vm9, 0.0, %v4947_v26  ;;  %v4034_v28 = vld [vmem:[%s5615_s8 + $0x40] sm:$0xff]  }
 0x339   :  { %v5027_v62 = vsel %vm689_vm9, %v4947_v26, %v2121_v30  ;;  %v5034_v58 = vsel %vm689_vm9, %v2121_v30, 0.0  ;;  %v1785_v29 = vsel %vm197_vm1, %v1783_v15, %v1784_v35  ;;  %v1787_v34 = vsel %vm197_vm1, %v1784_v35, %v1786_v55  ;;  %v4036_v26 = vld [vmem:[%s5615_s8] sm:$0xff]   ;;  %3519 = vmatprep.subr.bf16.mxu0 %v4034_v28 }
 0x33a   :  { %v1806_v59 = vrot.slane %v4994_v44, 2  ;;  %v1808_v60 = vrot.slane %v4997_v45, 2  ;;  %v1864_v61 = vrot.slane %v4994_v44, 5  ;;  %v1866_v8 = vrot.slane %v4997_v45, 5  ;;  %3520 = vmatpush3.bf16.msra.mxu0 %v4036_v26 }
 0x33b   :  { %v3803_v12 = vpack.i.bf16 %v2141_v37, %v2139_v56  ;;  %v1805_v53 = vrot.slane %v4987_v17, 2  ;;  %v2178_v13 = vrot.slane %v5031_v57, 3  ;;  %v3808_v2 = vpack.i.bf16 %v1787_v34, %v1785_v29  ;;  %v5078_v37 = vld [vmem:[%s5615_s8 + $0x118] sm:$0xff]  }
 0x33c   :  { %3799 = vrot.lane.b32.xlu1 %v3798_v52, %s4080_s21  ;;  %3794 = vrot.lane.b32.xlu0 %v3793_v32, %s4082_s10  ;;  %v1863_v33 = vrot.slane %v4987_v17, 5  ;;  %v2179_v4 = vrot.slane %v5027_v62, 3  ;;  %v2181_v5 = vrot.slane %v5034_v58, 3  ;;  %v1809_v22 = vsel %vm220_vm2, %v1806_v59, %v1808_v60 }
 0x33d   :  { %v1807_v21 = vsel %vm220_vm2, %v1805_v53, %v1806_v59  ;;  %v1828_v24 = vrot.slane %v4994_v44, 3  ;;  %v1830_v27 = vrot.slane %v4997_v45, 3  ;;  %v1867_v36 = vsel %vm1269_vm6, %v1864_v61, %v1866_v8  ;;  %3639 = vmatprep.subr.bf16.mxu0 %v5078_v37 }
 0x33e   :  { %v1865_v30 = vsel %vm1269_vm6, %v1863_v33, %v1864_v61  ;;  %v1886_v38 = vrot.slane %v4994_v44, 6  ;;  %v1888_v42 = vrot.slane %v4997_v45, 6  ;;  %v1827_v46 = vrot.slane %v4987_v17, 3 }
 0x33f   :  { %v2142_v23 = vrot.slane %v5031_v57, 1  ;;  %v2143_v39 = vrot.slane %v5027_v62, 1  ;;  %v2145_v47 = vrot.slane %v5034_v58, 1  ;;  %v3818_v50 = vpack.i.bf16 %v1809_v22, %v1807_v21 }
 0x340   :  { %3809 = vrot.lane.b32.xlu1 %v3808_v2, %s4081_s9  ;;  %3804 = vrot.lane.b32.xlu0 %v3803_v12, %s4080_s21  ;;  %v1885_v35 = vrot.slane %v4987_v17, 6  ;;  %v2180_v51 = vsel %vm666_vm5, %v2178_v13, %v2179_v4  ;;  %v2245_v52 = vrot.slane %v4923_v48, 7  ;;  %v3813_v55 = vpack.i.bf16 %v1867_v36, %v1865_v30 }
 0x341   :  { %v1829_v40 = vsel %vm666_vm5, %v1827_v46, %v1828_v24  ;;  %v1831_v15 = vsel %vm666_vm5, %v1828_v24, %v1830_v27  ;;  %v2246_v56 = vrot.slane %v4920_v49, 7  ;;  %v1889_v28 = vsel %vm609_vm4, %v1886_v38, %v1888_v42 }
 0x342   :  { %v1887_v32 = vsel %vm609_vm4, %v1885_v35, %v1886_v38  ;;  %v2209_v29 = vrot.slane %v4923_v48, 5  ;;  %v2210_v34 = vrot.slane %v4920_v49, 5  ;;  %v2182_v59 = vsel %vm666_vm5, %v2179_v4, %v2181_v5 }
 0x343   :  { %v2144_v60 = vsel %vm197_vm1, %v2142_v23, %v2143_v39  ;;  %v2146_v26 = vsel %vm197_vm1, %v2143_v39, %v2145_v47  ;;  %v2212_v61 = vrot.slane %v4914_v54, 5  ;;  %v3833_v8 = vpack.i.bf16 %v1831_v15, %v1829_v40 }
 0x344   :  { %3819 = vrot.lane.b32.xlu1 %v3818_v50, %s4080_s21  ;;  %3814 = vrot.lane.b32.xlu0 %v3813_v55, %s4081_s9  ;;  %v2248_v12 = vrot.slane %v4914_v54, 7  ;;  %v3823_v53 = vpack.i.bf16 %v1889_v28, %v1887_v32  ;;  %v3828_v13 = vpack.i.bf16 %v2182_v59, %v2180_v51  ;;  %v3838_v2 = vpack.i.bf16 %v2146_v26, %v2144_v60 }
 0x345   :  { %v2247_v33 = vsel %vm176_vm0, %v2245_v52, %v2246_v56  ;;  %v2211_v4 = vsel %vm1269_vm6, %v2209_v29, %v2210_v34  ;;  %v2213_v5 = vsel %vm1269_vm6, %v2210_v34, %v2212_v61  ;;  %v2214_v21 = vrot.slane %v5031_v57, 5 }
 0x346   :  { %v2215_v22 = vrot.slane %v5027_v62, 5  ;;  %v2217_v24 = vrot.slane %v5034_v58, 5  ;;  %v2249_v27 = vsel %vm176_vm0, %v2246_v56, %v2248_v12  ;;  %v2250_v30 = vrot.slane %v5031_v57, 7 }
 0x347   :  { %v2251_v36 = vrot.slane %v5027_v62, 7  ;;  %v2253_v38 = vrot.slane %v5034_v58, 7  ;;  %v3848_v42 = vpack.i.bf16 %v2213_v5, %v2211_v4  ;;  %v3843_v46 = vpack.i.bf16 %v2249_v27, %v2247_v33 }
 0x348   :  { %3834 = vrot.lane.b32.xlu1 %v3833_v8, %s4082_s10  ;;  %3824 = vrot.lane.b32.xlu0 %v3823_v53, %s4080_s21  ;;  %v2216_v23 = vsel %vm1269_vm6, %v2214_v21, %v2215_v22  ;;  %v2218_v39 = vsel %vm1269_vm6, %v2215_v22, %v2217_v24  ;;  %v1086_v40 = vrot.slane %v4825_v31, 4  ;;  %v1088_v15 = vrot.slane %v4821_v11, 4 }
 0x349   :  { %v2252_v47 = vsel %vm176_vm0, %v2250_v30, %v2251_v36  ;;  %v2254_v50 = vsel %vm176_vm0, %v2251_v36, %v2253_v38  ;;  %v3858_v35 = vpack.i.bf16 %v2218_v39, %v2216_v23  ;;  %v1085_v34 = vrot.slane %v4812_v20, 4 }
 0x34a   :  { %v3853_v51 = vpack.i.bf16 %v2254_v50, %v2252_v47  ;;  %v1089_v11 = vsel %vm689_vm9, %v1086_v40, %v1088_v15  ;;  %v4004_v50 = vld [vmem:[%s5614_s11 + $0x30] sm:$0xff]   ;;  %v4009_v15 = vld [vmem:[%s5614_s11 + $0x8] sm:$0xff]  }
 0x34b   :  { %v1087_v53 = vsel %vm689_vm9, %v1085_v34, %v1086_v40  ;;  %v4008_v40 = vld [vmem:[%s5614_s11 + $0x10] sm:$0xff]  }
 0x34c   :  { %3839 = vrot.lane.b32.xlu1 %v3838_v2, %s4080_s21  ;;  %3829 = vrot.lane.b32.xlu0 %v3828_v13, %s4080_s21  ;;  %v1109_v27 = vpack.c.bf16 %v1089_v11, %v1087_v53  ;;  %v4020_v34 = vld [vmem:[%s5614_s11 + $0x50] sm:$0xff]  }
 0x350   :  { %3849 = vrot.lane.b32.xlu1 %v3848_v42, %s4080_s21  ;;  %3844 = vrot.lane.b32.xlu0 %v3843_v46, %s4080_s21 }
 0x354   :  { %3859 = vrot.lane.b32.xlu1 %v3858_v35, %s4080_s21  ;;  %3854 = vrot.lane.b32.xlu0 %v3853_v51, %s4080_s21 }
 0x359   :  { %v3750_v52 = vpop.permute.xlu1 %3749 }
 0x35a   :  { %v3745_v55 = vpop.permute.xlu0 %3744  ;;  %v3752_v28 = vunpack.i.h.bf16 %v3750_v52  ;;  %v3751_v29 = vunpack.i.l.bf16 %v3750_v52  ;;  %v4006_v52 = vld [vmem:[%s5614_s11 + $0x20] sm:$0xff]  }
 0x35b   :  { %v3747_v56 = vunpack.i.h.bf16 %v3745_v55  ;;  %v3746_v32 = vunpack.i.l.bf16 %v3745_v55  ;;  %v4007_v55 = vld [vmem:[%s5614_s11 + $0x18] sm:$0xff]  }
 0x35d   :  { %v1095_v59 = vsel %vm470_vm7, %v4829_v63, %v3747_v56  ;;  %v1094_v60 = vsel %vm470_vm7, %v4815_v3, %v3746_v32  ;;  %v3760_v26 = vpop.permute.xlu1 %3759  ;;  %v4003_v3 = vld [vmem:[%s5614_s11 + $0x38] sm:$0xff]   ;;  %v4010_v56 = vld [vmem:[%s5614_s11] sm:$0xff]   ;;  %v4011_v32 = vld [vmem:[%s5614_s11 + $0x68] sm:$0xff]  }
 0x35e   :  { %v3755_v61 = vpop.permute.xlu0 %3754  ;;  %v3762_v13 = vunpack.i.h.bf16 %v3760_v26  ;;  %v3761_v2 = vunpack.i.l.bf16 %v3760_v26  ;;  %v1098_v33 = vsel %vm93_vm3, %v1094_v60, %v3751_v29  ;;  %v1099_v4 = vsel %vm93_vm3, %v1095_v59, %v3752_v28  ;;  %v4014_v28 = vld [vmem:[%s5614_s11 + $0x60] sm:$0xff]   ;;  %v4017_v29 = vld [vmem:[%s5614_s11 + $0x58] sm:$0xff]   ;;  %v4023_v59 = vld [vmem:[%s5614_s11 + $0x48] sm:$0xff]  }
 0x35f   :  { %v3757_v8 = vunpack.i.h.bf16 %v3755_v61  ;;  %v3756_v12 = vunpack.i.l.bf16 %v3755_v61  ;;  %v4026_v60 = vld [vmem:[%s5614_s11 + $0x40] sm:$0xff]   ;;  %v4029_v26 = vld [vmem:[%s5615_s8 + $0xf8] sm:$0xff]  }
 0x360   :  { %v1097_v46 = vsel %vm470_vm7, %v4825_v31, %v3762_v13  ;;  %v1096_v23 = vsel %vm470_vm7, %v4812_v20, %v3761_v2  ;;  %v4005_v20 = vld [vmem:[%s5614_s11 + $0x28] sm:$0xff]   ;;  %v1844_v2 = vrot.slane %v4929_v19, 4 }
 0x361   :  { %v1102_v5 = vsel %vm529_vm8, %v1098_v33, %v3756_v12  ;;  %v1103_v63 = vsel %vm529_vm8, %v1099_v4, %v3757_v8  ;;  %v3770_v21 = vpop.permute.xlu1 %3769  ;;  %v1847_v8 = vrot.slane %v4953_v41, 4  ;;  %v1845_v12 = vrot.slane %v4950_v43, 4 }
 0x362   :  { %v1106_v22 = vpack.c.bf16 %v1103_v63, %v1102_v5  ;;  %v3765_v24 = vpop.permute.xlu0 %3764  ;;  %v3772_v30 = vunpack.i.h.bf16 %v3770_v21  ;;  %v3771_v36 = vunpack.i.l.bf16 %v3770_v21  ;;  %v2159_v4 = vrot.slane %v4923_v48, 2 }
 0x363   :  { %v3767_v38 = vunpack.i.h.bf16 %v3765_v24  ;;  %v3766_v42 = vunpack.i.l.bf16 %v3765_v24  ;;  %v2162_v5 = vrot.slane %v4914_v54, 2  ;;  %v1846_v63 = vsel %vm689_vm9, %v1844_v2, %v1845_v12 }
 0x364   :  { %1229 = vmatmul.mubr.bf16.vlgmr.msra.gmra.mxu1 %v1106_v22  ;;  %v1848_v21 = vsel %vm689_vm9, %v1845_v12, %v1847_v8  ;;  %v4033_v8 = vld [vmem:[%s5615_s8 + $0xf0] sm:$0xff]   ;;  %v2164_v2 = vrot.slane %v5031_v57, 2 }
 0x365   :  { %v1101_v39 = vsel %vm93_vm3, %v1097_v46, %v3767_v38  ;;  %v1100_v47 = vsel %vm93_vm3, %v1096_v23, %v3766_v42  ;;  %3324 = vmatprep.mubr.msk.bf16.mxu1 %vm470_vm7, %v1109_v27  ;;  %2045 = vmatpush1.bf16.msra.mxu1 %v4003_v3 }
 0x366   :  { %2046 = vmatprep.subr.bf16.mxu1 %v4079_v1  ;;  %v1104_v35 = vsel %vm529_vm8, %v1100_v47, %v3771_v36  ;;  %v1105_v31 = vsel %vm529_vm8, %v1101_v39, %v3772_v30 }
 0x367   :  { %v1108_v51 = vpack.c.bf16 %v1105_v31, %v1104_v35 }
 0x369   :  { %2047 = vmatpush1.bf16.msra.mxu1 %v4004_v50 }
 0x36a   :  { %2048 = vmatprep.subr.bf16.mxu1 %v4079_v1 }
 0x36c   :  { %1237 = vmatmul.mubr.bf16.gmra.mxu1 %v1108_v51 }
 0x36d   :  { %2049 = vmatpush1.bf16.msra.mxu1 %v4005_v20 }
 0x36e   :  { %2050 = vmatprep.subr.bf16.mxu1 %v4079_v1 }
 0x371   :  { %2051 = vmatpush1.bf16.msra.mxu1 %v4006_v52 }
 0x372   :  { %2052 = vmatprep.subr.bf16.mxu1 %v4079_v1 }
 0x375   :  { %2053 = vmatpush1.bf16.msra.mxu1 %v4007_v55 }
 0x376   :  { %2054 = vmatprep.subr.bf16.mxu1 %v4079_v1 }
 0x379   :  { %2055 = vmatpush1.bf16.msra.mxu1 %v4008_v40 }
 0x37a   :  { %2056 = vmatprep.subr.bf16.mxu1 %v4079_v1 }
 0x37d   :  { %2057 = vmatpush1.bf16.msra.mxu1 %v4009_v15 }
 0x37e   :  { %2058 = vmatprep.subr.bf16.mxu1 %v4079_v1 }
 0x381   :  { %2059 = vmatpush1.bf16.msra.mxu1 %v4010_v56 }
 0x382   :  { %2064 = vmatprep.subr.bf16.mxu1 %v4079_v1 }
 0x385   :  { %2065 = vmatpush2.bf16.msra.mxu1 %v4011_v32 }
 0x386   :  { %2066 = vmatprep.subr.bf16.mxu1 %v4079_v1 }
 0x389   :  { %2067 = vmatpush2.bf16.msra.mxu1 %v4014_v28 }
 0x38a   :  { %2068 = vmatprep.subr.bf16.mxu1 %v4079_v1 }
 0x38d   :  { %2069 = vmatpush2.bf16.msra.mxu1 %v4017_v29 }
 0x38e   :  { %2070 = vmatprep.subr.bf16.mxu1 %v4079_v1 }
 0x391   :  { %2071 = vmatpush2.bf16.msra.mxu1 %v4020_v34 }
 0x392   :  { %2072 = vmatprep.subr.bf16.mxu1 %v4079_v1 }
 0x395   :  { %2073 = vmatpush2.bf16.msra.mxu1 %v4023_v59 }
 0x396   :  { %2074 = vmatprep.subr.bf16.mxu1 %v4079_v1  ;;  %v2160_v1 = vrot.slane %v4920_v49, 2 }
 0x398   :  { %v2161_v50 = vsel %vm220_vm2, %v2159_v4, %v2160_v1  ;;  %v2163_v35 = vsel %vm220_vm2, %v2160_v1, %v2162_v5  ;;  %v4035_v5 = vld [vmem:[%s5615_s8 + $0xb0] sm:$0xff]  }
 0x399   :  { %2075 = vmatpush2.bf16.msra.mxu1 %v4026_v60 }
 0x39a   :  { %3533 = vmatprep.subr.bf16.mxu1 %v4029_v26 }
 0x3a6   :  { %v3780_v61 = vpop.permute.xlu1 %3779  ;;  %v3775_v53 = vpop.permute.xlu0 %3774 }
 0x3a7   :  { %v3782_v11 = vunpack.i.h.bf16 %v3780_v61  ;;  %v3781_v13 = vunpack.i.l.bf16 %v3780_v61  ;;  %v3777_v30 = vunpack.i.h.bf16 %v3775_v53  ;;  %v3776_v36 = vunpack.i.l.bf16 %v3775_v53 }
 0x3a9   :  { %v1915_v24 = vsel %vm470_vm7, %v1848_v21, %v3782_v11  ;;  %v1914_v27 = vsel %vm470_vm7, %v1846_v63, %v3781_v13  ;;  %v1903_v52 = vsel %vm470_vm7, %v4950_v43, %v3777_v30  ;;  %v1902_v55 = vsel %vm470_vm7, %v4929_v19, %v3776_v36  ;;  %v4031_v19 = vld [vmem:[%s5615_s8 + $0xb8] sm:$0xff]   ;;  %v4044_v30 = vld [vmem:[%s5615_s8 + $0x110] sm:$0xff]  }
 0x3aa   :  { %v3790_v33 = vpop.permute.xlu1 %3789  ;;  %v3785_v22 = vpop.permute.xlu0 %3784  ;;  %v1852_v11 = vrot.slane %v4997_v45, 4  ;;  %v1850_v13 = vrot.slane %v4994_v44, 4  ;;  %v2165_v63 = vrot.slane %v5027_v62, 2  ;;  %v2167_v45 = vrot.slane %v5034_v58, 2 }
 0x3ab   :  { %v3792_v3 = vunpack.i.h.bf16 %v3790_v33  ;;  %v3791_v41 = vunpack.i.l.bf16 %v3790_v33  ;;  %v3787_v46 = vunpack.i.h.bf16 %v3785_v22  ;;  %v3786_v23 = vunpack.i.l.bf16 %v3785_v22 }
 0x3ac   :  { %v1849_v22 = vrot.slane %v4987_v17, 4 }
 0x3ad   :  { %v1918_v38 = vsel %vm93_vm3, %v1914_v27, %v3791_v41  ;;  %v1919_v42 = vsel %vm93_vm3, %v1915_v24, %v3792_v3  ;;  %v1906_v56 = vsel %vm93_vm3, %v1902_v55, %v3786_v23  ;;  %v1907_v32 = vsel %vm93_vm3, %v1903_v52, %v3787_v46  ;;  %v4037_v27 = vld [vmem:[%s5615_s8 + $0xe8] sm:$0xff]  }
 0x3ae   :  { %v1923_v39 = vpack.c.bf16 %v1919_v42, %v1918_v38  ;;  %v3800_v47 = vpop.permute.xlu1 %3799  ;;  %v3795_v51 = vpop.permute.xlu0 %3794  ;;  %v1851_v42 = vsel %vm689_vm9, %v1849_v22, %v1850_v13 }
 0x3af   :  { %v3802_v31 = vunpack.i.h.bf16 %v3800_v47  ;;  %v3801_v20 = vunpack.i.l.bf16 %v3800_v47  ;;  %v3797_v40 = vunpack.i.h.bf16 %v3795_v51  ;;  %v3796_v15 = vunpack.i.l.bf16 %v3795_v51 }
 0x3b0   :  { %3369 = vmatprep.mubr.msk.bf16.mxu1 %vm529_vm8, %v1923_v39  ;;  %v1853_v39 = vsel %vm689_vm9, %v1850_v13, %v1852_v11 }
 0x3b1   :  { %v2271_v28 = vsel %vm93_vm3, %v2161_v50, %v3801_v20  ;;  %v2272_v29 = vsel %vm93_vm3, %v2163_v35, %v3802_v31  ;;  %v1910_v34 = vsel %vm529_vm8, %v1906_v56, %v3796_v15  ;;  %v1911_v59 = vsel %vm529_vm8, %v1907_v32, %v3797_v40  ;;  %v4038_v50 = vld [vmem:[%s5615_s8 + $0xa8] sm:$0xff]  }
 0x3b2   :  { %v3810_v43 = vpop.permute.xlu1 %3809  ;;  %v2284_v60 = vpack.c.bf16 %v2272_v29, %v2271_v28  ;;  %v1922_v26 = vpack.c.bf16 %v1911_v59, %v1910_v34  ;;  %v3805_v61 = vpop.permute.xlu0 %3804  ;;  %v2166_v35 = vsel %vm220_vm2, %v2164_v2, %v2165_v63  ;;  %v2168_v31 = vsel %vm220_vm2, %v2165_v63, %v2167_v45  ;;  %v4047_v56 = vld [vmem:[%s5615_s8 + $0x108] sm:$0xff]   ;;  %v4050_v63 = vld [vmem:[%s5615_s8 + $0x100] sm:$0xff]  }
 0x3b3   :  { %v3807_v12 = vunpack.i.h.bf16 %v3805_v61  ;;  %v3806_v53 = vunpack.i.l.bf16 %v3805_v61  ;;  %v3812_v21 = vunpack.i.h.bf16 %v3810_v43  ;;  %v3811_v3 = vunpack.i.l.bf16 %v3810_v43 }
 0x3b4   :  { %2623 = vmatprep.mubr.bf16.mxu0 %v2284_v60  ;;  %2077 = vmatmul.mubr.bf16.vlgmr.msra.gmra.mxu1 %v1922_v26  ;;  %v2231_v20 = vrot.slane %v4923_v48, 6  ;;  %v4040_v26 = vld [vmem:[%s5615_s8 + $0xa0] sm:$0xff]  }
 0x3b5   :  { %v2268_v33 = vsel %vm93_vm3, %v4920_v49, %v3807_v12  ;;  %v2267_v4 = vsel %vm93_vm3, %v4923_v48, %v3806_v53  ;;  %3534 = vmatpush3.bf16.msra.mxu1 %v4031_v19  ;;  %v1905_v51 = vsel %vm470_vm7, %v4994_v44, %v3812_v21  ;;  %v1904_v52 = vsel %vm470_vm7, %v4987_v17, %v3811_v3  ;;  %v4043_v3 = vld [vmem:[%s5615_s8 + $0x98] sm:$0xff]  }
 0x3b6   :  { %v3820_v1 = vpop.permute.xlu1 %3819  ;;  %v2283_v41 = vpack.c.bf16 %v2268_v33, %v2267_v4  ;;  %v3815_v24 = vpop.permute.xlu0 %3814  ;;  %3535 = vmatprep.subr.bf16.mxu1 %v4033_v8  ;;  %v2232_v8 = vrot.slane %v4920_v49, 6  ;;  %v2234_v12 = vrot.slane %v4914_v54, 6  ;;  %v4042_v4 = vld [vmem:[%s5615_s8 + $0xd8] sm:$0xff]  }
 0x3b7   :  { %v3822_v36 = vunpack.i.h.bf16 %v3820_v1  ;;  %v3821_v38 = vunpack.i.l.bf16 %v3820_v1  ;;  %v3817_v46 = vunpack.i.h.bf16 %v3815_v24  ;;  %v3816_v23 = vunpack.i.l.bf16 %v3815_v24 }
 0x3b8   :  { %2624 = vmatmul.mubr.bf16.vlgmr.msra.gmra.mxu0 %v2283_v41 }
 0x3b9   :  { %3536 = vmatpush3.bf16.msra.mxu1 %v4035_v5  ;;  %3640 = vmatpush3.bf16.msra.mxu0 %v5078_v37  ;;  %v4039_v37 = vld [vmem:[%s5615_s8 + $0xe0] sm:$0xff]   ;;  %v1908_v32 = vsel %vm93_vm3, %v1904_v52, %v3821_v38  ;;  %v1909_v44 = vsel %vm93_vm3, %v1905_v51, %v3822_v36  ;;  %v1917_v17 = vsel %vm470_vm7, %v1853_v39, %v3817_v46  ;;  %v2196_v51 = vrot.slane %v4920_v49, 4 }
 0x3ba   :  { %v3835_v47 = vpop.permute.xlu1 %3834  ;;  %v3825_v15 = vpop.permute.xlu0 %3824  ;;  %3537 = vmatprep.subr.bf16.mxu1 %v4037_v27  ;;  %3641 = vmatprep.subr.bf16.mxu0 %v4044_v30  ;;  %v1916_v34 = vsel %vm470_vm7, %v1851_v42, %v3816_v23  ;;  %v4045_v27 = vld [vmem:[%s5615_s8 + $0xd0] sm:$0xff]   ;;  %v2233_v38 = vsel %vm609_vm4, %v2231_v20, %v2232_v8  ;;  %v2235_v42 = vsel %vm609_vm4, %v2232_v8, %v2234_v12  ;;  %v2195_v20 = vrot.slane %v4923_v48, 4 }
 0x3bb   :  { %v3837_v55 = vunpack.i.h.bf16 %v3835_v47  ;;  %v3836_v40 = vunpack.i.l.bf16 %v3835_v47  ;;  %v3827_v28 = vunpack.i.h.bf16 %v3825_v15  ;;  %v3826_v29 = vunpack.i.l.bf16 %v3825_v15  ;;  %v4046_v47 = vld [vmem:[%s5615_s8 + $0x90] sm:$0xff]  }
 0x3bc   :  { %v2287_v39 = vpack.c.bf16 %v4914_v54, %v4920_v49  ;;  %v2198_v52 = vrot.slane %v4914_v54, 4  ;;  %v4049_v49 = vld [vmem:[%s5615_s8 + $0x88] sm:$0xff]   ;;  %v2200_v8 = vrot.slane %v5031_v57, 4 }
 0x3bd   :  { %v1912_v59 = vsel %vm529_vm8, %v1908_v32, %v3836_v40  ;;  %v1913_v43 = vsel %vm529_vm8, %v1909_v44, %v3837_v55  ;;  %v1920_v19 = vsel %vm93_vm3, %v1916_v34, %v3826_v29  ;;  %v1921_v60 = vsel %vm93_vm3, %v1917_v17, %v3827_v28  ;;  %3538 = vmatpush3.bf16.msra.mxu1 %v4038_v50  ;;  %v4051_v17 = vld [vmem:[%s5615_s8 + $0xc0] sm:$0xff]  }
 0x3be   :  { %v3840_v61 = vpop.permute.xlu1 %3839  ;;  %3642 = vmatpush3.bf16.msra.mxu0 %v4044_v30  ;;  %v1925_v53 = vpack.c.bf16 %v1921_v60, %v1920_v19  ;;  %3539 = vmatprep.subr.bf16.mxu1 %v4039_v37  ;;  %v1924_v11 = vpack.c.bf16 %v1913_v43, %v1912_v59  ;;  %v3830_v13 = vpop.permute.xlu0 %3829  ;;  %v2236_v37 = vrot.slane %v5031_v57, 6  ;;  %v2239_v32 = vrot.slane %v5034_v58, 6 }
 0x3bf   :  { %v3842_v2 = vunpack.i.h.bf16 %v3840_v61  ;;  %v3841_v33 = vunpack.i.l.bf16 %v3840_v61  ;;  %3643 = vmatprep.subr.bf16.mxu0 %v4047_v56  ;;  %v3832_v1 = vunpack.i.h.bf16 %v3830_v13  ;;  %v3831_v5 = vunpack.i.l.bf16 %v3830_v13  ;;  %v4052_v61 = vld [vmem:[%s5615_s8 + $0x80] sm:$0xff]  }
 0x3c0   :  { %3370 = vmatprep.mubr.msk.bf16.mxu1 %vm529_vm8, %v1925_v53  ;;  %v2292_v44 = vpack.c.bf16 %v5034_v58, %v5027_v62  ;;  %v2197_v28 = vsel %vm689_vm9, %v2195_v20, %v2196_v51  ;;  %v2199_v29 = vsel %vm689_vm9, %v2196_v51, %v2198_v52  ;;  %v2201_v13 = vrot.slane %v5027_v62, 4  ;;  %v4062_v20 = vld [vmem:[%s5616_s12 + $0x20] sm:$0xff]   ;;  %v4063_v51 = vld [vmem:[%s5616_s12 + $0x58] sm:$0xff]  }
 0x3c1   :  { %v2269_v45 = vsel %vm93_vm3, %v5031_v57, %v3841_v33  ;;  %v2270_v21 = vsel %vm93_vm3, %v5027_v62, %v3842_v2  ;;  %3540 = vmatpush3.bf16.msra.mxu1 %v4040_v26  ;;  %v2273_v41 = vsel %vm93_vm3, %v2166_v35, %v3831_v5  ;;  %v2274_v22 = vsel %vm93_vm3, %v2168_v31, %v3832_v1  ;;  %v4048_v31 = vld [vmem:[%s5615_s8 + $0xc8] sm:$0xff]   ;;  %v4064_v52 = vld [vmem:[%s5616_s12 + $0x18] sm:$0xff]  }
 0x3c2   :  { %v2288_v24 = vpack.c.bf16 %v2270_v21, %v2269_v45  ;;  %3644 = vmatpush3.bf16.msra.mxu0 %v4047_v56  ;;  %2085 = vmatmul.mubr.bf16.gmra.mxu1 %v1924_v11  ;;  %v2289_v30 = vpack.c.bf16 %v2274_v22, %v2273_v41  ;;  %v3845_v36 = vpop.permute.xlu0 %3844  ;;  %v3850_v55 = vpop.permute.xlu1 %3849  ;;  %v2237_v56 = vrot.slane %v5027_v62, 6  ;;  %v2203_v2 = vrot.slane %v5034_v58, 4 }
 0x3c3   :  { %3541 = vmatprep.subr.bf16.mxu1 %v4042_v4  ;;  %v3847_v46 = vunpack.i.h.bf16 %v3845_v36  ;;  %v3846_v23 = vunpack.i.l.bf16 %v3845_v36  ;;  %3645 = vmatprep.subr.bf16.mxu0 %v4050_v63  ;;  %v3852_v48 = vunpack.i.h.bf16 %v3850_v55  ;;  %v3851_v54 = vunpack.i.l.bf16 %v3850_v55 }
 0x3c4   :  { %2631 = vmatprep.mubr.bf16.mxu0 %v2289_v30  ;;  %v2238_v43 = vsel %vm609_vm4, %v2236_v37, %v2237_v56  ;;  %v2240_v19 = vsel %vm609_vm4, %v2237_v56, %v2239_v32  ;;  %v2204_v45 = vsel %vm689_vm9, %v2201_v13, %v2203_v2  ;;  %v4053_v30 = vld [vmem:[%s5616_s12 + $0x88] sm:$0xff]  }
 0x3c5   :  { %3542 = vmatpush3.bf16.msra.mxu1 %v4043_v3  ;;  %2632 = vmatmul.mubr.bf16.gmra.mxu0 %v2288_v24  ;;  %v2279_v50 = vsel %vm93_vm3, %v2233_v38, %v3846_v23  ;;  %v2280_v35 = vsel %vm93_vm3, %v2235_v42, %v3847_v46  ;;  %v2276_v60 = vsel %vm93_vm3, %v2199_v29, %v3852_v48  ;;  %v4054_v38 = vld [vmem:[%s5616_s12 + $0x80] sm:$0xff]   ;;  %v4055_v46 = vld [vmem:[%s5616_s12 + $0x78] sm:$0xff]  }
 0x3c6   :  { %3543 = vmatprep.subr.bf16.mxu1 %v4045_v27  ;;  %3646 = vmatpush3.bf16.msra.mxu0 %v4050_v63  ;;  %v2286_v40 = vpack.c.bf16 %v2280_v35, %v2279_v50  ;;  %v3855_v15 = vpop.permute.xlu0 %3854  ;;  %v2275_v26 = vsel %vm93_vm3, %v2197_v28, %v3851_v54  ;;  %v3860_v12 = vpop.permute.xlu1 %3859  ;;  %v2202_v63 = vsel %vm689_vm9, %v2200_v8, %v2201_v13  ;;  %v4056_v23 = vld [vmem:[%s5616_s12 + $0x38] sm:$0xff]   ;;  %v4059_v50 = vld [vmem:[%s5616_s12 + $0x68] sm:$0xff]  }
 0x3c7   :  { %3647 = vmatprep.mubr.msk.bf16.mxu0 %vm93_vm3, %v2287_v39  ;;  %v3857_v34 = vunpack.i.h.bf16 %v3855_v15  ;;  %v3856_v59 = vunpack.i.l.bf16 %v3855_v15  ;;  %v2285_v33 = vpack.c.bf16 %v2276_v60, %v2275_v26  ;;  %v3862_v4 = vunpack.i.h.bf16 %v3860_v12  ;;  %3651 = vmatprep.subr.bf16.mxu0 %v4053_v30  ;;  %v4057_v39 = vld [vmem:[%s5616_s12 + $0x70] sm:$0xff]   ;;  %v4060_v35 = vld [vmem:[%s5616_s12 + $0x28] sm:$0xff]   ;;  %v4078_v60 = vld [vmem:[%s5610_s3] sm:$0xf] }
 0x3c8   :  { %2672 = vmatprep.mubr.bf16.mxu1 %v2286_v40  ;;  %v3861_v1 = vunpack.i.l.bf16 %v3860_v12  ;;  %v2368_v26 = vrot.slane %v4078_v60, %v4874_v6  ;;  %v4068_v60 = vld [vmem:[%s5616_s12 + $0x8] sm:$0xff]  }
 0x3c9   :  { %3544 = vmatpush3.bf16.msra.mxu1 %v4046_v47  ;;  %v2281_v53 = vsel %vm93_vm3, %v2238_v43, %v3856_v59  ;;  %v2282_v11 = vsel %vm93_vm3, %v2240_v19, %v3857_v34  ;;  %v2278_v21 = vsel %vm93_vm3, %v2204_v45, %v3862_v4  ;;  %v4058_v47 = vld [vmem:[%s5616_s12 + $0x30] sm:$0xff]  }
 0x3ca   :  { %3545 = vmatprep.subr.bf16.mxu1 %v4048_v31  ;;  %v2291_v5 = vpack.c.bf16 %v2282_v11, %v2281_v53  ;;  %v2277_v57 = vsel %vm93_vm3, %v2202_v63, %v3861_v1  ;;  %v4061_v31 = vld [vmem:[%s5616_s12 + $0x60] sm:$0xff]  }
 0x3cb   :  { %v2290_v3 = vpack.c.bf16 %v2278_v21, %v2277_v57 }
 0x3cd   :  { %3546 = vmatpush3.bf16.msra.mxu1 %v4049_v49  ;;  %3648 = vmatmul.mubr.msk.bf16.vlgmr.msra.gmra.mxu0 %vm93_vm3, %v2292_v44 }
 0x3ce   :  { %3547 = vmatprep.subr.bf16.mxu1 %v4051_v17  ;;  %3652 = vmatpush3.bf16.msra.mxu0 %v4053_v30 }
 0x3cf   :  { %3653 = vmatprep.subr.bf16.mxu0 %v4054_v38 }
 0x3d1   :  { %3548 = vmatpush3.bf16.msra.mxu1 %v4052_v61 }
 0x3d2   :  { %3654 = vmatpush3.bf16.msra.mxu0 %v4054_v38  ;;  %3567 = vmatprep.subr.bf16.mxu1 %v4055_v46 }
 0x3d4   :  { %2673 = vmatmul.mubr.bf16.vlgmr.msra.gmra.mxu1 %v2285_v33 }
 0x3d5   :  { %2680 = vmatprep.mubr.bf16.mxu1 %v2291_v5  ;;  %3568 = vmatpush3.bf16.msra.mxu1 %v4056_v23 }
 0x3d6   :  { %3569 = vmatprep.subr.bf16.mxu1 %v4057_v39 }
 0x3d9   :  { %3570 = vmatpush3.bf16.msra.mxu1 %v4058_v47 }
 0x3da   :  { %3571 = vmatprep.subr.bf16.mxu1 %v4059_v50 }
 0x3dc   :  { %2681 = vmatmul.mubr.bf16.gmra.mxu1 %v2290_v3 }
 0x3dd   :  { %3572 = vmatpush3.bf16.msra.mxu1 %v4060_v35 }
 0x3de   :  { %3573 = vmatprep.subr.bf16.mxu1 %v4061_v31  ;;  %v4065_v31 = vld [vmem:[%s5616_s12 + $0x50] sm:$0xff]  }
 0x3e1   :  { %3574 = vmatpush3.bf16.msra.mxu1 %v4062_v20  ;;  %v4066_v20 = vld [vmem:[%s5616_s12 + $0x10] sm:$0xff]  }
 0x3e2   :  { %3575 = vmatprep.subr.bf16.mxu1 %v4063_v51 }
 0x3e5   :  { %3576 = vmatpush3.bf16.msra.mxu1 %v4064_v52 }
 0x3e6   :  { %3577 = vmatprep.subr.bf16.mxu1 %v4065_v31 }
 0x3e9   :  { %3578 = vmatpush3.bf16.msra.mxu1 %v4066_v20 }
 0x424   :  { %v5341_v62 = vpop.f32.mrf.mxu1 }
 0x426   :  { %v1232_v58 = vpop.f32.mrf.mxu1 }
 0x428   :  { %v5343_v41 = vpop.f32.mrf.mxu1 }
 0x42a   :  { %v1235_v22 = vpop.f32.mrf.mxu1 }
 0x42c   :  { %v5345_v24 = vpop.f32.mrf.mxu1 }
 0x42e   :  { %v1240_v27 = vpop.f32.mrf.mxu1 }
 0x430   :  { %v5350_v36 = vpop.f32.mrf.mxu1 }
 0x432   :  { %v1243_v42 = vpop.f32.mrf.mxu1 }
 0x474   :  { %v5385_v55 = vpop.f32.mrf.mxu1 }
 0x476   :  { %v2080_v40 = vpop.f32.mrf.mxu1 }
 0x478   :  { %v5387_v15 = vpop.f32.mrf.mxu1  ;;  %v3521_v37 = vpop.f32.mrf.mxu0 }
 0x47a   :  { %v2083_v56 = vpop.f32.mrf.mxu1  ;;  %v3522_v32 = vpop.f32.mrf.mxu0 }
 0x47b   :  { %v3523_v61 = vadd.f32 %v3522_v32, %v3521_v37 }
 0x47c   :  { %v3524_v49 = vpop.f32.mrf.mxu0 }
 0x47d   :  { %v2626_v11 = vadd.f32 %v3523_v61, %v2368_v26 }
 0x47e   :  { %v3525_v54 = vpop.f32.mrf.mxu0 }
 0x47f   :  { %v3526_v13 = vadd.f32 %v3525_v54, %v3524_v49 }
 0x481   :  { %v2629_v63 = vadd.f32 %v3526_v13, %v2368_v26 }
 0x482   :  { %v5389_v48 = vpop.f32.mrf.mxu1 }
 0x484   :  { %v2088_v44 = vpop.f32.mrf.mxu1 }
 0x485   :  { %v3527_v28 = vpop.f32.mrf.mxu0 }
 0x486   :  { %v5391_v29 = vpop.f32.mrf.mxu1 }
 0x487   :  { %v3528_v17 = vpop.f32.mrf.mxu0 }
 0x488   :  { %v2091_v34 = vpop.f32.mrf.mxu1  ;;  %v3529_v45 = vadd.f32 %v3528_v17, %v3527_v28 }
 0x489   :  { %v3530_v59 = vpop.f32.mrf.mxu0 }
 0x48a   :  { %v2634_v38 = vadd.f32 %v3529_v45, %v2368_v26 }
 0x48b   :  { %v3531_v43 = vpop.f32.mrf.mxu0 }
 0x48c   :  { %v3532_v27 = vadd.f32 %v3531_v43, %v3530_v59 }
 0x48d   :  { %v3649_v19 = vpop.f32.mrf.mxu0 }
 0x48e   :  { %v2637_v51 = vadd.f32 %v3532_v27, %v2368_v26 }
 0x48f   :  { %v2723_v12 = vpop.f32.mrf.mxu0 }
 0x491   :  { %v3650_v1 = vpop.f32.mrf.mxu0 }
 0x493   :  { %v2726_v6 = vpop.f32.mrf.mxu0 }
 0x494   :  { %v3549_v8 = vpop.f32.mrf.mxu1 }
 0x496   :  { %v3550_v53 = vpop.f32.mrf.mxu1 }
 0x497   :  { %v3551_v2 = vadd.f32 %v3550_v53, %v3549_v8 }
 0x498   :  { %v3552_v33 = vpop.f32.mrf.mxu1 }
 0x499   :  { %v2675_v4 = vadd.f32 %v3551_v2, %v2626_v11 }
 0x49a   :  { %v3553_v5 = vpop.f32.mrf.mxu1 }
 0x49b   :  { %v2724_v57 = vadd.f32 %v2723_v12, %v2675_v4  ;;  %v3554_v21 = vadd.f32 %v3553_v5, %v3552_v33 }
 0x49c   :  { %v3555_v3 = vpop.f32.mrf.mxu1 }
 0x49d   :  { %v2738_v58 = vmax.f32 %v2724_v57, 0.0  ;;  %v2678_v22 = vadd.f32 %v3554_v21, %v2629_v63 }
 0x49e   :  { %v3556_v30 = vpop.f32.mrf.mxu1 }
 0x49f   :  { %v2746_v42 = vrot.slane %v2738_v58, 4  ;;  %v2727_v46 = vadd.f32 %v2726_v6, %v2678_v22  ;;  %v3557_v23 = vadd.f32 %v3556_v30, %v3555_v3  ;;  %v4069_v6 = vld [vmem:[%s5616_s12 + $0x40] sm:$0xff]  }
 0x4a0   :  { %v3558_v39 = vpop.f32.mrf.mxu1  ;;  %v4070_v30 = vld [vmem:[%s5616_s12] sm:$0xff]  }
 0x4a1   :  { %v5398_v47 = vsel %vm689_vm9, 0.0, %v2746_v42  ;;  %v2739_v50 = vmax.f32 %v2727_v46, 0.0  ;;  %v2683_v35 = vadd.f32 %v3557_v23, %v2634_v38 }
 0x4a2   :  { %v3559_v52 = vpop.f32.mrf.mxu1  ;;  %v2846_v32 = vrot.slane %v5398_v47, 5  ;;  %v2766_v49 = vrot.slane %v5398_v47, 1  ;;  %v2868_v54 = vrot.slane %v5398_v47, 6  ;;  %v2788_v44 = vrot.slane %v5398_v47, 2 }
 0x4a3   :  { %v2747_v40 = vrot.slane %v2739_v50, 4  ;;  %v2732_v37 = vadd.f32 %v3649_v19, %v2683_v35  ;;  %v3560_v56 = vadd.f32 %v3559_v52, %v3558_v39  ;;  %v2890_v28 = vrot.slane %v5398_v47, 7  ;;  %v4067_v19 = vld [vmem:[%s5616_s12 + $0x48] sm:$0xff]  }
 0x4a4   :  { %3579 = vmatprep.subr.bf16.mxu1 %v4067_v19  ;;  %v2810_v21 = vrot.slane %v5398_v47, 3 }
 0x4a5   :  { %v5412_v17 = vsel %vm689_vm9, %v2746_v42, %v2747_v40  ;;  %v5415_v34 = vsel %vm689_vm9, %v2747_v40, 0.0  ;;  %v2740_v59 = vmax.f32 %v2732_v37, 0.0  ;;  %v2686_v43 = vadd.f32 %v3560_v56, %v2637_v51  ;;  %3580 = vmatpush3.bf16.msra.mxu1 %v4068_v60 }
 0x4a6   :  { %v2938_v26 = vpack.c.bf16 %v5415_v34, %v5412_v17  ;;  %v2847_v61 = vrot.slane %v5412_v17, 5  ;;  %v2849_v8 = vrot.slane %v5415_v34, 5  ;;  %v2767_v12 = vrot.slane %v5412_v17, 1  ;;  %3581 = vmatprep.subr.bf16.mxu1 %v4069_v6 }
 0x4a7   :  { %v2749_v53 = vrot.slane %v2740_v59, 4  ;;  %v2735_v11 = vadd.f32 %v3650_v1, %v2686_v43  ;;  %v2769_v13 = vrot.slane %v5415_v34, 1  ;;  %v2869_v2 = vrot.slane %v5412_v17, 6 }
 0x4a8   :  { %3655 = vmatprep.mubr.msk.bf16.mxu0 %vm470_vm7, %v2938_v26  ;;  %v2848_v33 = vsel %vm1269_vm6, %v2846_v32, %v2847_v61  ;;  %v2850_v4 = vsel %vm1269_vm6, %v2847_v61, %v2849_v8  ;;  %v2768_v5 = vsel %vm197_vm1, %v2766_v49, %v2767_v12  ;;  %v2871_v63 = vrot.slane %v5415_v34, 6 }
 0x4a9   :  { %v2741_v45 = vmax.f32 %v2735_v11, 0.0  ;;  %v3863_v57 = vpack.i.bf16 %v2850_v4, %v2848_v33  ;;  %v2770_v1 = vsel %vm197_vm1, %v2767_v12, %v2769_v13  ;;  %v2870_v58 = vsel %vm609_vm4, %v2868_v54, %v2869_v2  ;;  %3582 = vmatpush3.bf16.msra.mxu1 %v4070_v30 }
 0x4aa   :  { %v3868_v3 = vpack.i.bf16 %v2770_v1, %v2768_v5  ;;  %v2872_v22 = vsel %vm609_vm4, %v2869_v2, %v2871_v63  ;;  %v2789_v27 = vrot.slane %v5412_v17, 2  ;;  %v5447_v38 = vsel %vm689_vm9, 0.0, %v2749_v53 }
 0x4ab   :  { %v2750_v42 = vrot.slane %v2741_v45, 4  ;;  %3864 = vrot.lane.b32.xlu0 %v3863_v57, %s4081_s9  ;;  %v2791_v46 = vrot.slane %v5415_v34, 2  ;;  %v2891_v23 = vrot.slane %v5412_v17, 7  ;;  %v2893_v50 = vrot.slane %v5415_v34, 7 }
 0x4ac   :  { %3869 = vrot.lane.b32.xlu1 %v3868_v3, %s4081_s9  ;;  %v2790_v39 = vsel %vm220_vm2, %v2788_v44, %v2789_v27  ;;  %v2811_v35 = vrot.slane %v5412_v17, 3  ;;  %v2813_v31 = vrot.slane %v5415_v34, 3  ;;  %v3873_v52 = vpack.i.bf16 %v2872_v22, %v2870_v58 }
 0x4ad   :  { %v5458_v20 = vsel %vm689_vm9, %v2749_v53, %v2750_v42  ;;  %v5461_v51 = vsel %vm689_vm9, %v2750_v42, 0.0  ;;  %v2792_v40 = vsel %vm220_vm2, %v2789_v27, %v2791_v46  ;;  %v2892_v32 = vsel %vm176_vm0, %v2890_v28, %v2891_v23 }
 0x4ae   :  { %v3878_v37 = vpack.i.bf16 %v2792_v40, %v2790_v39  ;;  %v2941_v56 = vpack.c.bf16 %v5461_v51, %v5458_v20  ;;  %v2894_v49 = vsel %vm176_vm0, %v2891_v23, %v2893_v50  ;;  %v2812_v54 = vsel %vm666_vm5, %v2810_v21, %v2811_v35 }
 0x4af   :  { %3874 = vrot.lane.b32.xlu0 %v3873_v52, %s4080_s21  ;;  %v2814_v44 = vsel %vm666_vm5, %v2811_v35, %v2813_v31  ;;  %v2852_v59 = vrot.slane %v5458_v20, 5  ;;  %v2851_v43 = vrot.slane %v5447_v38, 5  ;;  %v2854_v19 = vrot.slane %v5461_v51, 5 }
 0x4b0   :  { %3879 = vrot.lane.b32.xlu1 %v3878_v37, %s4080_s21  ;;  %3656 = vmatmul.mubr.msk.bf16.vlgmr.msra.gmra.mxu0 %vm470_vm7, %v2941_v56  ;;  %v2772_v28 = vrot.slane %v5458_v20, 1  ;;  %v3883_v60 = vpack.i.bf16 %v2894_v49, %v2892_v32  ;;  %v2771_v26 = vrot.slane %v5447_v38, 1  ;;  %v2774_v61 = vrot.slane %v5461_v51, 1 }
 0x4b1   :  { %v2874_v8 = vrot.slane %v5458_v20, 6  ;;  %v3888_v12 = vpack.i.bf16 %v2814_v44, %v2812_v54  ;;  %v2853_v53 = vsel %vm1269_vm6, %v2851_v43, %v2852_v59  ;;  %v2855_v11 = vsel %vm1269_vm6, %v2852_v59, %v2854_v19 }
 0x4b2   :  { %v2876_v13 = vrot.slane %v5461_v51, 6  ;;  %v2773_v2 = vsel %vm197_vm1, %v2771_v26, %v2772_v28  ;;  %v2775_v33 = vsel %vm197_vm1, %v2772_v28, %v2774_v61  ;;  %v2873_v4 = vrot.slane %v5447_v38, 6 }
 0x4b3   :  { %3884 = vrot.lane.b32.xlu0 %v3883_v60, %s4082_s10  ;;  %v2794_v5 = vrot.slane %v5458_v20, 2  ;;  %v2796_v63 = vrot.slane %v5461_v51, 2  ;;  %v3893_v45 = vpack.i.bf16 %v2855_v11, %v2853_v53  ;;  %v2793_v1 = vrot.slane %v5447_v38, 2 }
 0x4b4   :  { %3889 = vrot.lane.b32.xlu1 %v3888_v12, %s4082_s10  ;;  %v2875_v57 = vsel %vm609_vm4, %v2873_v4, %v2874_v8  ;;  %v3898_v21 = vpack.i.bf16 %v2775_v33, %v2773_v2  ;;  %v2877_v3 = vsel %vm609_vm4, %v2874_v8, %v2876_v13  ;;  %v2896_v58 = vrot.slane %v5458_v20, 7 }
 0x4b5   :  { %v2898_v22 = vrot.slane %v5461_v51, 7  ;;  %v2795_v27 = vsel %vm220_vm2, %v2793_v1, %v2794_v5  ;;  %v2797_v6 = vsel %vm220_vm2, %v2794_v5, %v2796_v63  ;;  %v2816_v30 = vrot.slane %v5458_v20, 3 }
 0x4b6   :  { %v2818_v42 = vrot.slane %v5461_v51, 3  ;;  %v2895_v46 = vrot.slane %v5447_v38, 7  ;;  %v3903_v23 = vpack.i.bf16 %v2877_v3, %v2875_v57  ;;  %v2815_v39 = vrot.slane %v5447_v38, 3 }
 0x4b7   :  { %3894 = vrot.lane.b32.xlu0 %v3893_v45, %s4081_s9  ;;  %v3908_v50 = vpack.i.bf16 %v2797_v6, %v2795_v27  ;;  %v2899_v31 = vsel %vm176_vm0, %v2896_v58, %v2898_v22  ;;  %v2835_v32 = vrot.slane %v5415_v34, 4  ;;  %v2838_v27 = vrot.slane %v5458_v20, 4 }
 0x4b8   :  { %3899 = vrot.lane.b32.xlu1 %v3898_v21, %s4081_s9  ;;  %v2897_v35 = vsel %vm176_vm0, %v2895_v46, %v2896_v58  ;;  %v2817_v52 = vsel %vm666_vm5, %v2815_v39, %v2816_v30  ;;  %v2819_v40 = vsel %vm666_vm5, %v2816_v30, %v2818_v42  ;;  %v2840_v6 = vrot.slane %v5461_v51, 4 }
 0x4b9   :  { %v3913_v37 = vpack.i.bf16 %v2899_v31, %v2897_v35  ;;  %v3918_v56 = vpack.i.bf16 %v2819_v40, %v2817_v52 }
 0x4bb   :  { %3904 = vrot.lane.b32.xlu0 %v3903_v23, %s4080_s21  ;;  %v2837_v23 = vrot.slane %v5447_v38, 4 }
 0x4bc   :  { %3909 = vrot.lane.b32.xlu1 %v3908_v50, %s4080_s21 }
 0x4bd   :  { %v2839_v40 = vsel %vm689_vm9, %v2837_v23, %v2838_v27 }
 0x4bf   :  { %3914 = vrot.lane.b32.xlu0 %v3913_v37, %s4082_s10  ;;  %v2841_v37 = vsel %vm689_vm9, %v2838_v27, %v2840_v6 }
 0x4c0   :  { %3919 = vrot.lane.b32.xlu1 %v3918_v56, %s4082_s10 }
 0x4c3   :  { %3194 = vrot.lane.b32.xlu0 %v5341_v62, %s4081_s9 }
 0x4c4   :  { %3196 = vrot.lane.b32.xlu1 %v5343_v41, %s4081_s9 }
 0x4c7   :  { %3198 = vrot.lane.b32.xlu0 %v5345_v24, %s4081_s9  ;;  %v2833_v24 = vrot.slane %v5412_v17, 4 }
 0x4c8   :  { %3200 = vrot.lane.b32.xlu1 %v5350_v36, %s4081_s9 }
 0x4cb   :  { %3210 = vrot.lane.b32.xlu0 %v5385_v55, %s4080_s21  ;;  %v2832_v55 = vrot.slane %v5398_v47, 4 }
 0x4cc   :  { %3212 = vrot.lane.b32.xlu1 %v5387_v15, %s4080_s21 }
 0x4cf   :  { %3214 = vrot.lane.b32.xlu0 %v5389_v48, %s4080_s21  ;;  %v2834_v48 = vsel %vm689_vm9, %v2832_v55, %v2833_v24 }
 0x4d0   :  { %3216 = vrot.lane.b32.xlu1 %v5391_v29, %s4080_s21  ;;  %v2836_v29 = vsel %vm689_vm9, %v2833_v24, %v2835_v32 }
 0x51d   :  { %v3865_v62 = vpop.permute.xlu0 %3864 }
 0x51e   :  { %v3870_v41 = vpop.permute.xlu1 %3869  ;;  %v3867_v49 = vunpack.i.h.bf16 %v3865_v62  ;;  %v3866_v36 = vunpack.i.l.bf16 %v3865_v62 }
 0x51f   :  { %v3872_v44 = vunpack.i.h.bf16 %v3870_v41  ;;  %v3871_v59 = vunpack.i.l.bf16 %v3870_v41 }
 0x520   :  { %v2924_v34 = vsel %vm470_vm7, %v2834_v48, %v3866_v36  ;;  %v2925_v26 = vsel %vm470_vm7, %v2836_v29, %v3867_v49 }
 0x521   :  { %v3875_v54 = vpop.permute.xlu0 %3874  ;;  %v2913_v8 = vsel %vm470_vm7, %v5412_v17, %v3872_v44  ;;  %v2912_v12 = vsel %vm470_vm7, %v5398_v47, %v3871_v59 }
 0x522   :  { %v3880_v15 = vpop.permute.xlu1 %3879  ;;  %v3877_v43 = vunpack.i.h.bf16 %v3875_v54  ;;  %v3876_v19 = vunpack.i.l.bf16 %v3875_v54 }
 0x523   :  { %v3882_v28 = vunpack.i.h.bf16 %v3880_v15  ;;  %v3881_v60 = vunpack.i.l.bf16 %v3880_v15 }
 0x524   :  { %v2928_v2 = vsel %vm93_vm3, %v2924_v34, %v3876_v19  ;;  %v2929_v33 = vsel %vm93_vm3, %v2925_v26, %v3877_v43 }
 0x525   :  { %v3885_v61 = vpop.permute.xlu0 %3884  ;;  %v2916_v63 = vsel %vm93_vm3, %v2912_v12, %v3881_v60  ;;  %v2917_v45 = vsel %vm93_vm3, %v2913_v8, %v3882_v28 }
 0x526   :  { %v3887_v53 = vunpack.i.h.bf16 %v3885_v61  ;;  %v3886_v11 = vunpack.i.l.bf16 %v3885_v61  ;;  %v3890_v13 = vpop.permute.xlu1 %3889 }
 0x527   :  { %v3892_v4 = vunpack.i.h.bf16 %v3890_v13  ;;  %v3891_v5 = vunpack.i.l.bf16 %v3890_v13 }
 0x528   :  { %v2932_v57 = vsel %vm529_vm8, %v2928_v2, %v3886_v11  ;;  %v2933_v17 = vsel %vm529_vm8, %v2929_v33, %v3887_v53 }
 0x529   :  { %v2920_v1 = vsel %vm529_vm8, %v2916_v63, %v3891_v5  ;;  %v2921_v47 = vsel %vm529_vm8, %v2917_v45, %v3892_v4  ;;  %v3895_v21 = vpop.permute.xlu0 %3894  ;;  %v2937_v3 = vpack.c.bf16 %v2933_v17, %v2932_v57 }
 0x52a   :  { %v2936_v58 = vpack.c.bf16 %v2921_v47, %v2920_v1  ;;  %v3900_v22 = vpop.permute.xlu1 %3899  ;;  %v3897_v30 = vunpack.i.h.bf16 %v3895_v21  ;;  %v3896_v42 = vunpack.i.l.bf16 %v3895_v21 }
 0x52b   :  { %3124 = vmatprep.mubr.bf16.mxu1 %v2937_v3  ;;  %v3902_v39 = vunpack.i.h.bf16 %v3900_v22  ;;  %v3901_v50 = vunpack.i.l.bf16 %v3900_v22 }
 0x52c   :  { %3125 = vmatmul.mubr.bf16.vlgmr.msra.gmra.mxu1 %v2936_v58  ;;  %v2927_v41 = vsel %vm470_vm7, %v2841_v37, %v3897_v30  ;;  %v2926_v51 = vsel %vm470_vm7, %v2839_v40, %v3896_v42 }
 0x52d   :  { %v3905_v46 = vpop.permute.xlu0 %3904  ;;  %v2915_v24 = vsel %vm470_vm7, %v5458_v20, %v3902_v39  ;;  %v2914_v49 = vsel %vm470_vm7, %v5447_v38, %v3901_v50  ;;  %v3262_v39 = vld [vmem:[%s5617_s4] ss:$0 sm:$0xff] }
 0x52e   :  { %v3910_v35 = vpop.permute.xlu1 %3909  ;;  %v3907_v31 = vunpack.i.h.bf16 %v3905_v46  ;;  %v3906_v52 = vunpack.i.l.bf16 %v3905_v46 }
 0x52f   :  { %v3912_v56 = vunpack.i.h.bf16 %v3910_v35  ;;  %v3911_v62 = vunpack.i.l.bf16 %v3910_v35  ;;  %v135_v35 = vadd.f32 %v3262_v39, %v4758_v25 }
 0x530   :  { %v2930_v44 = vsel %vm93_vm3, %v2926_v51, %v3906_v52  ;;  %v2931_v59 = vsel %vm93_vm3, %v2927_v41, %v3907_v31  ;;  %v138_v41 = vadd.f32 %v3262_v39, %v4762_v10 }
 0x531   :  { %v3915_v32 = vpop.permute.xlu0 %3914  ;;  %v2918_v19 = vsel %vm93_vm3, %v2914_v49, %v3911_v62  ;;  %v2919_v48 = vsel %vm93_vm3, %v2915_v24, %v3912_v56 }
 0x532   :  { %v3917_v36 = vunpack.i.h.bf16 %v3915_v32  ;;  %v3916_v54 = vunpack.i.l.bf16 %v3915_v32  ;;  %v3920_v55 = vpop.permute.xlu1 %3919 }
 0x533   :  { %v3922_v15 = vunpack.i.h.bf16 %v3920_v55  ;;  %v3921_v43 = vunpack.i.l.bf16 %v3920_v55 }
 0x534   :  { %v2934_v29 = vsel %vm529_vm8, %v2930_v44, %v3916_v54  ;;  %v2935_v20 = vsel %vm529_vm8, %v2931_v59, %v3917_v36  ;;  %v146_v44 = vadd.f32 %v4760_v7, %v3262_v39 }
 0x535   :  { %v2940_v28 = vpack.c.bf16 %v2935_v20, %v2934_v29  ;;  %v2922_v38 = vsel %vm529_vm8, %v2918_v19, %v3921_v43  ;;  %v2923_v60 = vsel %vm529_vm8, %v2919_v48, %v3922_v15  ;;  %v3195_v22 = vpop.permute.xlu0 %3194 }
 0x536   :  { %v2939_v34 = vpack.c.bf16 %v2923_v60, %v2922_v38  ;;  %v3197_v27 = vpop.permute.xlu1 %3196  ;;  %v3238_v50 = vsel %vm470_vm7, %v4766_v18, %v3195_v22 }
 0x537   :  { %3132 = vmatprep.mubr.bf16.mxu1 %v2940_v28  ;;  %v3239_v62 = vsel %vm470_vm7, %v4777_v9, %v3197_v27  ;;  %v143_v9 = vadd.f32 %v4756_v16, %v3262_v39 }
 0x538   :  { %3133 = vmatmul.mubr.bf16.gmra.mxu1 %v2939_v34 }
 0x539   :  { %v3199_v6 = vpop.permute.xlu0 %3198 }
 0x53a   :  { %v3201_v30 = vpop.permute.xlu1 %3200  ;;  %v3240_v24 = vsel %vm470_vm7, %v4764_v14, %v3199_v6 }
 0x53b   :  { %v3241_v55 = vsel %vm470_vm7, %v4771_v0, %v3201_v30 }
 0x53d   :  { %v3211_v42 = vpop.permute.xlu0 %3210 }
 0x53e   :  { %v3213_v46 = vpop.permute.xlu1 %3212  ;;  %v3242_v31 = vsel %vm93_vm3, %v3238_v50, %v3211_v42 }
 0x53f   :  { %v3243_v51 = vsel %vm93_vm3, %v3239_v62, %v3213_v46 }
 0x541   :  { %v3215_v23 = vpop.permute.xlu0 %3214 }
 0x542   :  { %v3217_v52 = vpop.permute.xlu1 %3216  ;;  %v3244_v10 = vsel %vm93_vm3, %v3240_v24, %v3215_v23 }
 0x543   :  { %v3245_v59 = vsel %vm93_vm3, %v3241_v55, %v3217_v52 }
 0x570   :  { %v3657_v26 = vpop.f32.mrf.mxu0 }
 0x572   :  { %v3175_v61 = vpop.f32.mrf.mxu0 }
 0x574   :  { %v3658_v11 = vpop.f32.mrf.mxu0 }
 0x576   :  { %v3178_v5 = vpop.f32.mrf.mxu0 }
 0x5ec   :  { %v3583_v8 = vpop.f32.mrf.mxu1 }
 0x5ee   :  { %v3584_v12 = vpop.f32.mrf.mxu1 }
 0x5ef   :  { %v3585_v53 = vadd.f32 %v3584_v12, %v3583_v8 }
 0x5f0   :  { %v3586_v13 = vpop.f32.mrf.mxu1 }
 0x5f1   :  { %v3176_v2 = vadd.f32 %v3585_v53, %v3175_v61 }
 0x5f2   :  { %v3587_v33 = vpop.f32.mrf.mxu1 }
 0x5f3   :  { %v3588_v4 = vadd.f32 %v3587_v33, %v3586_v13  ;;  %3226 = vrot.lane.b32.xlu0 %v3176_v2, %s4082_s10 }
 0x5f5   :  { %v3179_v63 = vadd.f32 %v3588_v4, %v3178_v5 }
 0x5f7   :  { %3228 = vrot.lane.b32.xlu1 %v3179_v63, %s4082_s10 }
 0x5f8   :  { %v3589_v45 = vpop.f32.mrf.mxu1 }
 0x5fa   :  { %v3590_v57 = vpop.f32.mrf.mxu1 }
 0x5fb   :  { %v3591_v17 = vadd.f32 %v3590_v57, %v3589_v45 }
 0x5fc   :  { %v3592_v1 = vpop.f32.mrf.mxu1 }
 0x5fd   :  { %v3184_v47 = vadd.f32 %v3657_v26, %v3591_v17 }
 0x5fe   :  { %v3593_v21 = vpop.f32.mrf.mxu1 }
 0x5ff   :  { %v3594_v3 = vadd.f32 %v3593_v21, %v3592_v1  ;;  %3230 = vrot.lane.b32.xlu0 %v3184_v47, %s4082_s10 }
 0x601   :  { %v3187_v58 = vadd.f32 %v3658_v11, %v3594_v3 }
 0x603   :  { %3232 = vrot.lane.b32.xlu1 %v3187_v58, %s4082_s10 }
 0x665   :  { %v3227_v40 = vpop.permute.xlu0 %3226 }
 0x666   :  { %v3246_v37 = vsel %vm529_vm8, %v3242_v31, %v3227_v40 }
 0x667   :  { %v3250_v56 = vadd.f32 %v3246_v37, %v135_v35 }
 0x669   :  { %3254 = vst [vmem:[%s5618_s14] sm:$0xff] %v3250_v56  ;;  %v3229_v18 = vpop.permute.xlu1 %3228 }
 0x66a   :  { %v3247_v25 = vsel %vm529_vm8, %v3243_v51, %v3229_v18 }
 0x66b   :  { %v3251_v32 = vadd.f32 %v3247_v25, %v138_v41 }
 0x66d   :  { %3255 = vst [vmem:[%s5618_s14 + $0x8] sm:$0xff] %v3251_v32 }
 0x671   :  { %v3231_v49 = vpop.permute.xlu0 %3230 }
 0x672   :  { %v3248_v36 = vsel %vm529_vm8, %v3244_v10, %v3231_v49 }
 0x673   :  { %v3252_v54 = vadd.f32 %v3248_v36, %v143_v9 }
 0x675   :  { %3256 = vst [vmem:[%s5618_s14 + $0x10] sm:$0xff] %v3252_v54  ;;  %v3233_v14 = vpop.permute.xlu1 %3232 }
 0x676   :  { %v3249_v16 = vsel %vm529_vm8, %v3245_v59, %v3233_v14 }
 0x677   :  { %v3253_v15 = vadd.f32 %v3249_v16, %v146_v44 }
 0x679   :  { %3257 = vst [vmem:[%s5618_s14 + $0x18] sm:$0xff] %v3253_v15 }

</bundles_post_ra>
